<compile_context>
chip_gen: v6e
topology: v6e:2x2x1
jax: 0.10.0
libtpu: 0.0.40
codegen_flags: <defaults>
</compile_context>

<pallas_src>
import numpy as np
import jax
import jax.numpy as jnp
from jax import lax
from jax.experimental import pallas as pl
from jax.experimental.pallas import tpu as pltpu


def _make_lstm_kernel(t_block, h_pad, mm_dtype):
    """Kernel factory closed over static time-block size / padded hidden / matmul dtype."""

    HP = h_pad

    def kernel(x_ref, wih_ref, whh_ref, b_ref, len_ref, out_ref, h_ref, c_ref):
        # x_ref   : (t_block*B_blk, D)   time-major flattened input block
        #                                (row = t_local*B_blk + b_local), mm_dtype
        # wih_ref : (D, 4*HP)            W_ih^T, gate order (i,f,o,g), mm_dtype, resident
        # whh_ref : (HP, 4*HP)           W_hh^T, gate order (i,f,o,g), mm_dtype, resident
        # b_ref   : (1, 4*HP)  f32       b_ih + b_hh, gate order (i,f,o,g), resident
        # len_ref : (B_blk, HP) int32    lengths broadcast lane-dense (hoisted mask source)
        # out_ref : (B_blk, t_block*HP)  lane-dense output block
        # h_ref / c_ref : (B_blk, HP) f32 VMEM scratch, persist across time blocks
        Bb = h_ref.shape[0]

        @pl.when(pl.program_id(1) == 0)        # first time block of this batch block
        def _init():
            h_ref[...] = jnp.zeros_like(h_ref)
            c_ref[...] = jnp.zeros_like(c_ref)

        # Hoisted loop-invariant loads.
        wih = wih_ref[...]
        whh = whh_ref[...]
        bias = b_ref[...]
        lens_b = len_ref[...]                  # (Bb, HP) int32, already lane-broadcast
        t0 = pl.program_id(1) * t_block        # global time offset of this block

        # Input projection hoisted out of the recurrence:
        # one MXU (t_block*Bb, D) x (D, 4*HP) matmul per time block, f32 accumulate.
        gates_x = jnp.dot(x_ref[...], wih,
                          preferred_element_type=jnp.float32) + bias

        h = h_ref[...]
        c = c_ref[...]
        for t in range(t_block):               # static unroll across steps
            gates = gates_x[t * Bb:(t + 1) * Bb, :] + jnp.dot(
                h.astype(mm_dtype), whh, preferred_element_type=jnp.float32)
            # Gate order (i, f, o, g): one sigmoid over 3*HP lanes, one tanh over HP.
            sig = jax.nn.sigmoid(gates[:, :3 * HP])
            g_g = jnp.tanh(gates[:, 3 * HP:])
            i_g = sig[:, 0 * HP:1 * HP]
            f_g = sig[:, 1 * HP:2 * HP]
            o_g = sig[:, 2 * HP:3 * HP]
            c = f_g * c + i_g * g_g
            h = o_g * jnp.tanh(c)
            # pack/pad_packed semantics: outputs past a sequence's length are zero.
            # Single full-vreg compare+select (off the h->h critical path), then a
            # lane-aligned 128-wide store — no concat, no masked partial vst.
            valid = (t0 + t) < lens_b
            out_ref[:, t * HP:(t + 1) * HP] = jnp.where(valid, h, 0.0)

        h_ref[...] = h
        c_ref[...] = c

    return kernel


def encoder_forward(sent_variable, sent_len, w_ih, w_hh, b_ih, b_hh, *,
                    t_block=16, b_block=8, matmul_dtype=jnp.bfloat16):
    """Mirrors Encoder.forward for config.model='LSTM', nlayers=1, unidirectional.

    sent_variable : (B, T, D) float32
    sent_len      : host numpy int array of shape (B,)  (as in the PyTorch module)
    w_ih          : (4H, D), w_hh : (4H, H), b_ih / b_hh : (4H,)  (PyTorch layout,
                    gate order i,f,g,o)
    matmul_dtype  : dtype for MXU inputs (bf16 on v6e/v7x; f32 path kept for checks).
                    All gate/elementwise math stays f32.
    returns       : (B, max(sent_len), H) float32
    """
    B, T, D = sent_variable.shape
    H = w_hh.shape[1]
    HP = ((H + 127) // 128) * 128            # pad hidden to full 128-lane vregs
    sent_len = np.asarray(sent_len)
    max_len = int(sent_len.max())            # host numpy -> no device sync
    assert max_len <= T, "sent_len must not exceed the padded sequence length T"

    t_run = ((max_len + t_block - 1) // t_block) * t_block
    B_pad = ((B + b_block - 1) // b_block) * b_block
    nb = B_pad // b_block                    # batch blocks ("parallel" grid axis)
    nt = t_run // t_block                    # time blocks  ("arbitrary" grid axis)

    x = jnp.asarray(sent_variable, jnp.float32)
    if t_run <= T:
        x = x[:, :t_run, :]
    else:
        x = jnp.pad(x, ((0, 0), (0, t_run - T), (0, 0)))
    if B_pad > B:
        x = jnp.pad(x, ((0, B_pad - B), (0, 0), (0, 0)))
    # Per batch block: time-major + flattened so each time block is one contiguous
    # (t_block*b_block, D) matmul LHS and every per-step slice is sublane-aligned.
    # row = bi*(t_run*b_block) + t*b_block + b_local
    x_flat = (x.reshape(nb, b_block, t_run, D)
                .transpose(0, 2, 1, 3)
                .reshape(nb * t_run * b_block, D)).astype(matmul_dtype)

    def _reorder_and_pad_cols(wT):
        # wT: (rows, 4H) columns in PyTorch order [i|f|g|o]; -> [i|f|o|g], each
        # gate zero-padded from H to HP columns (exact: padded lanes stay 0).
        i_w, f_w, g_w, o_w = (wT[:, k * H:(k + 1) * H] for k in range(4))
        pad = lambda cols: jnp.pad(cols, ((0, 0), (0, HP - H)))
        return jnp.concatenate([pad(i_w), pad(f_w), pad(o_w), pad(g_w)], axis=-1)

    wih_t = _reorder_and_pad_cols(jnp.asarray(w_ih, jnp.float32).T)          # (D, 4HP)
    whh_t = _reorder_and_pad_cols(jnp.asarray(w_hh, jnp.float32).T)          # (H, 4HP)
    whh_t = jnp.pad(whh_t, ((0, HP - H), (0, 0)))                            # (HP, 4HP)
    wih_t = wih_t.astype(matmul_dtype)
    whh_t = whh_t.astype(matmul_dtype)
    bias = _reorder_and_pad_cols(
        (jnp.asarray(b_ih, jnp.float32) + jnp.asarray(b_hh, jnp.float32)
         ).reshape(1, 4 * H))                                                # (1, 4HP) f32

    # Lengths as a lane-dense (B_pad, HP) int32 tile (one (8,128) tile per batch
    # block, loaded once per grid step; padded batch rows get length 0 -> masked).
    lens_pad = np.zeros((B_pad,), np.int32)
    lens_pad[:B] = sent_len.astype(np.int32)
    lens_lane = jnp.broadcast_to(jnp.asarray(lens_pad, jnp.int32)[:, None],
                                 (B_pad, HP))

    kernel = _make_lstm_kernel(t_block, HP, matmul_dtype)

    out_flat = pl.pallas_call(
        kernel,
        out_shape=jax.ShapeDtypeStruct((B_pad, t_run * HP), jnp.float32),
        grid_spec=pltpu.PrefetchScalarGridSpec(
            num_scalar_prefetch=0,
            grid=(nb, nt),
            in_specs=[
                # x: row-block (bi*nt + ti) of the flattened time-major input.
                pl.BlockSpec((t_block * b_block, D),
                             lambda bi, ti, _nt=nt: (bi * _nt + ti, 0)),
                pl.BlockSpec((D, 4 * HP), lambda bi, ti: (0, 0)),     # W_ih^T (resident)
                pl.BlockSpec((HP, 4 * HP), lambda bi, ti: (0, 0)),    # W_hh^T (resident)
                pl.BlockSpec((1, 4 * HP), lambda bi, ti: (0, 0)),     # bias   (resident)
                pl.BlockSpec((b_block, HP), lambda bi, ti: (bi, 0)),  # lengths (lane-dense)
            ],
            out_specs=pl.BlockSpec((b_block, t_block * HP), lambda bi, ti: (bi, ti)),
            scratch_shapes=[
                pltpu.VMEM((b_block, HP), jnp.float32),   # h carry (per batch block)
                pltpu.VMEM((b_block, HP), jnp.float32),   # c carry
            ],
        ),
        compiler_params=pltpu.CompilerParams(
            # Batch blocks are independent (megacore/v7x 2-TC sharding);
            # the time axis carries the recurrence -> sequential.
            dimension_semantics=("parallel", "arbitrary"),
        ),
    )(x_flat, wih_t, whh_t, bias, lens_lane)

    out = out_flat.reshape(B_pad, t_run, HP)
    # pad_packed_sequence pads only to the longest sequence; drop H/batch padding.
    return out[:B, :max_len, :H]


def _reference_lstm(sent_variable, sent_len, w_ih, w_hh, b_ih, b_hh):
    """Pure-JAX reference (same semantics) for the correctness check."""
    B, T, D = sent_variable.shape
    H = w_hh.shape[1]
    bias = b_ih + b_hh

    def step(carry, x_t):
        h, c = carry
        gates = x_t @ w_ih.T + h @ w_hh.T + bias
        i_g = jax.nn.sigmoid(gates[:, 0 * H:1 * H])
        f_g = jax.nn.sigmoid(gates[:, 1 * H:2 * H])
        g_g = jnp.tanh(gates[:, 2 * H:3 * H])
        o_g = jax.nn.sigmoid(gates[:, 3 * H:4 * H])
        c_new = f_g * c + i_g * g_g
        h_new = o_g * jnp.tanh(c_new)
        return (h_new, c_new), h_new

    xs = jnp.transpose(sent_variable, (1, 0, 2))  # (T, B, D)
    (_, _), hs = lax.scan(step, (jnp.zeros((B, H)), jnp.zeros((B, H))), xs)
    hs = jnp.transpose(hs, (1, 0, 2))             # (B, T, H)
    mask = (jnp.arange(T)[None, :, None] < jnp.asarray(sent_len)[:, None, None])
    hs = jnp.where(mask, hs, 0.0)
    max_len = int(np.max(np.asarray(sent_len)))
    return hs[:, :max_len, :]


if __name__ == "__main__":
    # Small shapes consistent with the module's forward (exercise both grid axes:
    # 2 batch blocks x 2 time blocks).
    B, T = 12, 32        # batch, padded sequence length
    input_size = 16      # Encoder input_size
    hidden_size = 32     # Encoder hidden_size

    key = jax.random.PRNGKey(0)
    k_x, k_wih, k_whh, k_bih, k_bhh = jax.random.split(key, 5)

    sent_variable = jax.random.normal(k_x, (B, T, input_size), dtype=jnp.float32)
    sent_len = np.array([30, 9, 17, 22, 5, 32, 1, 14, 27, 3, 19, 11],
                        dtype=np.int32)  # variable lengths

    # Deterministic LSTM parameter init (PyTorch shapes: W_ih (4H, D), W_hh (4H, H)).
    bound = 1.0 / np.sqrt(hidden_size)
    w_ih = jax.random.uniform(k_wih, (4 * hidden_size, input_size),
                              minval=-bound, maxval=bound, dtype=jnp.float32)
    w_hh = jax.random.uniform(k_whh, (4 * hidden_size, hidden_size),
                              minval=-bound, maxval=bound, dtype=jnp.float32)
    b_ih = jax.random.uniform(k_bih, (4 * hidden_size,),
                              minval=-bound, maxval=bound, dtype=jnp.float32)
    b_hh = jax.random.uniform(k_bhh, (4 * hidden_size,),
                              minval=-bound, maxval=bound, dtype=jnp.float32)

    ref = _reference_lstm(sent_variable, sent_len, w_ih, w_hh, b_ih, b_hh)
    ref = np.asarray(jax.block_until_ready(ref))

    # f32 matmul path: exact-semantics check (padding/reordering is numerically exact).
    out_f32 = encoder_forward(sent_variable, sent_len, w_ih, w_hh, b_ih, b_hh,
                              t_block=16, matmul_dtype=jnp.float32)
    out_f32 = np.asarray(jax.block_until_ready(out_f32))
    np.testing.assert_allclose(out_f32, ref, rtol=2e-5, atol=2e-5)

    # bf16 MXU-input path (the performance configuration on v6e/v7x): looser check.
    out_bf16 = encoder_forward(sent_variable, sent_len, w_ih, w_hh, b_ih, b_hh,
                               t_block=16, matmul_dtype=jnp.bfloat16)
    out_bf16 = np.asarray(jax.block_until_ready(out_bf16))
    np.testing.assert_allclose(out_bf16, ref, rtol=5e-2, atol=5e-2)

    print("KERNEL_OK")
</pallas_src>

<mosaic_0001>
module attributes {stable_mosaic.version = 11 : i64} {
  func.func @kernel(%arg0: i32, %arg1: i32, %arg2: memref<128x16xf32, #tpu.memory_space<vmem>>, %arg3: memref<16x512xf32, #tpu.memory_space<vmem>>, %arg4: memref<128x512xf32, #tpu.memory_space<vmem>>, %arg5: memref<1x512xf32, #tpu.memory_space<vmem>>, %arg6: memref<8x128xi32, #tpu.memory_space<vmem>>, %arg7: memref<8x2048xf32, #tpu.memory_space<vmem>>, %arg8: memref<8x128xf32, #tpu.memory_space<vmem>>, %arg9: memref<8x128xf32, #tpu.memory_space<vmem>>) attributes {dimension_semantics = [#tpu.dimension_semantics<parallel>, #tpu.dimension_semantics<arbitrary>], iteration_bounds = array<i64: 2, 2>, scalar_prefetch = 0 : i64, scratch_operands = 2 : i64, tpu.core_type = #tpu.core_type<tc>, window_params = [{transform_indices = @transform_0, window_bounds = array<i64: 128, 16>}, {pipeline_mode = #tpu.pipeline_mode<synchronous>, transform_indices = @transform_1, window_bounds = array<i64: 16, 512>}, {pipeline_mode = #tpu.pipeline_mode<synchronous>, transform_indices = @transform_2, window_bounds = array<i64: 128, 512>}, {pipeline_mode = #tpu.pipeline_mode<synchronous>, transform_indices = @transform_3, window_bounds = array<i64: 1, 512>}, {transform_indices = @transform_4, window_bounds = array<i64: 8, 128>}, {transform_indices = @transform_5, window_bounds = array<i64: 8, 2048>}]} {
    %c0_i32 = arith.constant 0 : i32
    %0 = arith.cmpi eq, %arg1, %c0_i32 : i32
    %1 = arith.extui %0 : i1 to i32
    %c0_i32_0 = arith.constant 0 : i32
    %2 = arith.cmpi ne, %1, %c0_i32_0 : i32
    scf.if %2 {
      %cst_84 = arith.constant 0.000000e+00 : f32
      %416 = vector.broadcast %cst_84 : f32 to vector<8x128xf32>
      %c0_85 = arith.constant 0 : index
      %c0_86 = arith.constant 0 : index
      %417 = vector.load %arg8[%c0_85, %c0_86] : memref<8x128xf32, #tpu.memory_space<vmem>>, vector<8x128xf32>
      tpu.vector_store %arg8[%c0_85, %c0_86], %416 {strides = array<i32>} : memref<8x128xf32, #tpu.memory_space<vmem>>, vector<8x128xf32>,
      %cst_87 = arith.constant 0.000000e+00 : f32
      %418 = vector.broadcast %cst_87 : f32 to vector<8x128xf32>
      %c0_88 = arith.constant 0 : index
      %c0_89 = arith.constant 0 : index
      %419 = vector.load %arg9[%c0_88, %c0_89] : memref<8x128xf32, #tpu.memory_space<vmem>>, vector<8x128xf32>
      tpu.vector_store %arg9[%c0_88, %c0_89], %418 {strides = array<i32>} : memref<8x128xf32, #tpu.memory_space<vmem>>, vector<8x128xf32>,
    } else {
    }
    %c0 = arith.constant 0 : index
    %c0_1 = arith.constant 0 : index
    %3 = vector.load %arg3[%c0, %c0_1] : memref<16x512xf32, #tpu.memory_space<vmem>>, vector<16x512xf32>
    %c0_2 = arith.constant 0 : index
    %c0_3 = arith.constant 0 : index
    %4 = vector.load %arg4[%c0_2, %c0_3] : memref<128x512xf32, #tpu.memory_space<vmem>>, vector<128x512xf32>
    %c0_4 = arith.constant 0 : index
    %c0_5 = arith.constant 0 : index
    %5 = vector.load %arg5[%c0_4, %c0_5] : memref<1x512xf32, #tpu.memory_space<vmem>>, vector<1x512xf32>
    %c0_6 = arith.constant 0 : index
    %c0_7 = arith.constant 0 : index
    %6 = vector.load %arg6[%c0_6, %c0_7] : memref<8x128xi32, #tpu.memory_space<vmem>>, vector<8x128xi32>
    %c16_i32 = arith.constant 16 : i32
    %7 = arith.muli %arg1, %c16_i32 : i32
    %c0_8 = arith.constant 0 : index
    %c0_9 = arith.constant 0 : index
    %8 = vector.load %arg2[%c0_8, %c0_9] : memref<128x16xf32, #tpu.memory_space<vmem>>, vector<128x16xf32>
    %cst = arith.constant dense<0.000000e+00> : vector<128x512xf32>
    %9 = tpu.matmul %8, %3, %cst {dimension_numbers = #tpu.dot_dimension_numbers<[1], [0], [0], [1], [0, 0, 1, 1], [], []>} : vector<128x16xf32>, vector<16x512xf32>, vector<128x512xf32> -> vector<128x512xf32>
    %10 = vector.broadcast %5 : vector<1x512xf32> to vector<128x512xf32>
    %11 = arith.addf %9, %10 : vector<128x512xf32>
    %c0_10 = arith.constant 0 : index
    %c0_11 = arith.constant 0 : index
    %12 = vector.load %arg8[%c0_10, %c0_11] : memref<8x128xf32, #tpu.memory_space<vmem>>, vector<8x128xf32>
    %c0_12 = arith.constant 0 : index
    %c0_13 = arith.constant 0 : index
    %13 = vector.load %arg9[%c0_12, %c0_13] : memref<8x128xf32, #tpu.memory_space<vmem>>, vector<8x128xf32>
    %14 = vector.extract_strided_slice %11 {offsets = [0, 0], sizes = [8, 512], strides = [1, 1]} : vector<128x512xf32> to vector<8x512xf32>
    %cst_14 = arith.constant dense<0.000000e+00> : vector<8x512xf32>
    %15 = tpu.matmul %12, %4, %cst_14 {dimension_numbers = #tpu.dot_dimension_numbers<[1], [0], [0], [1], [0, 0, 1, 1], [], []>} : vector<8x128xf32>, vector<128x512xf32>, vector<8x512xf32> -> vector<8x512xf32>
    %16 = arith.addf %14, %15 : vector<8x512xf32>
    %17 = vector.extract_strided_slice %16 {offsets = [0, 0], sizes = [8, 384], strides = [1, 1]} : vector<8x512xf32> to vector<8x384xf32>
    %18 = arith.negf %17 : vector<8x384xf32>
    %19 = math.exp %18 : vector<8x384xf32>
    %cst_15 = arith.constant 1.000000e+00 : f32
    %20 = vector.broadcast %cst_15 : f32 to vector<8x384xf32>
    %21 = arith.addf %20, %19 : vector<8x384xf32>
    %22 = arith.divf %20, %21 : vector<8x384xf32>
    %23 = vector.extract_strided_slice %16 {offsets = [0, 384], sizes = [8, 128], strides = [1, 1]} : vector<8x512xf32> to vector<8x128xf32>
    %24 = math.tanh %23 : vector<8x128xf32>
    %25 = vector.extract_strided_slice %22 {offsets = [0, 0], sizes = [8, 128], strides = [1, 1]} : vector<8x384xf32> to vector<8x128xf32>
    %26 = vector.extract_strided_slice %22 {offsets = [0, 128], sizes = [8, 128], strides = [1, 1]} : vector<8x384xf32> to vector<8x128xf32>
    %27 = vector.extract_strided_slice %22 {offsets = [0, 256], sizes = [8, 128], strides = [1, 1]} : vector<8x384xf32> to vector<8x128xf32>
    %28 = arith.mulf %26, %13 : vector<8x128xf32>
    %29 = arith.mulf %25, %24 : vector<8x128xf32>
    %30 = arith.addf %28, %29 : vector<8x128xf32>
    %31 = math.tanh %30 : vector<8x128xf32>
    %32 = arith.mulf %27, %31 : vector<8x128xf32>
    %c0_i32_16 = arith.constant 0 : i32
    %33 = arith.addi %7, %c0_i32_16 : i32
    %34 = vector.broadcast %33 : i32 to vector<8x128xi32>
    %35 = arith.cmpi slt, %34, %6 : vector<8x128xi32>
    %cst_17 = arith.constant 0.000000e+00 : f32
    %36 = vector.broadcast %cst_17 : f32 to vector<8x128xf32>
    %37 = arith.select %35, %32, %36 : vector<8x128xi1>, vector<8x128xf32>
    %c0_18 = arith.constant 0 : index
    %c0_19 = arith.constant 0 : index
    %38 = vector.load %arg7[%c0_18, %c0_19] : memref<8x2048xf32, #tpu.memory_space<vmem>>, vector<8x128xf32>
    tpu.vector_store %arg7[%c0_18, %c0_19], %37 {strides = array<i32>} : memref<8x2048xf32, #tpu.memory_space<vmem>>, vector<8x128xf32>,
    %39 = vector.extract_strided_slice %11 {offsets = [8, 0], sizes = [8, 512], strides = [1, 1]} : vector<128x512xf32> to vector<8x512xf32>
    %cst_20 = arith.constant dense<0.000000e+00> : vector<8x512xf32>
    %40 = tpu.matmul %32, %4, %cst_20 {dimension_numbers = #tpu.dot_dimension_numbers<[1], [0], [0], [1], [0, 0, 1, 1], [], []>} : vector<8x128xf32>, vector<128x512xf32>, vector<8x512xf32> -> vector<8x512xf32>
    %41 = arith.addf %39, %40 : vector<8x512xf32>
    %42 = vector.extract_strided_slice %41 {offsets = [0, 0], sizes = [8, 384], strides = [1, 1]} : vector<8x512xf32> to vector<8x384xf32>
    %43 = arith.negf %42 : vector<8x384xf32>
    %44 = math.exp %43 : vector<8x384xf32>
    %cst_21 = arith.constant 1.000000e+00 : f32
    %45 = vector.broadcast %cst_21 : f32 to vector<8x384xf32>
    %46 = arith.addf %45, %44 : vector<8x384xf32>
    %47 = arith.divf %45, %46 : vector<8x384xf32>
    %48 = vector.extract_strided_slice %41 {offsets = [0, 384], sizes = [8, 128], strides = [1, 1]} : vector<8x512xf32> to vector<8x128xf32>
    %49 = math.tanh %48 : vector<8x128xf32>
    %50 = vector.extract_strided_slice %47 {offsets = [0, 0], sizes = [8, 128], strides = [1, 1]} : vector<8x384xf32> to vector<8x128xf32>
    %51 = vector.extract_strided_slice %47 {offsets = [0, 128], sizes = [8, 128], strides = [1, 1]} : vector<8x384xf32> to vector<8x128xf32>
    %52 = vector.extract_strided_slice %47 {offsets = [0, 256], sizes = [8, 128], strides = [1, 1]} : vector<8x384xf32> to vector<8x128xf32>
    %53 = arith.mulf %51, %30 : vector<8x128xf32>
    %54 = arith.mulf %50, %49 : vector<8x128xf32>
    %55 = arith.addf %53, %54 : vector<8x128xf32>
    %56 = math.tanh %55 : vector<8x128xf32>
    %57 = arith.mulf %52, %56 : vector<8x128xf32>
    %c1_i32 = arith.constant 1 : i32
    %58 = arith.addi %7, %c1_i32 : i32
    %59 = vector.broadcast %58 : i32 to vector<8x128xi32>
    %60 = arith.cmpi slt, %59, %6 : vector<8x128xi32>
    %cst_22 = arith.constant 0.000000e+00 : f32
    %61 = vector.broadcast %cst_22 : f32 to vector<8x128xf32>
    %62 = arith.select %60, %57, %61 : vector<8x128xi1>, vector<8x128xf32>
    %c0_23 = arith.constant 0 : index
    %c128 = arith.constant 128 : index
    %63 = vector.load %arg7[%c0_23, %c128] : memref<8x2048xf32, #tpu.memory_space<vmem>>, vector<8x128xf32>
    tpu.vector_store %arg7[%c0_23, %c128], %62 {strides = array<i32>} : memref<8x2048xf32, #tpu.memory_space<vmem>>, vector<8x128xf32>,
    %64 = vector.extract_strided_slice %11 {offsets = [16, 0], sizes = [8, 512], strides = [1, 1]} : vector<128x512xf32> to vector<8x512xf32>
    %cst_24 = arith.constant dense<0.000000e+00> : vector<8x512xf32>
    %65 = tpu.matmul %57, %4, %cst_24 {dimension_numbers = #tpu.dot_dimension_numbers<[1], [0], [0], [1], [0, 0, 1, 1], [], []>} : vector<8x128xf32>, vector<128x512xf32>, vector<8x512xf32> -> vector<8x512xf32>
    %66 = arith.addf %64, %65 : vector<8x512xf32>
    %67 = vector.extract_strided_slice %66 {offsets = [0, 0], sizes = [8, 384], strides = [1, 1]} : vector<8x512xf32> to vector<8x384xf32>
    %68 = arith.negf %67 : vector<8x384xf32>
    %69 = math.exp %68 : vector<8x384xf32>
    %cst_25 = arith.constant 1.000000e+00 : f32
    %70 = vector.broadcast %cst_25 : f32 to vector<8x384xf32>
    %71 = arith.addf %70, %69 : vector<8x384xf32>
    %72 = arith.divf %70, %71 : vector<8x384xf32>
    %73 = vector.extract_strided_slice %66 {offsets = [0, 384], sizes = [8, 128], strides = [1, 1]} : vector<8x512xf32> to vector<8x128xf32>
    %74 = math.tanh %73 : vector<8x128xf32>
    %75 = vector.extract_strided_slice %72 {offsets = [0, 0], sizes = [8, 128], strides = [1, 1]} : vector<8x384xf32> to vector<8x128xf32>
    %76 = vector.extract_strided_slice %72 {offsets = [0, 128], sizes = [8, 128], strides = [1, 1]} : vector<8x384xf32> to vector<8x128xf32>
    %77 = vector.extract_strided_slice %72 {offsets = [0, 256], sizes = [8, 128], strides = [1, 1]} : vector<8x384xf32> to vector<8x128xf32>
    %78 = arith.mulf %76, %55 : vector<8x128xf32>
    %79 = arith.mulf %75, %74 : vector<8x128xf32>
    %80 = arith.addf %78, %79 : vector<8x128xf32>
    %81 = math.tanh %80 : vector<8x128xf32>
    %82 = arith.mulf %77, %81 : vector<8x128xf32>
    %c2_i32 = arith.constant 2 : i32
    %83 = arith.addi %7, %c2_i32 : i32
    %84 = vector.broadcast %83 : i32 to vector<8x128xi32>
    %85 = arith.cmpi slt, %84, %6 : vector<8x128xi32>
    %cst_26 = arith.constant 0.000000e+00 : f32
    %86 = vector.broadcast %cst_26 : f32 to vector<8x128xf32>
    %87 = arith.select %85, %82, %86 : vector<8x128xi1>, vector<8x128xf32>
    %c0_27 = arith.constant 0 : index
    %c256 = arith.constant 256 : index
    %88 = vector.load %arg7[%c0_27, %c256] : memref<8x2048xf32, #tpu.memory_space<vmem>>, vector<8x128xf32>
    tpu.vector_store %arg7[%c0_27, %c256], %87 {strides = array<i32>} : memref<8x2048xf32, #tpu.memory_space<vmem>>, vector<8x128xf32>,
    %89 = vector.extract_strided_slice %11 {offsets = [24, 0], sizes = [8, 512], strides = [1, 1]} : vector<128x512xf32> to vector<8x512xf32>
    %cst_28 = arith.constant dense<0.000000e+00> : vector<8x512xf32>
    %90 = tpu.matmul %82, %4, %cst_28 {dimension_numbers = #tpu.dot_dimension_numbers<[1], [0], [0], [1], [0, 0, 1, 1], [], []>} : vector<8x128xf32>, vector<128x512xf32>, vector<8x512xf32> -> vector<8x512xf32>
    %91 = arith.addf %89, %90 : vector<8x512xf32>
    %92 = vector.extract_strided_slice %91 {offsets = [0, 0], sizes = [8, 384], strides = [1, 1]} : vector<8x512xf32> to vector<8x384xf32>
    %93 = arith.negf %92 : vector<8x384xf32>
    %94 = math.exp %93 : vector<8x384xf32>
    %cst_29 = arith.constant 1.000000e+00 : f32
    %95 = vector.broadcast %cst_29 : f32 to vector<8x384xf32>
    %96 = arith.addf %95, %94 : vector<8x384xf32>
    %97 = arith.divf %95, %96 : vector<8x384xf32>
    %98 = vector.extract_strided_slice %91 {offsets = [0, 384], sizes = [8, 128], strides = [1, 1]} : vector<8x512xf32> to vector<8x128xf32>
    %99 = math.tanh %98 : vector<8x128xf32>
    %100 = vector.extract_strided_slice %97 {offsets = [0, 0], sizes = [8, 128], strides = [1, 1]} : vector<8x384xf32> to vector<8x128xf32>
    %101 = vector.extract_strided_slice %97 {offsets = [0, 128], sizes = [8, 128], strides = [1, 1]} : vector<8x384xf32> to vector<8x128xf32>
    %102 = vector.extract_strided_slice %97 {offsets = [0, 256], sizes = [8, 128], strides = [1, 1]} : vector<8x384xf32> to vector<8x128xf32>
    %103 = arith.mulf %101, %80 : vector<8x128xf32>
    %104 = arith.mulf %100, %99 : vector<8x128xf32>
    %105 = arith.addf %103, %104 : vector<8x128xf32>
    %106 = math.tanh %105 : vector<8x128xf32>
    %107 = arith.mulf %102, %106 : vector<8x128xf32>
    %c3_i32 = arith.constant 3 : i32
    %108 = arith.addi %7, %c3_i32 : i32
    %109 = vector.broadcast %108 : i32 to vector<8x128xi32>
    %110 = arith.cmpi slt, %109, %6 : vector<8x128xi32>
    %cst_30 = arith.constant 0.000000e+00 : f32
    %111 = vector.broadcast %cst_30 : f32 to vector<8x128xf32>
    %112 = arith.select %110, %107, %111 : vector<8x128xi1>, vector<8x128xf32>
    %c0_31 = arith.constant 0 : index
    %c384 = arith.constant 384 : index
    %113 = vector.load %arg7[%c0_31, %c384] : memref<8x2048xf32, #tpu.memory_space<vmem>>, vector<8x128xf32>
    tpu.vector_store %arg7[%c0_31, %c384], %112 {strides = array<i32>} : memref<8x2048xf32, #tpu.memory_space<vmem>>, vector<8x128xf32>,
    %114 = vector.extract_strided_slice %11 {offsets = [32, 0], sizes = [8, 512], strides = [1, 1]} : vector<128x512xf32> to vector<8x512xf32>
    %cst_32 = arith.constant dense<0.000000e+00> : vector<8x512xf32>
    %115 = tpu.matmul %107, %4, %cst_32 {dimension_numbers = #tpu.dot_dimension_numbers<[1], [0], [0], [1], [0, 0, 1, 1], [], []>} : vector<8x128xf32>, vector<128x512xf32>, vector<8x512xf32> -> vector<8x512xf32>
    %116 = arith.addf %114, %115 : vector<8x512xf32>
    %117 = vector.extract_strided_slice %116 {offsets = [0, 0], sizes = [8, 384], strides = [1, 1]} : vector<8x512xf32> to vector<8x384xf32>
    %118 = arith.negf %117 : vector<8x384xf32>
    %119 = math.exp %118 : vector<8x384xf32>
    %cst_33 = arith.constant 1.000000e+00 : f32
    %120 = vector.broadcast %cst_33 : f32 to vector<8x384xf32>
    %121 = arith.addf %120, %119 : vector<8x384xf32>
    %122 = arith.divf %120, %121 : vector<8x384xf32>
    %123 = vector.extract_strided_slice %116 {offsets = [0, 384], sizes = [8, 128], strides = [1, 1]} : vector<8x512xf32> to vector<8x128xf32>
    %124 = math.tanh %123 : vector<8x128xf32>
    %125 = vector.extract_strided_slice %122 {offsets = [0, 0], sizes = [8, 128], strides = [1, 1]} : vector<8x384xf32> to vector<8x128xf32>
    %126 = vector.extract_strided_slice %122 {offsets = [0, 128], sizes = [8, 128], strides = [1, 1]} : vector<8x384xf32> to vector<8x128xf32>
    %127 = vector.extract_strided_slice %122 {offsets = [0, 256], sizes = [8, 128], strides = [1, 1]} : vector<8x384xf32> to vector<8x128xf32>
    %128 = arith.mulf %126, %105 : vector<8x128xf32>
    %129 = arith.mulf %125, %124 : vector<8x128xf32>
    %130 = arith.addf %128, %129 : vector<8x128xf32>
    %131 = math.tanh %130 : vector<8x128xf32>
    %132 = arith.mulf %127, %131 : vector<8x128xf32>
    %c4_i32 = arith.constant 4 : i32
    %133 = arith.addi %7, %c4_i32 : i32
    %134 = vector.broadcast %133 : i32 to vector<8x128xi32>
    %135 = arith.cmpi slt, %134, %6 : vector<8x128xi32>
    %cst_34 = arith.constant 0.000000e+00 : f32
    %136 = vector.broadcast %cst_34 : f32 to vector<8x128xf32>
    %137 = arith.select %135, %132, %136 : vector<8x128xi1>, vector<8x128xf32>
    %c0_35 = arith.constant 0 : index
    %c512 = arith.constant 512 : index
    %138 = vector.load %arg7[%c0_35, %c512] : memref<8x2048xf32, #tpu.memory_space<vmem>>, vector<8x128xf32>
    tpu.vector_store %arg7[%c0_35, %c512], %137 {strides = array<i32>} : memref<8x2048xf32, #tpu.memory_space<vmem>>, vector<8x128xf32>,
    %139 = vector.extract_strided_slice %11 {offsets = [40, 0], sizes = [8, 512], strides = [1, 1]} : vector<128x512xf32> to vector<8x512xf32>
    %cst_36 = arith.constant dense<0.000000e+00> : vector<8x512xf32>
    %140 = tpu.matmul %132, %4, %cst_36 {dimension_numbers = #tpu.dot_dimension_numbers<[1], [0], [0], [1], [0, 0, 1, 1], [], []>} : vector<8x128xf32>, vector<128x512xf32>, vector<8x512xf32> -> vector<8x512xf32>
    %141 = arith.addf %139, %140 : vector<8x512xf32>
    %142 = vector.extract_strided_slice %141 {offsets = [0, 0], sizes = [8, 384], strides = [1, 1]} : vector<8x512xf32> to vector<8x384xf32>
    %143 = arith.negf %142 : vector<8x384xf32>
    %144 = math.exp %143 : vector<8x384xf32>
    %cst_37 = arith.constant 1.000000e+00 : f32
    %145 = vector.broadcast %cst_37 : f32 to vector<8x384xf32>
    %146 = arith.addf %145, %144 : vector<8x384xf32>
    %147 = arith.divf %145, %146 : vector<8x384xf32>
    %148 = vector.extract_strided_slice %141 {offsets = [0, 384], sizes = [8, 128], strides = [1, 1]} : vector<8x512xf32> to vector<8x128xf32>
    %149 = math.tanh %148 : vector<8x128xf32>
    %150 = vector.extract_strided_slice %147 {offsets = [0, 0], sizes = [8, 128], strides = [1, 1]} : vector<8x384xf32> to vector<8x128xf32>
    %151 = vector.extract_strided_slice %147 {offsets = [0, 128], sizes = [8, 128], strides = [1, 1]} : vector<8x384xf32> to vector<8x128xf32>
    %152 = vector.extract_strided_slice %147 {offsets = [0, 256], sizes = [8, 128], strides = [1, 1]} : vector<8x384xf32> to vector<8x128xf32>
    %153 = arith.mulf %151, %130 : vector<8x128xf32>
    %154 = arith.mulf %150, %149 : vector<8x128xf32>
    %155 = arith.addf %153, %154 : vector<8x128xf32>
    %156 = math.tanh %155 : vector<8x128xf32>
    %157 = arith.mulf %152, %156 : vector<8x128xf32>
    %c5_i32 = arith.constant 5 : i32
    %158 = arith.addi %7, %c5_i32 : i32
    %159 = vector.broadcast %158 : i32 to vector<8x128xi32>
    %160 = arith.cmpi slt, %159, %6 : vector<8x128xi32>
    %cst_38 = arith.constant 0.000000e+00 : f32
    %161 = vector.broadcast %cst_38 : f32 to vector<8x128xf32>
    %162 = arith.select %160, %157, %161 : vector<8x128xi1>, vector<8x128xf32>
    %c0_39 = arith.constant 0 : index
    %c640 = arith.constant 640 : index
    %163 = vector.load %arg7[%c0_39, %c640] : memref<8x2048xf32, #tpu.memory_space<vmem>>, vector<8x128xf32>
    tpu.vector_store %arg7[%c0_39, %c640], %162 {strides = array<i32>} : memref<8x2048xf32, #tpu.memory_space<vmem>>, vector<8x128xf32>,
    %164 = vector.extract_strided_slice %11 {offsets = [48, 0], sizes = [8, 512], strides = [1, 1]} : vector<128x512xf32> to vector<8x512xf32>
    %cst_40 = arith.constant dense<0.000000e+00> : vector<8x512xf32>
    %165 = tpu.matmul %157, %4, %cst_40 {dimension_numbers = #tpu.dot_dimension_numbers<[1], [0], [0], [1], [0, 0, 1, 1], [], []>} : vector<8x128xf32>, vector<128x512xf32>, vector<8x512xf32> -> vector<8x512xf32>
    %166 = arith.addf %164, %165 : vector<8x512xf32>
    %167 = vector.extract_strided_slice %166 {offsets = [0, 0], sizes = [8, 384], strides = [1, 1]} : vector<8x512xf32> to vector<8x384xf32>
    %168 = arith.negf %167 : vector<8x384xf32>
    %169 = math.exp %168 : vector<8x384xf32>
    %cst_41 = arith.constant 1.000000e+00 : f32
    %170 = vector.broadcast %cst_41 : f32 to vector<8x384xf32>
    %171 = arith.addf %170, %169 : vector<8x384xf32>
    %172 = arith.divf %170, %171 : vector<8x384xf32>
    %173 = vector.extract_strided_slice %166 {offsets = [0, 384], sizes = [8, 128], strides = [1, 1]} : vector<8x512xf32> to vector<8x128xf32>
    %174 = math.tanh %173 : vector<8x128xf32>
    %175 = vector.extract_strided_slice %172 {offsets = [0, 0], sizes = [8, 128], strides = [1, 1]} : vector<8x384xf32> to vector<8x128xf32>
    %176 = vector.extract_strided_slice %172 {offsets = [0, 128], sizes = [8, 128], strides = [1, 1]} : vector<8x384xf32> to vector<8x128xf32>
    %177 = vector.extract_strided_slice %172 {offsets = [0, 256], sizes = [8, 128], strides = [1, 1]} : vector<8x384xf32> to vector<8x128xf32>
    %178 = arith.mulf %176, %155 : vector<8x128xf32>
    %179 = arith.mulf %175, %174 : vector<8x128xf32>
    %180 = arith.addf %178, %179 : vector<8x128xf32>
    %181 = math.tanh %180 : vector<8x128xf32>
    %182 = arith.mulf %177, %181 : vector<8x128xf32>
    %c6_i32 = arith.constant 6 : i32
    %183 = arith.addi %7, %c6_i32 : i32
    %184 = vector.broadcast %183 : i32 to vector<8x128xi32>
    %185 = arith.cmpi slt, %184, %6 : vector<8x128xi32>
    %cst_42 = arith.constant 0.000000e+00 : f32
    %186 = vector.broadcast %cst_42 : f32 to vector<8x128xf32>
    %187 = arith.select %185, %182, %186 : vector<8x128xi1>, vector<8x128xf32>
    %c0_43 = arith.constant 0 : index
    %c768 = arith.constant 768 : index
    %188 = vector.load %arg7[%c0_43, %c768] : memref<8x2048xf32, #tpu.memory_space<vmem>>, vector<8x128xf32>
    tpu.vector_store %arg7[%c0_43, %c768], %187 {strides = array<i32>} : memref<8x2048xf32, #tpu.memory_space<vmem>>, vector<8x128xf32>,
    %189 = vector.extract_strided_slice %11 {offsets = [56, 0], sizes = [8, 512], strides = [1, 1]} : vector<128x512xf32> to vector<8x512xf32>
    %cst_44 = arith.constant dense<0.000000e+00> : vector<8x512xf32>
    %190 = tpu.matmul %182, %4, %cst_44 {dimension_numbers = #tpu.dot_dimension_numbers<[1], [0], [0], [1], [0, 0, 1, 1], [], []>} : vector<8x128xf32>, vector<128x512xf32>, vector<8x512xf32> -> vector<8x512xf32>
    %191 = arith.addf %189, %190 : vector<8x512xf32>
    %192 = vector.extract_strided_slice %191 {offsets = [0, 0], sizes = [8, 384], strides = [1, 1]} : vector<8x512xf32> to vector<8x384xf32>
    %193 = arith.negf %192 : vector<8x384xf32>
    %194 = math.exp %193 : vector<8x384xf32>
    %cst_45 = arith.constant 1.000000e+00 : f32
    %195 = vector.broadcast %cst_45 : f32 to vector<8x384xf32>
    %196 = arith.addf %195, %194 : vector<8x384xf32>
    %197 = arith.divf %195, %196 : vector<8x384xf32>
    %198 = vector.extract_strided_slice %191 {offsets = [0, 384], sizes = [8, 128], strides = [1, 1]} : vector<8x512xf32> to vector<8x128xf32>
    %199 = math.tanh %198 : vector<8x128xf32>
    %200 = vector.extract_strided_slice %197 {offsets = [0, 0], sizes = [8, 128], strides = [1, 1]} : vector<8x384xf32> to vector<8x128xf32>
    %201 = vector.extract_strided_slice %197 {offsets = [0, 128], sizes = [8, 128], strides = [1, 1]} : vector<8x384xf32> to vector<8x128xf32>
    %202 = vector.extract_strided_slice %197 {offsets = [0, 256], sizes = [8, 128], strides = [1, 1]} : vector<8x384xf32> to vector<8x128xf32>
    %203 = arith.mulf %201, %180 : vector<8x128xf32>
    %204 = arith.mulf %200, %199 : vector<8x128xf32>
    %205 = arith.addf %203, %204 : vector<8x128xf32>
    %206 = math.tanh %205 : vector<8x128xf32>
    %207 = arith.mulf %202, %206 : vector<8x128xf32>
    %c7_i32 = arith.constant 7 : i32
    %208 = arith.addi %7, %c7_i32 : i32
    %209 = vector.broadcast %208 : i32 to vector<8x128xi32>
    %210 = arith.cmpi slt, %209, %6 : vector<8x128xi32>
    %cst_46 = arith.constant 0.000000e+00 : f32
    %211 = vector.broadcast %cst_46 : f32 to vector<8x128xf32>
    %212 = arith.select %210, %207, %211 : vector<8x128xi1>, vector<8x128xf32>
    %c0_47 = arith.constant 0 : index
    %c896 = arith.constant 896 : index
    %213 = vector.load %arg7[%c0_47, %c896] : memref<8x2048xf32, #tpu.memory_space<vmem>>, vector<8x128xf32>
    tpu.vector_store %arg7[%c0_47, %c896], %212 {strides = array<i32>} : memref<8x2048xf32, #tpu.memory_space<vmem>>, vector<8x128xf32>,
    %214 = vector.extract_strided_slice %11 {offsets = [64, 0], sizes = [8, 512], strides = [1, 1]} : vector<128x512xf32> to vector<8x512xf32>
    %cst_48 = arith.constant dense<0.000000e+00> : vector<8x512xf32>
    %215 = tpu.matmul %207, %4, %cst_48 {dimension_numbers = #tpu.dot_dimension_numbers<[1], [0], [0], [1], [0, 0, 1, 1], [], []>} : vector<8x128xf32>, vector<128x512xf32>, vector<8x512xf32> -> vector<8x512xf32>
    %216 = arith.addf %214, %215 : vector<8x512xf32>
    %217 = vector.extract_strided_slice %216 {offsets = [0, 0], sizes = [8, 384], strides = [1, 1]} : vector<8x512xf32> to vector<8x384xf32>
    %218 = arith.negf %217 : vector<8x384xf32>
    %219 = math.exp %218 : vector<8x384xf32>
    %cst_49 = arith.constant 1.000000e+00 : f32
    %220 = vector.broadcast %cst_49 : f32 to vector<8x384xf32>
    %221 = arith.addf %220, %219 : vector<8x384xf32>
    %222 = arith.divf %220, %221 : vector<8x384xf32>
    %223 = vector.extract_strided_slice %216 {offsets = [0, 384], sizes = [8, 128], strides = [1, 1]} : vector<8x512xf32> to vector<8x128xf32>
    %224 = math.tanh %223 : vector<8x128xf32>
    %225 = vector.extract_strided_slice %222 {offsets = [0, 0], sizes = [8, 128], strides = [1, 1]} : vector<8x384xf32> to vector<8x128xf32>
    %226 = vector.extract_strided_slice %222 {offsets = [0, 128], sizes = [8, 128], strides = [1, 1]} : vector<8x384xf32> to vector<8x128xf32>
    %227 = vector.extract_strided_slice %222 {offsets = [0, 256], sizes = [8, 128], strides = [1, 1]} : vector<8x384xf32> to vector<8x128xf32>
    %228 = arith.mulf %226, %205 : vector<8x128xf32>
    %229 = arith.mulf %225, %224 : vector<8x128xf32>
    %230 = arith.addf %228, %229 : vector<8x128xf32>
    %231 = math.tanh %230 : vector<8x128xf32>
    %232 = arith.mulf %227, %231 : vector<8x128xf32>
    %c8_i32 = arith.constant 8 : i32
    %233 = arith.addi %7, %c8_i32 : i32
    %234 = vector.broadcast %233 : i32 to vector<8x128xi32>
    %235 = arith.cmpi slt, %234, %6 : vector<8x128xi32>
    %cst_50 = arith.constant 0.000000e+00 : f32
    %236 = vector.broadcast %cst_50 : f32 to vector<8x128xf32>
    %237 = arith.select %235, %232, %236 : vector<8x128xi1>, vector<8x128xf32>
    %c0_51 = arith.constant 0 : index
    %c1024 = arith.constant 1024 : index
    %238 = vector.load %arg7[%c0_51, %c1024] : memref<8x2048xf32, #tpu.memory_space<vmem>>, vector<8x128xf32>
    tpu.vector_store %arg7[%c0_51, %c1024], %237 {strides = array<i32>} : memref<8x2048xf32, #tpu.memory_space<vmem>>, vector<8x128xf32>,
    %239 = vector.extract_strided_slice %11 {offsets = [72, 0], sizes = [8, 512], strides = [1, 1]} : vector<128x512xf32> to vector<8x512xf32>
    %cst_52 = arith.constant dense<0.000000e+00> : vector<8x512xf32>
    %240 = tpu.matmul %232, %4, %cst_52 {dimension_numbers = #tpu.dot_dimension_numbers<[1], [0], [0], [1], [0, 0, 1, 1], [], []>} : vector<8x128xf32>, vector<128x512xf32>, vector<8x512xf32> -> vector<8x512xf32>
    %241 = arith.addf %239, %240 : vector<8x512xf32>
    %242 = vector.extract_strided_slice %241 {offsets = [0, 0], sizes = [8, 384], strides = [1, 1]} : vector<8x512xf32> to vector<8x384xf32>
    %243 = arith.negf %242 : vector<8x384xf32>
    %244 = math.exp %243 : vector<8x384xf32>
    %cst_53 = arith.constant 1.000000e+00 : f32
    %245 = vector.broadcast %cst_53 : f32 to vector<8x384xf32>
    %246 = arith.addf %245, %244 : vector<8x384xf32>
    %247 = arith.divf %245, %246 : vector<8x384xf32>
    %248 = vector.extract_strided_slice %241 {offsets = [0, 384], sizes = [8, 128], strides = [1, 1]} : vector<8x512xf32> to vector<8x128xf32>
    %249 = math.tanh %248 : vector<8x128xf32>
    %250 = vector.extract_strided_slice %247 {offsets = [0, 0], sizes = [8, 128], strides = [1, 1]} : vector<8x384xf32> to vector<8x128xf32>
    %251 = vector.extract_strided_slice %247 {offsets = [0, 128], sizes = [8, 128], strides = [1, 1]} : vector<8x384xf32> to vector<8x128xf32>
    %252 = vector.extract_strided_slice %247 {offsets = [0, 256], sizes = [8, 128], strides = [1, 1]} : vector<8x384xf32> to vector<8x128xf32>
    %253 = arith.mulf %251, %230 : vector<8x128xf32>
    %254 = arith.mulf %250, %249 : vector<8x128xf32>
    %255 = arith.addf %253, %254 : vector<8x128xf32>
    %256 = math.tanh %255 : vector<8x128xf32>
    %257 = arith.mulf %252, %256 : vector<8x128xf32>
    %c9_i32 = arith.constant 9 : i32
    %258 = arith.addi %7, %c9_i32 : i32
    %259 = vector.broadcast %258 : i32 to vector<8x128xi32>
    %260 = arith.cmpi slt, %259, %6 : vector<8x128xi32>
    %cst_54 = arith.constant 0.000000e+00 : f32
    %261 = vector.broadcast %cst_54 : f32 to vector<8x128xf32>
    %262 = arith.select %260, %257, %261 : vector<8x128xi1>, vector<8x128xf32>
    %c0_55 = arith.constant 0 : index
    %c1152 = arith.constant 1152 : index
    %263 = vector.load %arg7[%c0_55, %c1152] : memref<8x2048xf32, #tpu.memory_space<vmem>>, vector<8x128xf32>
    tpu.vector_store %arg7[%c0_55, %c1152], %262 {strides = array<i32>} : memref<8x2048xf32, #tpu.memory_space<vmem>>, vector<8x128xf32>,
    %264 = vector.extract_strided_slice %11 {offsets = [80, 0], sizes = [8, 512], strides = [1, 1]} : vector<128x512xf32> to vector<8x512xf32>
    %cst_56 = arith.constant dense<0.000000e+00> : vector<8x512xf32>
    %265 = tpu.matmul %257, %4, %cst_56 {dimension_numbers = #tpu.dot_dimension_numbers<[1], [0], [0], [1], [0, 0, 1, 1], [], []>} : vector<8x128xf32>, vector<128x512xf32>, vector<8x512xf32> -> vector<8x512xf32>
    %266 = arith.addf %264, %265 : vector<8x512xf32>
    %267 = vector.extract_strided_slice %266 {offsets = [0, 0], sizes = [8, 384], strides = [1, 1]} : vector<8x512xf32> to vector<8x384xf32>
    %268 = arith.negf %267 : vector<8x384xf32>
    %269 = math.exp %268 : vector<8x384xf32>
    %cst_57 = arith.constant 1.000000e+00 : f32
    %270 = vector.broadcast %cst_57 : f32 to vector<8x384xf32>
    %271 = arith.addf %270, %269 : vector<8x384xf32>
    %272 = arith.divf %270, %271 : vector<8x384xf32>
    %273 = vector.extract_strided_slice %266 {offsets = [0, 384], sizes = [8, 128], strides = [1, 1]} : vector<8x512xf32> to vector<8x128xf32>
    %274 = math.tanh %273 : vector<8x128xf32>
    %275 = vector.extract_strided_slice %272 {offsets = [0, 0], sizes = [8, 128], strides = [1, 1]} : vector<8x384xf32> to vector<8x128xf32>
    %276 = vector.extract_strided_slice %272 {offsets = [0, 128], sizes = [8, 128], strides = [1, 1]} : vector<8x384xf32> to vector<8x128xf32>
    %277 = vector.extract_strided_slice %272 {offsets = [0, 256], sizes = [8, 128], strides = [1, 1]} : vector<8x384xf32> to vector<8x128xf32>
    %278 = arith.mulf %276, %255 : vector<8x128xf32>
    %279 = arith.mulf %275, %274 : vector<8x128xf32>
    %280 = arith.addf %278, %279 : vector<8x128xf32>
    %281 = math.tanh %280 : vector<8x128xf32>
    %282 = arith.mulf %277, %281 : vector<8x128xf32>
    %c10_i32 = arith.constant 10 : i32
    %283 = arith.addi %7, %c10_i32 : i32
    %284 = vector.broadcast %283 : i32 to vector<8x128xi32>
    %285 = arith.cmpi slt, %284, %6 : vector<8x128xi32>
    %cst_58 = arith.constant 0.000000e+00 : f32
    %286 = vector.broadcast %cst_58 : f32 to vector<8x128xf32>
    %287 = arith.select %285, %282, %286 : vector<8x128xi1>, vector<8x128xf32>
    %c0_59 = arith.constant 0 : index
    %c1280 = arith.constant 1280 : index
    %288 = vector.load %arg7[%c0_59, %c1280] : memref<8x2048xf32, #tpu.memory_space<vmem>>, vector<8x128xf32>
    tpu.vector_store %arg7[%c0_59, %c1280], %287 {strides = array<i32>} : memref<8x2048xf32, #tpu.memory_space<vmem>>, vector<8x128xf32>,
    %289 = vector.extract_strided_slice %11 {offsets = [88, 0], sizes = [8, 512], strides = [1, 1]} : vector<128x512xf32> to vector<8x512xf32>
    %cst_60 = arith.constant dense<0.000000e+00> : vector<8x512xf32>
    %290 = tpu.matmul %282, %4, %cst_60 {dimension_numbers = #tpu.dot_dimension_numbers<[1], [0], [0], [1], [0, 0, 1, 1], [], []>} : vector<8x128xf32>, vector<128x512xf32>, vector<8x512xf32> -> vector<8x512xf32>
    %291 = arith.addf %289, %290 : vector<8x512xf32>
    %292 = vector.extract_strided_slice %291 {offsets = [0, 0], sizes = [8, 384], strides = [1, 1]} : vector<8x512xf32> to vector<8x384xf32>
    %293 = arith.negf %292 : vector<8x384xf32>
    %294 = math.exp %293 : vector<8x384xf32>
    %cst_61 = arith.constant 1.000000e+00 : f32
    %295 = vector.broadcast %cst_61 : f32 to vector<8x384xf32>
    %296 = arith.addf %295, %294 : vector<8x384xf32>
    %297 = arith.divf %295, %296 : vector<8x384xf32>
    %298 = vector.extract_strided_slice %291 {offsets = [0, 384], sizes = [8, 128], strides = [1, 1]} : vector<8x512xf32> to vector<8x128xf32>
    %299 = math.tanh %298 : vector<8x128xf32>
    %300 = vector.extract_strided_slice %297 {offsets = [0, 0], sizes = [8, 128], strides = [1, 1]} : vector<8x384xf32> to vector<8x128xf32>
    %301 = vector.extract_strided_slice %297 {offsets = [0, 128], sizes = [8, 128], strides = [1, 1]} : vector<8x384xf32> to vector<8x128xf32>
    %302 = vector.extract_strided_slice %297 {offsets = [0, 256], sizes = [8, 128], strides = [1, 1]} : vector<8x384xf32> to vector<8x128xf32>
    %303 = arith.mulf %301, %280 : vector<8x128xf32>
    %304 = arith.mulf %300, %299 : vector<8x128xf32>
    %305 = arith.addf %303, %304 : vector<8x128xf32>
    %306 = math.tanh %305 : vector<8x128xf32>
    %307 = arith.mulf %302, %306 : vector<8x128xf32>
    %c11_i32 = arith.constant 11 : i32
    %308 = arith.addi %7, %c11_i32 : i32
    %309 = vector.broadcast %308 : i32 to vector<8x128xi32>
    %310 = arith.cmpi slt, %309, %6 : vector<8x128xi32>
    %cst_62 = arith.constant 0.000000e+00 : f32
    %311 = vector.broadcast %cst_62 : f32 to vector<8x128xf32>
    %312 = arith.select %310, %307, %311 : vector<8x128xi1>, vector<8x128xf32>
    %c0_63 = arith.constant 0 : index
    %c1408 = arith.constant 1408 : index
    %313 = vector.load %arg7[%c0_63, %c1408] : memref<8x2048xf32, #tpu.memory_space<vmem>>, vector<8x128xf32>
    tpu.vector_store %arg7[%c0_63, %c1408], %312 {strides = array<i32>} : memref<8x2048xf32, #tpu.memory_space<vmem>>, vector<8x128xf32>,
    %314 = vector.extract_strided_slice %11 {offsets = [96, 0], sizes = [8, 512], strides = [1, 1]} : vector<128x512xf32> to vector<8x512xf32>
    %cst_64 = arith.constant dense<0.000000e+00> : vector<8x512xf32>
    %315 = tpu.matmul %307, %4, %cst_64 {dimension_numbers = #tpu.dot_dimension_numbers<[1], [0], [0], [1], [0, 0, 1, 1], [], []>} : vector<8x128xf32>, vector<128x512xf32>, vector<8x512xf32> -> vector<8x512xf32>
    %316 = arith.addf %314, %315 : vector<8x512xf32>
    %317 = vector.extract_strided_slice %316 {offsets = [0, 0], sizes = [8, 384], strides = [1, 1]} : vector<8x512xf32> to vector<8x384xf32>
    %318 = arith.negf %317 : vector<8x384xf32>
    %319 = math.exp %318 : vector<8x384xf32>
    %cst_65 = arith.constant 1.000000e+00 : f32
    %320 = vector.broadcast %cst_65 : f32 to vector<8x384xf32>
    %321 = arith.addf %320, %319 : vector<8x384xf32>
    %322 = arith.divf %320, %321 : vector<8x384xf32>
    %323 = vector.extract_strided_slice %316 {offsets = [0, 384], sizes = [8, 128], strides = [1, 1]} : vector<8x512xf32> to vector<8x128xf32>
    %324 = math.tanh %323 : vector<8x128xf32>
    %325 = vector.extract_strided_slice %322 {offsets = [0, 0], sizes = [8, 128], strides = [1, 1]} : vector<8x384xf32> to vector<8x128xf32>
    %326 = vector.extract_strided_slice %322 {offsets = [0, 128], sizes = [8, 128], strides = [1, 1]} : vector<8x384xf32> to vector<8x128xf32>
    %327 = vector.extract_strided_slice %322 {offsets = [0, 256], sizes = [8, 128], strides = [1, 1]} : vector<8x384xf32> to vector<8x128xf32>
    %328 = arith.mulf %326, %305 : vector<8x128xf32>
    %329 = arith.mulf %325, %324 : vector<8x128xf32>
    %330 = arith.addf %328, %329 : vector<8x128xf32>
    %331 = math.tanh %330 : vector<8x128xf32>
    %332 = arith.mulf %327, %331 : vector<8x128xf32>
    %c12_i32 = arith.constant 12 : i32
    %333 = arith.addi %7, %c12_i32 : i32
    %334 = vector.broadcast %333 : i32 to vector<8x128xi32>
    %335 = arith.cmpi slt, %334, %6 : vector<8x128xi32>
    %cst_66 = arith.constant 0.000000e+00 : f32
    %336 = vector.broadcast %cst_66 : f32 to vector<8x128xf32>
    %337 = arith.select %335, %332, %336 : vector<8x128xi1>, vector<8x128xf32>
    %c0_67 = arith.constant 0 : index
    %c1536 = arith.constant 1536 : index
    %338 = vector.load %arg7[%c0_67, %c1536] : memref<8x2048xf32, #tpu.memory_space<vmem>>, vector<8x128xf32>
    tpu.vector_store %arg7[%c0_67, %c1536], %337 {strides = array<i32>} : memref<8x2048xf32, #tpu.memory_space<vmem>>, vector<8x128xf32>,
    %339 = vector.extract_strided_slice %11 {offsets = [104, 0], sizes = [8, 512], strides = [1, 1]} : vector<128x512xf32> to vector<8x512xf32>
    %cst_68 = arith.constant dense<0.000000e+00> : vector<8x512xf32>
    %340 = tpu.matmul %332, %4, %cst_68 {dimension_numbers = #tpu.dot_dimension_numbers<[1], [0], [0], [1], [0, 0, 1, 1], [], []>} : vector<8x128xf32>, vector<128x512xf32>, vector<8x512xf32> -> vector<8x512xf32>
    %341 = arith.addf %339, %340 : vector<8x512xf32>
    %342 = vector.extract_strided_slice %341 {offsets = [0, 0], sizes = [8, 384], strides = [1, 1]} : vector<8x512xf32> to vector<8x384xf32>
    %343 = arith.negf %342 : vector<8x384xf32>
    %344 = math.exp %343 : vector<8x384xf32>
    %cst_69 = arith.constant 1.000000e+00 : f32
    %345 = vector.broadcast %cst_69 : f32 to vector<8x384xf32>
    %346 = arith.addf %345, %344 : vector<8x384xf32>
    %347 = arith.divf %345, %346 : vector<8x384xf32>
    %348 = vector.extract_strided_slice %341 {offsets = [0, 384], sizes = [8, 128], strides = [1, 1]} : vector<8x512xf32> to vector<8x128xf32>
    %349 = math.tanh %348 : vector<8x128xf32>
    %350 = vector.extract_strided_slice %347 {offsets = [0, 0], sizes = [8, 128], strides = [1, 1]} : vector<8x384xf32> to vector<8x128xf32>
    %351 = vector.extract_strided_slice %347 {offsets = [0, 128], sizes = [8, 128], strides = [1, 1]} : vector<8x384xf32> to vector<8x128xf32>
    %352 = vector.extract_strided_slice %347 {offsets = [0, 256], sizes = [8, 128], strides = [1, 1]} : vector<8x384xf32> to vector<8x128xf32>
    %353 = arith.mulf %351, %330 : vector<8x128xf32>
    %354 = arith.mulf %350, %349 : vector<8x128xf32>
    %355 = arith.addf %353, %354 : vector<8x128xf32>
    %356 = math.tanh %355 : vector<8x128xf32>
    %357 = arith.mulf %352, %356 : vector<8x128xf32>
    %c13_i32 = arith.constant 13 : i32
    %358 = arith.addi %7, %c13_i32 : i32
    %359 = vector.broadcast %358 : i32 to vector<8x128xi32>
    %360 = arith.cmpi slt, %359, %6 : vector<8x128xi32>
    %cst_70 = arith.constant 0.000000e+00 : f32
    %361 = vector.broadcast %cst_70 : f32 to vector<8x128xf32>
    %362 = arith.select %360, %357, %361 : vector<8x128xi1>, vector<8x128xf32>
    %c0_71 = arith.constant 0 : index
    %c1664 = arith.constant 1664 : index
    %363 = vector.load %arg7[%c0_71, %c1664] : memref<8x2048xf32, #tpu.memory_space<vmem>>, vector<8x128xf32>
    tpu.vector_store %arg7[%c0_71, %c1664], %362 {strides = array<i32>} : memref<8x2048xf32, #tpu.memory_space<vmem>>, vector<8x128xf32>,
    %364 = vector.extract_strided_slice %11 {offsets = [112, 0], sizes = [8, 512], strides = [1, 1]} : vector<128x512xf32> to vector<8x512xf32>
    %cst_72 = arith.constant dense<0.000000e+00> : vector<8x512xf32>
    %365 = tpu.matmul %357, %4, %cst_72 {dimension_numbers = #tpu.dot_dimension_numbers<[1], [0], [0], [1], [0, 0, 1, 1], [], []>} : vector<8x128xf32>, vector<128x512xf32>, vector<8x512xf32> -> vector<8x512xf32>
    %366 = arith.addf %364, %365 : vector<8x512xf32>
    %367 = vector.extract_strided_slice %366 {offsets = [0, 0], sizes = [8, 384], strides = [1, 1]} : vector<8x512xf32> to vector<8x384xf32>
    %368 = arith.negf %367 : vector<8x384xf32>
    %369 = math.exp %368 : vector<8x384xf32>
    %cst_73 = arith.constant 1.000000e+00 : f32
    %370 = vector.broadcast %cst_73 : f32 to vector<8x384xf32>
    %371 = arith.addf %370, %369 : vector<8x384xf32>
    %372 = arith.divf %370, %371 : vector<8x384xf32>
    %373 = vector.extract_strided_slice %366 {offsets = [0, 384], sizes = [8, 128], strides = [1, 1]} : vector<8x512xf32> to vector<8x128xf32>
    %374 = math.tanh %373 : vector<8x128xf32>
    %375 = vector.extract_strided_slice %372 {offsets = [0, 0], sizes = [8, 128], strides = [1, 1]} : vector<8x384xf32> to vector<8x128xf32>
    %376 = vector.extract_strided_slice %372 {offsets = [0, 128], sizes = [8, 128], strides = [1, 1]} : vector<8x384xf32> to vector<8x128xf32>
    %377 = vector.extract_strided_slice %372 {offsets = [0, 256], sizes = [8, 128], strides = [1, 1]} : vector<8x384xf32> to vector<8x128xf32>
    %378 = arith.mulf %376, %355 : vector<8x128xf32>
    %379 = arith.mulf %375, %374 : vector<8x128xf32>
    %380 = arith.addf %378, %379 : vector<8x128xf32>
    %381 = math.tanh %380 : vector<8x128xf32>
    %382 = arith.mulf %377, %381 : vector<8x128xf32>
    %c14_i32 = arith.constant 14 : i32
    %383 = arith.addi %7, %c14_i32 : i32
    %384 = vector.broadcast %383 : i32 to vector<8x128xi32>
    %385 = arith.cmpi slt, %384, %6 : vector<8x128xi32>
    %cst_74 = arith.constant 0.000000e+00 : f32
    %386 = vector.broadcast %cst_74 : f32 to vector<8x128xf32>
    %387 = arith.select %385, %382, %386 : vector<8x128xi1>, vector<8x128xf32>
    %c0_75 = arith.constant 0 : index
    %c1792 = arith.constant 1792 : index
    %388 = vector.load %arg7[%c0_75, %c1792] : memref<8x2048xf32, #tpu.memory_space<vmem>>, vector<8x128xf32>
    tpu.vector_store %arg7[%c0_75, %c1792], %387 {strides = array<i32>} : memref<8x2048xf32, #tpu.memory_space<vmem>>, vector<8x128xf32>,
    %389 = vector.extract_strided_slice %11 {offsets = [120, 0], sizes = [8, 512], strides = [1, 1]} : vector<128x512xf32> to vector<8x512xf32>
    %cst_76 = arith.constant dense<0.000000e+00> : vector<8x512xf32>
    %390 = tpu.matmul %382, %4, %cst_76 {dimension_numbers = #tpu.dot_dimension_numbers<[1], [0], [0], [1], [0, 0, 1, 1], [], []>} : vector<8x128xf32>, vector<128x512xf32>, vector<8x512xf32> -> vector<8x512xf32>
    %391 = arith.addf %389, %390 : vector<8x512xf32>
    %392 = vector.extract_strided_slice %391 {offsets = [0, 0], sizes = [8, 384], strides = [1, 1]} : vector<8x512xf32> to vector<8x384xf32>
    %393 = arith.negf %392 : vector<8x384xf32>
    %394 = math.exp %393 : vector<8x384xf32>
    %cst_77 = arith.constant 1.000000e+00 : f32
    %395 = vector.broadcast %cst_77 : f32 to vector<8x384xf32>
    %396 = arith.addf %395, %394 : vector<8x384xf32>
    %397 = arith.divf %395, %396 : vector<8x384xf32>
    %398 = vector.extract_strided_slice %391 {offsets = [0, 384], sizes = [8, 128], strides = [1, 1]} : vector<8x512xf32> to vector<8x128xf32>
    %399 = math.tanh %398 : vector<8x128xf32>
    %400 = vector.extract_strided_slice %397 {offsets = [0, 0], sizes = [8, 128], strides = [1, 1]} : vector<8x384xf32> to vector<8x128xf32>
    %401 = vector.extract_strided_slice %397 {offsets = [0, 128], sizes = [8, 128], strides = [1, 1]} : vector<8x384xf32> to vector<8x128xf32>
    %402 = vector.extract_strided_slice %397 {offsets = [0, 256], sizes = [8, 128], strides = [1, 1]} : vector<8x384xf32> to vector<8x128xf32>
    %403 = arith.mulf %401, %380 : vector<8x128xf32>
    %404 = arith.mulf %400, %399 : vector<8x128xf32>
    %405 = arith.addf %403, %404 : vector<8x128xf32>
    %406 = math.tanh %405 : vector<8x128xf32>
    %407 = arith.mulf %402, %406 : vector<8x128xf32>
    %c15_i32 = arith.constant 15 : i32
    %408 = arith.addi %7, %c15_i32 : i32
    %409 = vector.broadcast %408 : i32 to vector<8x128xi32>
    %410 = arith.cmpi slt, %409, %6 : vector<8x128xi32>
    %cst_78 = arith.constant 0.000000e+00 : f32
    %411 = vector.broadcast %cst_78 : f32 to vector<8x128xf32>
    %412 = arith.select %410, %407, %411 : vector<8x128xi1>, vector<8x128xf32>
    %c0_79 = arith.constant 0 : index
    %c1920 = arith.constant 1920 : index
    %413 = vector.load %arg7[%c0_79, %c1920] : memref<8x2048xf32, #tpu.memory_space<vmem>>, vector<8x128xf32>
    tpu.vector_store %arg7[%c0_79, %c1920], %412 {strides = array<i32>} : memref<8x2048xf32, #tpu.memory_space<vmem>>, vector<8x128xf32>,
    %c0_80 = arith.constant 0 : index
    %c0_81 = arith.constant 0 : index
    %414 = vector.load %arg8[%c0_80, %c0_81] : memref<8x128xf32, #tpu.memory_space<vmem>>, vector<8x128xf32>
    tpu.vector_store %arg8[%c0_80, %c0_81], %407 {strides = array<i32>} : memref<8x128xf32, #tpu.memory_space<vmem>>, vector<8x128xf32>,
    %c0_82 = arith.constant 0 : index
    %c0_83 = arith.constant 0 : index
    %415 = vector.load %arg9[%c0_82, %c0_83] : memref<8x128xf32, #tpu.memory_space<vmem>>, vector<8x128xf32>
    tpu.vector_store %arg9[%c0_82, %c0_83], %405 {strides = array<i32>} : memref<8x128xf32, #tpu.memory_space<vmem>>, vector<8x128xf32>,
    return
  }
  func.func @transform_0(%arg0: i32, %arg1: i32) -> (i32, i32) {
    %c2_i32 = arith.constant 2 : i32
    %0 = arith.muli %arg0, %c2_i32 : i32
    %1 = arith.addi %0, %arg1 : i32
    %c0_i32 = arith.constant 0 : i32
    %c0_i32_0 = arith.constant 0 : i32
    return %1, %c0_i32 : i32, i32
  }
  func.func @transform_1(%arg0: i32, %arg1: i32) -> (i32, i32) {
    %c0_i32 = arith.constant 0 : i32
    %c0_i32_0 = arith.constant 0 : i32
    %c0_i32_1 = arith.constant 0 : i32
    return %c0_i32, %c0_i32_0 : i32, i32
  }
  func.func @transform_2(%arg0: i32, %arg1: i32) -> (i32, i32) {
    %c0_i32 = arith.constant 0 : i32
    %c0_i32_0 = arith.constant 0 : i32
    %c0_i32_1 = arith.constant 0 : i32
    return %c0_i32, %c0_i32_0 : i32, i32
  }
  func.func @transform_3(%arg0: i32, %arg1: i32) -> (i32, i32) {
    %c0_i32 = arith.constant 0 : i32
    %c0_i32_0 = arith.constant 0 : i32
    %c0_i32_1 = arith.constant 0 : i32
    return %c0_i32, %c0_i32_0 : i32, i32
  }
  func.func @transform_4(%arg0: i32, %arg1: i32) -> (i32, i32) {
    %c0_i32 = arith.constant 0 : i32
    %c0_i32_0 = arith.constant 0 : i32
    return %arg0, %c0_i32 : i32, i32
  }
  func.func @transform_5(%arg0: i32, %arg1: i32) -> (i32, i32) {
    %c0_i32 = arith.constant 0 : i32
    return %arg0, %arg1 : i32, i32
  }
}

</mosaic_0001>

<bundles_post_ra>
// kernel: tpu_custom_call.1
= control target key start
LH: loop header
LB: loop body
LE: loop exit
PB: predicated region body
PF: predicated region fallthrough
CT: control target
= control target key end

     0   :  { %s7657_s0 = inlined_call_operand.vmem [shape: f32[512,16], index: 0, kind: input, shape index: {}]   ;;  %s7658_s1 = inlined_call_operand.vmem [shape: f32[16,512], index: 1, kind: input, shape index: {}]   ;;  %s7659_s2 = inlined_call_operand.vmem [shape: f32[128,512], index: 2, kind: input, shape index: {}]   ;;  %s7660_s3 = inlined_call_operand.hbm [shape: f32[1,512], index: 3, kind: input, shape index: {}]   ;;  %s7661_s4 = inlined_call_operand.hbm [shape: s32[16,128], index: 4, kind: input, shape index: {}]   ;;  %s7662_s5 = inlined_call_operand.hbm [shape: f32[16,4096], index: 5, kind: output, shape index: {}]  }
   0x1   :  { %7821 = sst [smem:[#allocation99_spill]] %s7659_s2 }
   0x2   :  { %7822 = sst [smem:[#allocation100_spill]] %s7660_s3 }
   0x3   :  { %7823 = sst [smem:[#allocation101_spill]] %s7662_s5 }
   0x4   :  { %10 = vsyncpa [#allocation5], 0 }
   0x5   :  { %11 = vsyncpa [#allocation8], 0 }
   0x6   :  { %13 = vsyncpa [#allocation8 + $0x1], 0 }
   0x7   :  { %14 = vsyncpa [#allocation6], 0 }
   0x8   :  { %16 = vsyncpa [#allocation6 + $0x1], 0  ;;  %s4605_s18 = smov 0   ;;  %s4607_s19 = smov 0  }
   0x9   :  { %s4609_s20 = smov 0   ;;  %s4611_s21 = smov 0  }
   0xa   :  { %s4613_s22 = smov 0   ;;  %s4615_s23 = smov 0  }
   0xb   :  { %s4617_s24 = smov 0   ;;  %s4619_s25 = smov 0  }
   0xc   :  { %s4621_s26 = smov 0   ;;  %s4623_s27 = smov 0  }
   0xd   :  { %s4625_s28 = smov 0  }
   0xe LB: > { %7824 = sst [smem:[#allocation13_spill]] %s4528_s18  ;;  %s3721_s29 = sadd.s32 4294967295, %s4568_s28   ;;  %s4568_s28 = sphi %s4625_s28, %s22_s28   ;;  %s4564_s27 = sphi %s4623_s27, %s8219_s27   ;;  %s4560_s26 = sphi %s4621_s26, %s8218_s26   ;;  %s4556_s25 = sphi %s4619_s25, %s8217_s25   ;;  %s4552_s24 = sphi %s4617_s24, %s8208_s24   ;;  %s4548_s23 = sphi %s4615_s23, %s8216_s23   ;;  %s4544_s22 = sphi %s4613_s22, %s8215_s22   ;;  %s4540_s21 = sphi %s4611_s21, %s8214_s21   ;;  %s4536_s20 = sphi %s4609_s20, %s8213_s20   ;;  %s4532_s19 = sphi %s4607_s19, %s8212_s19   ;;  %s4528_s18 = sphi %s4605_s18, %s8211_s18  }
   0xf   : > { %7825 = sst [smem:[#allocation14_spill]] %s4560_s26  ;;  %s3722_s30 = sadd.s32 4294967294, %s4568_s28  }
  0x10   : > { %p147_p0 = scmp.ne.s32.totalorder %s4544_s22, %s4540_s21  ;;  %p4661_p1 = scmp.eq.s32.totalorder %s3721_s29, 0 }
  0x11   : > { %p172_p2 = scmp.ne.s32.totalorder %s4536_s20, %s4532_s19  ;;  %p173_p4 = scmp.eq.s32.totalorder %s3721_s29, 3 }
  0x12   : > { %p4670_p3 = por %p4661_p1, %p147_p0  ;;  %p178_p5 = scmp.ne.s32.totalorder %s4532_s19, %s4528_s18 }
  0x13   : > { %p179_p6 = scmp.eq.s32.totalorder %s3722_s30, 3  ;;  %p4676_p7 = por %p173_p4, %p172_p2 }
  0x14   : > { %p3725_p8 = scmp.ge.s32.totalorder %s4568_s28, 1  ;;  %p186_p10 = scmp.lt.s32.totalorder %s4568_s28, 5 }
  0x15   : > { %s7828_s9 = scalar_select %p4676_p7, 1, 0 }
  0x16   : > { %p4681_p9 = por %p179_p6, %p178_p5  ;;  %p4686_p11 = pnand %p3725_p8, %p186_p10 }
  0x17   : > { %7829 = sst [smem:[#allocation15_spill]] %s7828_s9  ;;  %s4570_s12 = smov [#allocation4]  }
  0x18   : > { %s7830_s10 = scalar_select %p4681_p9, 1, 0 }
  0x19   : > { %s205_s13 = sshll.u32 %s4570_s12, 4  ;;  %p3833_p12 = pneg %p4686_p11  ;;  %s206_s13 = int_to_ptr.vmem [resolvable:$true] %s205_s13 }
  0x1a   : > { %7831 = sst [smem:[#allocation16_spill]] %s7830_s10  ;;  %s31_s14 = sadd.s32 1, %s4560_s26 }
  0x1b   : > { %p3834_p13 = pnand %p3833_p12, %p4661_p1  ;;  %s4401_s15 = scalar_lea.vmem %s206_s13, 64 }
  0x1c   : > { %p4402_p2 = scmp.ne.s32.totalorder %s206_s13, %s4401_s15  ;;  %p4409_p6 = scmp.lt.s32.totalorder %s206_s13, %s206_s13 }
  0x1d   : > { %p4392_p0 = pneg %p3834_p13  ;;  %p4410_p9 = scmp.lt.s32.totalorder %s4401_s15, %s4401_s15 }
  0x1f   : > { %p4404_p4 = pnand %p4402_p2, %p4392_p0  ;;  %p4411_p8 = por %p4410_p9, %p4409_p6 }
  0x21   : > { %p4405_p5 = pneg %p4404_p4 }
  0x23   : > { %p4412_p10 = pnand %p4411_p8, %p4405_p5 }
  0x25   : > { %4415 = shalt.err (!%p4412_p10)
}
  0x26   : > { %s7833_s3 = sld [smem:[#allocation100_spill]]  ;;  %p32_p12 = scmp.ge.s32.totalorder %s31_s14, 2 }
  0x27   : > { %s34_s21 = sadd.s32 1, %s4564_s27  ;;  %s134_s29 = sadd.s32 1, %s4548_s23 }
  0x28   : > { %p141_p9 = scmp.ne.s32.totalorder %s4548_s23, %s4544_s22  ;;  %s8221_s14 = smov (%p32_p12, %s31_s14), 0 }
  0x29   : > { %7834 = sst [smem:[#allocation17_spill]] %s8221_s14  ;;  %s8223_s21 = smov (!%p32_p12, %s34_s21), %s4564_s27 }
  0x2a   : > { %p142_p0 = scmp.eq.s32.totalorder %s4568_s28, 0  ;;  %s158_s30 = ssub.s32 %s4560_s26, %s8221_s14 }
  0x2b   : > { %p36_p2 = scmp.ge.s32.totalorder %s8223_s21, 2  ;;  %p3846_p4 = scmp.lt.s32.totalorder %s4568_s28, 4 }
  0x2c   : > { %3836 = dma.hbm_to_vmem [thread:$0]  (!%p3834_p13), %s7833_s3, 64, %s206_s13, [#allocation5]  }
  0x2d   : > { %p4709_p5 = por %p142_p0, %p141_p9  ;;  %s229_s13 = sand.u32 1, %s4548_s23  }
  0x2e   : > { %s8225_s21 = smov (%p36_p2, %s8223_s21), 0  ;;  %s3728_s15 = sshll.u32 %s229_s13, 3 }
  0x2f   : > { %7836 = sst [smem:[#allocation18_spill]] %s8225_s21  ;;  %s131_s16 = ssub.s32 %s4564_s27, %s8225_s21 }
  0x30   : > { %p132_p13 = scmp.eq.s32.totalorder %s131_s16, 0  ;;  %s159_s17 = sor.u32 %s158_s30, %s131_s16 }
  0x31   : > { %p160_p6 = scmp.eq.s32.totalorder %s159_s17, 0  ;;  %s3729_s7 = sshll.u32 %s4564_s27, 7 }
  0x32   : > { %s4720_s3 = scalar_select %p132_p13, %s4548_s23, %s134_s29  }
  0x33   : > { %s7837_s14 = sadd.s32 1, %s4536_s20  ;;  %s238_s5 = scalar_lea.hbm %s7661_s4, %s3729_s7 }
  0x34   : > { %s4725_s26 = scalar_select %p160_p6, %s4536_s20, %s7837_s14  }
  0x35   : > { %s233_s9 = scalar_lea.vmem [#allocation7], %s3728_s15  ;;  %p4734_p8 = pnand %p3846_p4, %p4709_p5 }
  0x36   : > { %s240_s2 = sshll.u32 %s233_s9, 4  ;;  %s230_s30 = scalar_lea.sflag [#allocation8], %s229_s13  ;;  %s241_s2 = int_to_ptr.vmem [resolvable:$true] %s240_s2 }
  0x37   : > { %p4418_p10 = pneg %p4734_p8  ;;  %s4429_s29 = scalar_lea.vmem %s241_s2, 128 }
  0x38   : > { %p4430_p12 = scmp.ne.s32.totalorder %s241_s2, %s4429_s29  ;;  %s4571_s14 = smov [#allocation7]  }
  0x39   : > { %s4434_s18 = sshll.u32 %s4571_s14, 4  ;;  %s4435_s18 = int_to_ptr.vmem [resolvable:$false] %s4434_s18 }
  0x3a   : > { %p4432_p9 = pnand %p4430_p12, %p4418_p10  ;;  %s4436_s7 = scalar_lea.vmem %s4435_s18, 256 }
  0x3b   : > { %p4437_p2 = scmp.lt.s32.totalorder %s241_s2, %s4435_s18  ;;  %p4438_p13 = scmp.lt.s32.totalorder %s4436_s7, %s4429_s29 }
  0x3c   : > { %p4433_p0 = pneg %p4432_p9 }
  0x3d   : > { %p4439_p6 = por %p4438_p13, %p4437_p2 }
  0x3f   : > { %p4440_p7 = pnand %p4439_p6, %p4433_p0 }
  0x41   : > { %4443 = shalt.err (!%p4440_p7)
}
  0x42   : > { %3840 = dma.hbm_to_vmem [thread:$0]  (!%p4734_p8), %s238_s5, 128, %s241_s2, %s230_s30  }
  0x43   : > { %249 = sbr.rel (%p4686_p11) target bundleno = 4157 (0x103d), region = 40 }
  0x48   : > { %4515 = dma.done.wait (%p4661_p1), [#allocation5], 64  }
  0x49   : > { %4517 = vsyncadd (%p4661_p1), [#allocation5], 4294967232  ;;  %s255_s9 = sand.u32 1, %s4544_s22  }
  0x4a   : > { %s3732_s10 = sshll.u32 %s255_s9, 3  ;;  %s256_s12 = scalar_lea.sflag [#allocation8], %s255_s9 }
  0x4b   : > { %s4749_s13 = scalar_lea.vmem [#allocation7], %s3732_s10 }
  0x4c   : > { %4519 = dma.done.wait (%p4670_p3), %s256_s12, 128  }
  0x4d   : > { %4521 = vsyncadd (%p4670_p3), %s256_s12, 4294967168  ;;  %s290_s2 = sand.u32 1, %s4532_s19   ;;  %s3734_s5 = sshll.u32 %s4556_s25, 1 }
  0x4e   : > { %s3733_s6 = sshll.u32 %s290_s2, 7  ;;  %s294_s11 = sadd.s32 %s4552_s24, %s3734_s5 }
  0x4f   : > { %s3735_s21 = sshll.u32 %s294_s11, 4  ;;  %s4765_s8 = scalar_lea.vmem [#allocation9], %s3733_s6 }
  0x50   : > { %p296_p1 = scmp.lt.s32.totalorder %s3735_s21, 63  ;;  %p3737_p3 = scmp.ne.s32.totalorder %s4552_s24, 0 }
  0x52   : > { %s8227_s21 = smov (!%p296_p1, %s3735_s21), 63  ;;  %307 = sbr.rel (%p3737_p3) target bundleno = 89 (0x59), region = 52 }
  0x53   : > { %s3736_s15 = sshll.u32 %s8227_s21, 3 }
  0x54   : > { %s4763_s30 = scalar_lea.vmem %s7657_s0, %s3736_s15 }
  0x57   : > { %v4572_v0 = vmov 0.0  }
  0x58   : > { %308 = vst [vmem:[#allocation2] sm:$0xff] %v4572_v0  ;;  %309 = vst [vmem:[#allocation3] sm:$0xff] %v4572_v0 }
  0x59 PF: > { %v315_v1 = vld [vmem:[%s7658_s1 + $0x28] sm:$0xff]  ;;  %v317_v2 = vld [vmem:[%s7658_s1 + $0x38] sm:$0xff]  ;;  %v314_v3 = vld [vmem:[%s7658_s1 + $0x20] sm:$0xff]  ;;  %vm422_vm0 = vcmask 130048   ;;  %v7673_v10 = vmov 0.0   ;;  %s7839_s9 = sld [smem:[#allocation99_spill]] }
  0x5a   : > { %499 = vmatprep.subr.mxu0 %v315_v1  ;;  %660 = vmatprep.subr.mxu1 %v317_v2  ;;  %v316_v4 = vld [vmem:[%s7658_s1 + $0x30] sm:$0xff]  ;;  %v311_v5 = vld [vmem:[%s7658_s1 + $0x8] sm:$0xff]  ;;  %v313_v6 = vld [vmem:[%s7658_s1 + $0x18] sm:$0xff]  ;;  %s5534_s17 = sshll.u32 %s4552_s24, 4  ;;  %s3613_s29 = sshll.u32 %s4765_s8, 4  ;;  %s7595_s29 = int_to_ptr.vmem [resolvable:$true] %s3613_s29 }
  0x5b   : > { %500 = vmatpush1.msra.mxu0 %v314_v3  ;;  %661 = vmatpush1.msra.mxu1 %v316_v4  ;;  %v310_v7 = vld [vmem:[%s7658_s1] sm:$0xff]  ;;  %v312_v8 = vld [vmem:[%s7658_s1 + $0x10] sm:$0xff]  ;;  %v386_v14 = vld [vmem:[%s4763_s30 + $0x8] sm:$0xff]  ;;  %s1139_s7 = sadd.s32 1, %s5534_s17  ;;  %s1664_s10 = sadd.s32 4, %s5534_s17 }
  0x5c   : > { %501 = vmatprep.subr.mxu0 %v311_v5  ;;  %662 = vmatprep.subr.mxu1 %v313_v6  ;;  %v385_v9 = vld [vmem:[%s4763_s30] sm:$0xff]  ;;  %v387_v20 = vld [vmem:[%s4763_s30 + $0x10] sm:$0xff]  ;;  %v388_v25 = vld [vmem:[%s4763_s30 + $0x18] sm:$0xff]  ;;  %s1839_s12 = sadd.s32 5, %s5534_s17  ;;  %s2539_s15 = sadd.s32 9, %s5534_s17 }
  0x5d   : > { %502 = vmatpush1.msra.mxu0 %v310_v7  ;;  %535 = vmatprep.mubr.f32.mxu0 %v7673_v10  ;;  %v389_v30 = vld [vmem:[%s4763_s30 + $0x20] sm:$0xff]  ;;  %v390_v35 = vld [vmem:[%s4763_s30 + $0x28] sm:$0xff]  ;;  %v391_v40 = vld [vmem:[%s4763_s30 + $0x30] sm:$0xff]  ;;  %s2714_s16 = sadd.s32 10, %s5534_s17  ;;  %s2889_s18 = sadd.s32 11, %s5534_s17 }
  0x5e   : > { %663 = vmatpush1.msra.mxu1 %v312_v8  ;;  %696 = vmatprep.mubr.f32.mxu1 %v7673_v10  ;;  %v392_v45 = vld [vmem:[%s4763_s30 + $0x38] sm:$0xff]  ;;  %v393_v50 = vld [vmem:[%s4763_s30 + $0x40] sm:$0xff]  ;;  %v394_v55 = vld [vmem:[%s4763_s30 + $0x48] sm:$0xff]  ;;  %s3064_s5 = sadd.s32 12, %s5534_s17  ;;  %s3239_s11 = sadd.s32 13, %s5534_s17 }
  0x5f   : > { %v4797_v11 = vld [vmem:[%s7839_s9 + $0x1e8] sm:$0xff]  ;;  %v4803_v12 = vld [vmem:[%s7839_s9 + $0x1e0] sm:$0xff]  ;;  %3739 = vmatmul.mubr.msk.f32.vlgmr.msra.gmra.mxu0 %vm422_vm0, %v385_v9  ;;  %3755 = vmatmul.mubr.msk.f32.vlgmr.msra.gmra.mxu1 %vm422_vm0, %v385_v9  ;;  %v4818_v15 = vld [vmem:[%s7839_s9 + $0x1f8] sm:$0xff]  ;;  %s3414_s21 = sadd.s32 14, %s5534_s17 }
  0x60   : > { %v4810_v13 = vld [vmem:[%s7839_s9 + $0x1c8] sm:$0xff]  ;;  %795 = vmatprep.subr.mxu0 %v4797_v11  ;;  %541 = vmatprep.mubr.f32.mxu0 %v7673_v10  ;;  %v4825_v16 = vld [vmem:[%s7839_s9 + $0x1c0] sm:$0xff]  ;;  %v4844_v19 = vld [vmem:[%s7839_s9 + $0x1f0] sm:$0xff] }
  0x61   : > { %796 = vmatpush1.msra.mxu0 %v4803_v12  ;;  %702 = vmatprep.mubr.f32.mxu1 %v7673_v10  ;;  %v4831_v17 = vld [vmem:[%s7839_s9 + $0x1a8] sm:$0xff]  ;;  %v4839_v18 = vld [vmem:[%s7839_s9 + $0x1a0] sm:$0xff]  ;;  %v4861_v22 = vld [vmem:[%s7839_s9 + $0x1d8] sm:$0xff] }
  0x62   : > { %797 = vmatprep.subr.mxu0 %v4810_v13  ;;  %866 = vmatprep.subr.mxu1 %v4818_v15  ;;  %v4855_v21 = vld [vmem:[%s7839_s9 + $0x188] sm:$0xff]  ;;  %v4868_v23 = vld [vmem:[%s7839_s9 + $0x180] sm:$0xff]  ;;  %v4873_v24 = vld [vmem:[%s7839_s9 + $0x1d0] sm:$0xff] }
  0x63   : > { %3740 = vmatmul.mubr.msk.f32.gmra.mxu0 %vm422_vm0, %v386_v14  ;;  %3756 = vmatmul.mubr.msk.f32.gmra.mxu1 %vm422_vm0, %v386_v14  ;;  %v4884_v26 = vld [vmem:[%s7839_s9 + $0x168] sm:$0xff]  ;;  %v4890_v27 = vld [vmem:[%s7839_s9 + $0x1b8] sm:$0xff]  ;;  %v4897_v28 = vld [vmem:[%s7839_s9 + $0x160] sm:$0xff] }
  0x64   : > { %798 = vmatpush1.msra.mxu0 %v4825_v16  ;;  %547 = vmatprep.mubr.f32.mxu0 %v7673_v10  ;;  %v4902_v29 = vld [vmem:[%s7839_s9 + $0x1b0] sm:$0xff]  ;;  %v4913_v31 = vld [vmem:[%s7839_s9 + $0x148] sm:$0xff]  ;;  %v4919_v32 = vld [vmem:[%s7839_s9 + $0x198] sm:$0xff] }
  0x65   : > { %708 = vmatprep.mubr.f32.mxu1 %v7673_v10  ;;  %799 = vmatprep.subr.mxu0 %v4831_v17  ;;  %v4926_v33 = vld [vmem:[%s7839_s9 + $0x140] sm:$0xff]  ;;  %v4931_v34 = vld [vmem:[%s7839_s9 + $0x190] sm:$0xff]  ;;  %v4942_v36 = vld [vmem:[%s7839_s9 + $0x128] sm:$0xff] }
  0x66   : > { %800 = vmatpush1.msra.mxu0 %v4839_v18  ;;  %867 = vmatpush1.msra.mxu1 %v4844_v19  ;;  %v4948_v37 = vld [vmem:[%s7839_s9 + $0x178] sm:$0xff]  ;;  %v4955_v38 = vld [vmem:[%s7839_s9 + $0x120] sm:$0xff]  ;;  %v4960_v39 = vld [vmem:[%s7839_s9 + $0x170] sm:$0xff] }
  0x67   : > { %3741 = vmatmul.mubr.msk.f32.gmra.mxu0 %vm422_vm0, %v387_v20  ;;  %3757 = vmatmul.mubr.msk.f32.gmra.mxu1 %vm422_vm0, %v387_v20  ;;  %v4971_v41 = vld [vmem:[%s7839_s9 + $0x108] sm:$0xff]  ;;  %v4977_v42 = vld [vmem:[%s7839_s9 + $0x158] sm:$0xff]  ;;  %v4984_v43 = vld [vmem:[%s7839_s9 + $0x100] sm:$0xff] }
  0x68   : > { %553 = vmatprep.mubr.f32.mxu0 %v7673_v10  ;;  %714 = vmatprep.mubr.f32.mxu1 %v7673_v10  ;;  %v4989_v44 = vld [vmem:[%s7839_s9 + $0x150] sm:$0xff]  ;;  %v5000_v46 = vld [vmem:[%s7839_s9 + $0xe8] sm:$0xff]  ;;  %v5006_v47 = vld [vmem:[%s7839_s9 + $0x138] sm:$0xff] }
  0x69   : > { %801 = vmatprep.subr.mxu0 %v4855_v21  ;;  %868 = vmatprep.subr.mxu1 %v4861_v22  ;;  %v5013_v48 = vld [vmem:[%s7839_s9 + $0xe0] sm:$0xff]  ;;  %v5018_v49 = vld [vmem:[%s7839_s9 + $0x130] sm:$0xff]  ;;  %v5029_v51 = vld [vmem:[%s7839_s9 + $0xc8] sm:$0xff] }
  0x6a   : > { %802 = vmatpush1.msra.mxu0 %v4868_v23  ;;  %869 = vmatpush1.msra.mxu1 %v4873_v24  ;;  %v5035_v52 = vld [vmem:[%s7839_s9 + $0x118] sm:$0xff]  ;;  %v5042_v53 = vld [vmem:[%s7839_s9 + $0xc0] sm:$0xff]  ;;  %v5047_v54 = vld [vmem:[%s7839_s9 + $0x110] sm:$0xff] }
  0x6b   : > { %3742 = vmatmul.mubr.msk.f32.gmra.mxu0 %vm422_vm0, %v388_v25  ;;  %3758 = vmatmul.mubr.msk.f32.gmra.mxu1 %vm422_vm0, %v388_v25  ;;  %v5058_v56 = vld [vmem:[%s7839_s9 + $0xa8] sm:$0xff]  ;;  %v5064_v57 = vld [vmem:[%s7839_s9 + $0xf8] sm:$0xff]  ;;  %v5071_v58 = vld [vmem:[%s7839_s9 + $0xa0] sm:$0xff] }
  0x6c   : > { %559 = vmatprep.mubr.f32.mxu0 %v7673_v10  ;;  %720 = vmatprep.mubr.f32.mxu1 %v7673_v10  ;;  %v5076_v59 = vld [vmem:[%s7839_s9 + $0xf0] sm:$0xff]  ;;  %v5087_v61 = vld [vmem:[%s7839_s9 + $0x88] sm:$0xff]  ;;  %v5093_v62 = vld [vmem:[%s7839_s9 + $0xd8] sm:$0xff] }
  0x6d   : > { %803 = vmatprep.subr.mxu0 %v4884_v26  ;;  %870 = vmatprep.subr.mxu1 %v4890_v27  ;;  %v395_v60 = vld [vmem:[%s4763_s30 + $0x50] sm:$0xff]  ;;  %7840 = vst [vmem:[#allocation19_spill] sm:$0xff] %v5087_v61  ;;  %v5100_v63 = vld [vmem:[%s7839_s9 + $0x80] sm:$0xff]  ;;  %v396_v1 = vld [vmem:[%s4763_s30 + $0x58] sm:$0xff] }
  0x6e   : > { %804 = vmatpush1.msra.mxu0 %v4897_v28  ;;  %871 = vmatpush1.msra.mxu1 %v4902_v29  ;;  %7841 = vst [vmem:[#allocation20_spill] sm:$0xff] %v5100_v63  ;;  %v5105_v0 = vld [vmem:[%s7839_s9 + $0xd0] sm:$0xff]  ;;  %v5116_v2 = vld [vmem:[%s7839_s9 + $0x68] sm:$0xff]  ;;  %v5122_v3 = vld [vmem:[%s7839_s9 + $0xb8] sm:$0xff] }
  0x6f   : > { %3743 = vmatmul.mubr.msk.f32.gmra.mxu0 %vm422_vm0, %v389_v30  ;;  %3759 = vmatmul.mubr.msk.f32.gmra.mxu1 %vm422_vm0, %v389_v30  ;;  %7842 = vst [vmem:[#allocation21_spill] sm:$0xff] %v5116_v2  ;;  %v5129_v4 = vld [vmem:[%s7839_s9 + $0x60] sm:$0xff]  ;;  %v5134_v5 = vld [vmem:[%s7839_s9 + $0xb0] sm:$0xff]  ;;  %v5145_v7 = vld [vmem:[%s7839_s9 + $0x48] sm:$0xff] }
  0x70   : > { %565 = vmatprep.mubr.f32.mxu0 %v7673_v10  ;;  %726 = vmatprep.mubr.f32.mxu1 %v7673_v10  ;;  %7843 = vst [vmem:[#allocation22_spill] sm:$0xff] %v5129_v4  ;;  %v397_v6 = vld [vmem:[%s4763_s30 + $0x60] sm:$0xff]  ;;  %7844 = vst [vmem:[#allocation23_spill] sm:$0xff] %v5145_v7  ;;  %v5151_v8 = vld [vmem:[%s7839_s9 + $0x98] sm:$0xff] }
  0x71   : > { %805 = vmatprep.subr.mxu0 %v4913_v31  ;;  %872 = vmatprep.subr.mxu1 %v4919_v32  ;;  %7845 = vst [vmem:[#allocation24_spill] sm:$0xff] %v5151_v8  ;;  %v5158_v9 = vld [vmem:[%s7839_s9 + $0x40] sm:$0xff]  ;;  %v5163_v14 = vld [vmem:[%s7839_s9 + $0x90] sm:$0xff]  ;;  %v398_v20 = vld [vmem:[%s4763_s30 + $0x68] sm:$0xff] }
  0x72   : > { %806 = vmatpush1.msra.mxu0 %v4926_v33  ;;  %873 = vmatpush1.msra.mxu1 %v4931_v34  ;;  %7846 = vst [vmem:[#allocation25_spill] sm:$0xff] %v5158_v9  ;;  %7847 = vst [vmem:[#allocation26_spill] sm:$0xff] %v5163_v14  ;;  %v5175_v25 = vld [vmem:[%s7839_s9 + $0x28] sm:$0xff]  ;;  %v5180_v30 = vld [vmem:[%s7839_s9 + $0x78] sm:$0xff] }
  0x73   : > { %3744 = vmatmul.mubr.msk.f32.gmra.mxu0 %vm422_vm0, %v390_v35  ;;  %3760 = vmatmul.mubr.msk.f32.gmra.mxu1 %vm422_vm0, %v390_v35  ;;  %7848 = vst [vmem:[#allocation27_spill] sm:$0xff] %v5175_v25  ;;  %7849 = vst [vmem:[#allocation28_spill] sm:$0xff] %v5180_v30  ;;  %v5187_v35 = vld [vmem:[%s7839_s9 + $0x20] sm:$0xff] }
  0x74   : > { %571 = vmatprep.mubr.f32.mxu0 %v7673_v10  ;;  %732 = vmatprep.mubr.f32.mxu1 %v7673_v10  ;;  %7850 = vst [vmem:[#allocation29_spill] sm:$0xff] %v5187_v35 }
  0x75   : > { %807 = vmatprep.subr.mxu0 %v4942_v36  ;;  %874 = vmatprep.subr.mxu1 %v4948_v37 }
  0x76   : > { %808 = vmatpush1.msra.mxu0 %v4955_v38  ;;  %875 = vmatpush1.msra.mxu1 %v4960_v39 }
  0x77   : > { %3745 = vmatmul.mubr.msk.f32.gmra.mxu0 %vm422_vm0, %v391_v40  ;;  %3761 = vmatmul.mubr.msk.f32.gmra.mxu1 %vm422_vm0, %v391_v40  ;;  %v5192_v40 = vld [vmem:[%s7839_s9 + $0x70] sm:$0xff] }
  0x78   : > { %577 = vmatprep.mubr.f32.mxu0 %v7673_v10  ;;  %738 = vmatprep.mubr.f32.mxu1 %v7673_v10  ;;  %7851 = vst [vmem:[#allocation30_spill] sm:$0xff] %v5192_v40 }
  0x79   : > { %809 = vmatprep.subr.mxu0 %v4971_v41  ;;  %876 = vmatprep.subr.mxu1 %v4977_v42 }
  0x7a   : > { %810 = vmatpush1.msra.mxu0 %v4984_v43  ;;  %877 = vmatpush1.msra.mxu1 %v4989_v44 }
  0x7b   : > { %3746 = vmatmul.mubr.msk.f32.gmra.mxu0 %vm422_vm0, %v392_v45  ;;  %3762 = vmatmul.mubr.msk.f32.gmra.mxu1 %vm422_vm0, %v392_v45  ;;  %v399_v45 = vld [vmem:[%s4763_s30 + $0x70] sm:$0xff] }
  0x7c   : > { %583 = vmatprep.mubr.f32.mxu0 %v7673_v10  ;;  %744 = vmatprep.mubr.f32.mxu1 %v7673_v10 }
  0x7d   : > { %811 = vmatprep.subr.mxu0 %v5000_v46  ;;  %878 = vmatprep.subr.mxu1 %v5006_v47 }
  0x7e   : > { %812 = vmatpush1.msra.mxu0 %v5013_v48  ;;  %879 = vmatpush1.msra.mxu1 %v5018_v49 }
  0x7f   : > { %3747 = vmatmul.mubr.msk.f32.gmra.mxu0 %vm422_vm0, %v393_v50  ;;  %3763 = vmatmul.mubr.msk.f32.gmra.mxu1 %vm422_vm0, %v393_v50  ;;  %v5202_v50 = vld [vmem:[%s7839_s9 + $0x58] sm:$0xff] }
  0x80   : > { %589 = vmatprep.mubr.f32.mxu0 %v7673_v10  ;;  %750 = vmatprep.mubr.f32.mxu1 %v7673_v10  ;;  %7852 = vst [vmem:[#allocation31_spill] sm:$0xff] %v5202_v50 }
  0x81   : > { %813 = vmatprep.subr.mxu0 %v5029_v51  ;;  %880 = vmatprep.subr.mxu1 %v5035_v52 }
  0x82   : > { %814 = vmatpush1.msra.mxu0 %v5042_v53  ;;  %881 = vmatpush1.msra.mxu1 %v5047_v54 }
  0x83   : > { %3748 = vmatmul.mubr.msk.f32.gmra.mxu0 %vm422_vm0, %v394_v55  ;;  %3764 = vmatmul.mubr.msk.f32.gmra.mxu1 %vm422_vm0, %v394_v55  ;;  %v5209_v55 = vld [vmem:[%s7839_s9 + $0x50] sm:$0xff] }
  0x84   : > { %595 = vmatprep.mubr.f32.mxu0 %v7673_v10  ;;  %756 = vmatprep.mubr.f32.mxu1 %v7673_v10  ;;  %7853 = vst [vmem:[#allocation32_spill] sm:$0xff] %v5209_v55 }
  0x85   : > { %815 = vmatprep.subr.mxu0 %v5058_v56  ;;  %882 = vmatprep.subr.mxu1 %v5064_v57 }
  0x86   : > { %816 = vmatpush1.msra.mxu0 %v5071_v58  ;;  %883 = vmatpush1.msra.mxu1 %v5076_v59 }
  0x87   : > { %3749 = vmatmul.mubr.msk.f32.gmra.mxu0 %vm422_vm0, %v395_v60  ;;  %3765 = vmatmul.mubr.msk.f32.gmra.mxu1 %vm422_vm0, %v395_v60  ;;  %v5216_v60 = vld [vmem:[%s7839_s9 + $0x8] sm:$0xff] }
  0x88   : > { %601 = vmatprep.mubr.f32.mxu0 %v7673_v10  ;;  %762 = vmatprep.mubr.f32.mxu1 %v7673_v10  ;;  %7854 = vst [vmem:[#allocation33_spill] sm:$0xff] %v5216_v60 }
  0x89   : > { %817 = vmatprep.subr.mxu0 %v5087_v61  ;;  %884 = vmatprep.subr.mxu1 %v5093_v62 }
  0x8a   : > { %818 = vmatpush1.msra.mxu0 %v5100_v63  ;;  %885 = vmatpush1.msra.mxu1 %v5105_v0 }
  0x8b   : > { %3750 = vmatmul.mubr.msk.f32.gmra.mxu0 %vm422_vm0, %v396_v1  ;;  %3766 = vmatmul.mubr.msk.f32.gmra.mxu1 %vm422_vm0, %v396_v1  ;;  %v5221_v1 = vld [vmem:[%s7839_s9 + $0x38] sm:$0xff] }
  0x8c   : > { %607 = vmatprep.mubr.f32.mxu0 %v7673_v10  ;;  %768 = vmatprep.mubr.f32.mxu1 %v7673_v10  ;;  %7855 = vst [vmem:[#allocation34_spill] sm:$0xff] %v5221_v1 }
  0x8d   : > { %819 = vmatprep.subr.mxu0 %v5116_v2  ;;  %886 = vmatprep.subr.mxu1 %v5122_v3 }
  0x8e   : > { %820 = vmatpush1.msra.mxu0 %v5129_v4  ;;  %887 = vmatpush1.msra.mxu1 %v5134_v5 }
  0x8f   : > { %3751 = vmatmul.mubr.msk.f32.gmra.mxu0 %vm422_vm0, %v397_v6  ;;  %3767 = vmatmul.mubr.msk.f32.gmra.mxu1 %vm422_vm0, %v397_v6  ;;  %v400_v6 = vld [vmem:[%s4763_s30 + $0x78] sm:$0xff]  ;;  %s1314_s30 = sadd.s32 2, %s5534_s17 }
  0x90   : > { %613 = vmatprep.mubr.f32.mxu0 %v7673_v10  ;;  %774 = vmatprep.mubr.f32.mxu1 %v7673_v10 }
  0x91   : > { %821 = vmatprep.subr.mxu0 %v5145_v7  ;;  %888 = vmatprep.subr.mxu1 %v5151_v8 }
  0x92   : > { %822 = vmatpush1.msra.mxu0 %v5158_v9  ;;  %889 = vmatpush1.msra.mxu1 %v5163_v14 }
  0x93   : > { %3752 = vmatmul.mubr.msk.f32.gmra.mxu0 %vm422_vm0, %v398_v20  ;;  %3768 = vmatmul.mubr.msk.f32.gmra.mxu1 %vm422_vm0, %v398_v20  ;;  %v5231_v20 = vld [vmem:[%s7839_s9] sm:$0xff] }
  0x94   : > { %619 = vmatprep.mubr.f32.mxu0 %v7673_v10  ;;  %780 = vmatprep.mubr.f32.mxu1 %v7673_v10  ;;  %7856 = vst [vmem:[#allocation35_spill] sm:$0xff] %v5231_v20 }
  0x95   : > { %823 = vmatprep.subr.mxu0 %v5175_v25  ;;  %890 = vmatprep.subr.mxu1 %v5180_v30 }
  0x96   : > { %824 = vmatpush1.msra.mxu0 %v5187_v35  ;;  %891 = vmatpush1.msra.mxu1 %v5192_v40  ;;  %v5250_v35 = vld [vmem:[%s7839_s9 + $0x10] sm:$0xff] }
  0x97   : > { %3753 = vmatmul.mubr.msk.f32.gmra.mxu0 %vm422_vm0, %v399_v45  ;;  %3769 = vmatmul.mubr.msk.f32.gmra.mxu1 %vm422_vm0, %v399_v45  ;;  %v5236_v45 = vld [vmem:[%s7839_s9 + $0x30] sm:$0xff]  ;;  %7859 = vst [vmem:[#allocation38_spill] sm:$0xff] %v5250_v35 }
  0x98   : > { %892 = vmatprep.subr.mxu1 %v5202_v50  ;;  %625 = vmatprep.mubr.f32.mxu0 %v7673_v10  ;;  %7857 = vst [vmem:[#allocation36_spill] sm:$0xff] %v5236_v45 }
  0x99   : > { %786 = vmatprep.mubr.f32.mxu1 %v7673_v10  ;;  %893 = vmatpush1.msra.mxu1 %v5209_v55  ;;  %v5243_v10 = vld [vmem:[%s7839_s9 + $0x18] sm:$0xff] }
  0x9a   : > { %825 = vmatprep.subr.mxu0 %v5216_v60  ;;  %894 = vmatprep.subr.mxu1 %v5221_v1  ;;  %7858 = vst [vmem:[#allocation37_spill] sm:$0xff] %v5243_v10  ;;  %v793_v60 = vld [vmem:[#allocation2] sm:$0xff]  ;;  %v7860_v1 = vmov 0.0  }
  0x9b   : > { %3754 = vmatmul.mubr.msk.f32.gmra.mxu0 %vm422_vm0, %v400_v6  ;;  %3770 = vmatmul.mubr.msk.f32.gmra.mxu1 %vm422_vm0, %v400_v6  ;;  %v7862_v6 = vld [vmem:[#allocation29_spill] sm:$0xff] }
  0x9c   : > { %826 = vmatpush1.msra.mxu0 %v5231_v20  ;;  %895 = vmatpush1.msra.mxu1 %v5236_v45 }
  0x9d   : > { %896 = vmatprep.subr.mxu1 %v5243_v10  ;;  %859 = vmatprep.mubr.f32.mxu0 %v7860_v1 }
  0x9e   : > { %897 = vmatpush1.msra.mxu1 %v5250_v35  ;;  %930 = vmatprep.mubr.f32.mxu1 %v7860_v1 }
  0x9f   : > { %860 = vmatmul.mubr.f32.vlgmr.msra.gmra.mxu0 %v793_v60  ;;  %931 = vmatmul.mubr.f32.vlgmr.msra.gmra.mxu1 %v793_v60  ;;  %v7861_v60 = vld [vmem:[#allocation34_spill] sm:$0xff] }
  0xa0   : > { %969 = vmatprep.subr.mxu0 %v4797_v11  ;;  %1040 = vmatprep.subr.mxu1 %v4818_v15 }
  0xa1   : > { %970 = vmatpush1.msra.mxu0 %v4803_v12  ;;  %1041 = vmatpush1.msra.mxu1 %v4844_v19 }
  0xa2   : > { %971 = vmatprep.subr.mxu0 %v4810_v13  ;;  %1042 = vmatprep.subr.mxu1 %v4861_v22 }
  0xa3   : > { %972 = vmatpush1.msra.mxu0 %v4825_v16  ;;  %1043 = vmatpush1.msra.mxu1 %v4873_v24 }
  0xa4   : > { %973 = vmatprep.subr.mxu0 %v4831_v17  ;;  %1044 = vmatprep.subr.mxu1 %v4890_v27 }
  0xa5   : > { %974 = vmatpush1.msra.mxu0 %v4839_v18  ;;  %1045 = vmatpush1.msra.mxu1 %v4902_v29 }
  0xa6   : > { %975 = vmatprep.subr.mxu0 %v4855_v21  ;;  %1046 = vmatprep.subr.mxu1 %v4919_v32 }
  0xa7   : > { %976 = vmatpush1.msra.mxu0 %v4868_v23  ;;  %1047 = vmatpush1.msra.mxu1 %v4931_v34 }
  0xa8   : > { %977 = vmatprep.subr.mxu0 %v4884_v26  ;;  %1048 = vmatprep.subr.mxu1 %v4948_v37 }
  0xa9   : > { %978 = vmatpush1.msra.mxu0 %v4897_v28  ;;  %1049 = vmatpush1.msra.mxu1 %v4960_v39 }
  0xaa   : > { %979 = vmatprep.subr.mxu0 %v4913_v31  ;;  %1050 = vmatprep.subr.mxu1 %v4977_v42 }
  0xab   : > { %980 = vmatpush1.msra.mxu0 %v4926_v33  ;;  %1051 = vmatpush1.msra.mxu1 %v4989_v44 }
  0xac   : > { %981 = vmatprep.subr.mxu0 %v4942_v36  ;;  %1052 = vmatprep.subr.mxu1 %v5006_v47 }
  0xad   : > { %982 = vmatpush1.msra.mxu0 %v4955_v38  ;;  %1053 = vmatpush1.msra.mxu1 %v5018_v49 }
  0xae   : > { %983 = vmatprep.subr.mxu0 %v4971_v41  ;;  %1054 = vmatprep.subr.mxu1 %v5035_v52 }
  0xaf   : > { %984 = vmatpush1.msra.mxu0 %v4984_v43  ;;  %1055 = vmatpush1.msra.mxu1 %v5047_v54 }
  0xb0   : > { %985 = vmatprep.subr.mxu0 %v5000_v46  ;;  %1056 = vmatprep.subr.mxu1 %v5064_v57 }
  0xb1   : > { %986 = vmatpush1.msra.mxu0 %v5013_v48  ;;  %1057 = vmatpush1.msra.mxu1 %v5076_v59 }
  0xb2   : > { %987 = vmatprep.subr.mxu0 %v5029_v51  ;;  %1058 = vmatprep.subr.mxu1 %v5093_v62 }
  0xb3   : > { %988 = vmatpush1.msra.mxu0 %v5042_v53  ;;  %1059 = vmatpush1.msra.mxu1 %v5105_v0 }
  0xb4   : > { %989 = vmatprep.subr.mxu0 %v5058_v56  ;;  %1060 = vmatprep.subr.mxu1 %v5122_v3 }
  0xb5   : > { %990 = vmatpush1.msra.mxu0 %v5071_v58  ;;  %1061 = vmatpush1.msra.mxu1 %v5134_v5 }
  0xb6   : > { %991 = vmatprep.subr.mxu0 %v5087_v61  ;;  %1062 = vmatprep.subr.mxu1 %v5151_v8 }
  0xb7   : > { %992 = vmatpush1.msra.mxu0 %v5100_v63  ;;  %1063 = vmatpush1.msra.mxu1 %v5163_v14 }
  0xb8   : > { %993 = vmatprep.subr.mxu0 %v5116_v2  ;;  %1064 = vmatprep.subr.mxu1 %v5180_v30  ;;  %v7863_v30 = vld [vmem:[#allocation33_spill] sm:$0xff] }
  0xb9   : > { %994 = vmatpush1.msra.mxu0 %v5129_v4  ;;  %1065 = vmatpush1.msra.mxu1 %v5192_v40 }
  0xba   : > { %995 = vmatprep.subr.mxu0 %v5145_v7  ;;  %1066 = vmatprep.subr.mxu1 %v5202_v50 }
  0xbb   : > { %996 = vmatpush1.msra.mxu0 %v5158_v9  ;;  %1067 = vmatpush1.msra.mxu1 %v5209_v55  ;;  %v382_v55 = vld [vmem:[#allocation4] sm:$0xf] }
  0xbc   : > { %997 = vmatprep.subr.mxu0 %v5175_v25  ;;  %1068 = vmatprep.subr.mxu1 %v7861_v60  ;;  %v402_v60 = vlaneseq }
  0xbd   : > { %998 = vmatpush1.msra.mxu0 %v7862_v6  ;;  %1069 = vmatpush1.msra.mxu1 %v5236_v45 }
  0xbe   : > { %999 = vmatprep.subr.mxu0 %v7863_v30  ;;  %1070 = vmatprep.subr.mxu1 %v5243_v10  ;;  %v403_v6 = vshrl.u32 %v402_v60, 7 }
  0xbf   : > { %1000 = vmatpush1.msra.mxu0 %v5231_v20  ;;  %1033 = vmatprep.mubr.f32.mxu0 %v7860_v1 }
  0xc0   : > { %1071 = vmatpush1.msra.mxu1 %v5250_v35  ;;  %1104 = vmatprep.mubr.f32.mxu1 %v7860_v1  ;;  %v404_v25 = vsub.s32 0, %v403_v6  ;;  %v412_v45 = vsub.s32 2, %v403_v6  ;;  %v408_v20 = vsub.s32 1, %v403_v6  ;;  %v416_v9 = vsub.s32 3, %v403_v6 }
  0xc1   : > { %1144 = vmatprep.subr.mxu0 %v4797_v11  ;;  %1215 = vmatprep.subr.mxu1 %v4818_v15 }
  0xc2   : > { %v5334_v1 = vrot.slane %v382_v55, %v404_v25  ;;  %v5336_v11 = vrot.slane %v382_v55, %v412_v45  ;;  %v5338_v60 = vrot.slane %v382_v55, %v408_v20  ;;  %v5340_v40 = vrot.slane %v382_v55, %v416_v9 }
 0x11f   : > { %v5326_v30 = vpop.f32.mrf.mxu0  ;;  %v5328_v10 = vpop.f32.mrf.mxu1 }
 0x121   : > { %v5330_v50 = vpop.f32.mrf.mxu0  ;;  %v5332_v35 = vpop.f32.mrf.mxu1 }
 0x123   : > { %v543_v15 = vpop.f32.mrf.mxu0  ;;  %v704_v7 = vpop.f32.mrf.mxu1 }
 0x124   : > { %v5343_v4 = vadd.f32 %v543_v15, %v5334_v1  ;;  %v5346_v2 = vadd.f32 %v704_v7, %v5336_v11 }
 0x125   : > { %v545_v6 = vpop.f32.mrf.mxu0  ;;  %v706_v14 = vpop.f32.mrf.mxu1 }
 0x126   : > { %7864 = vst [vmem:[#allocation39_spill] sm:$0xff] %v5343_v4  ;;  %7865 = vst [vmem:[#allocation40_spill] sm:$0xff] %v5346_v2  ;;  %v5349_v63 = vadd.f32 %v545_v6, %v5338_v60  ;;  %v5352_v25 = vadd.f32 %v706_v14, %v5340_v40 }
 0x127   : > { %v549_v45 = vpop.f32.mrf.mxu0  ;;  %v710_v8 = vpop.f32.mrf.mxu1 }
 0x128   : > { %7866 = vst [vmem:[#allocation41_spill] sm:$0xff] %v5349_v63  ;;  %7867 = vst [vmem:[#allocation42_spill] sm:$0xff] %v5352_v25  ;;  %v5355_v20 = vadd.f32 %v549_v45, %v5334_v1  ;;  %v5358_v9 = vadd.f32 %v710_v8, %v5336_v11 }
 0x129   : > { %v551_v55 = vpop.f32.mrf.mxu0  ;;  %v712_v15 = vpop.f32.mrf.mxu1 }
 0x12a   : > { %7868 = vst [vmem:[#allocation43_spill] sm:$0xff] %v5355_v20  ;;  %7869 = vst [vmem:[#allocation44_spill] sm:$0xff] %v5358_v9  ;;  %v5361_v7 = vadd.f32 %v551_v55, %v5338_v60  ;;  %v5364_v2 = vadd.f32 %v712_v15, %v5340_v40 }
 0x12b   : > { %v555_v6 = vpop.f32.mrf.mxu0  ;;  %v716_v63 = vpop.f32.mrf.mxu1 }
 0x12c   : > { %7870 = vst [vmem:[#allocation45_spill] sm:$0xff] %v5361_v7  ;;  %7871 = vst [vmem:[#allocation46_spill] sm:$0xff] %v5364_v2  ;;  %v5367_v14 = vadd.f32 %v555_v6, %v5334_v1  ;;  %v5370_v25 = vadd.f32 %v716_v63, %v5336_v11 }
 0x12d   : > { %v557_v45 = vpop.f32.mrf.mxu0  ;;  %v718_v20 = vpop.f32.mrf.mxu1 }
 0x12e   : > { %7872 = vst [vmem:[#allocation47_spill] sm:$0xff] %v5367_v14  ;;  %7873 = vst [vmem:[#allocation48_spill] sm:$0xff] %v5370_v25  ;;  %v5373_v8 = vadd.f32 %v557_v45, %v5338_v60  ;;  %v5376_v9 = vadd.f32 %v718_v20, %v5340_v40 }
 0x12f   : > { %v561_v55 = vpop.f32.mrf.mxu0  ;;  %v722_v7 = vpop.f32.mrf.mxu1 }
 0x130   : > { %7874 = vst [vmem:[#allocation49_spill] sm:$0xff] %v5373_v8  ;;  %7875 = vst [vmem:[#allocation50_spill] sm:$0xff] %v5376_v9  ;;  %v5379_v15 = vadd.f32 %v561_v55, %v5334_v1  ;;  %v5382_v2 = vadd.f32 %v722_v7, %v5336_v11 }
 0x131   : > { %v563_v6 = vpop.f32.mrf.mxu0  ;;  %v724_v14 = vpop.f32.mrf.mxu1 }
 0x132   : > { %7876 = vst [vmem:[#allocation51_spill] sm:$0xff] %v5379_v15  ;;  %7877 = vst [vmem:[#allocation52_spill] sm:$0xff] %v5382_v2  ;;  %v5385_v63 = vadd.f32 %v563_v6, %v5338_v60  ;;  %v5388_v25 = vadd.f32 %v724_v14, %v5340_v40 }
 0x133   : > { %v567_v45 = vpop.f32.mrf.mxu0  ;;  %v728_v8 = vpop.f32.mrf.mxu1 }
 0x134   : > { %7878 = vst [vmem:[#allocation53_spill] sm:$0xff] %v5385_v63  ;;  %7879 = vst [vmem:[#allocation54_spill] sm:$0xff] %v5388_v25  ;;  %v5391_v20 = vadd.f32 %v567_v45, %v5334_v1  ;;  %v5394_v9 = vadd.f32 %v728_v8, %v5336_v11 }
 0x135   : > { %v569_v55 = vpop.f32.mrf.mxu0  ;;  %v730_v15 = vpop.f32.mrf.mxu1 }
 0x136   : > { %7880 = vst [vmem:[#allocation55_spill] sm:$0xff] %v5391_v20  ;;  %7881 = vst [vmem:[#allocation56_spill] sm:$0xff] %v5394_v9  ;;  %v5397_v7 = vadd.f32 %v569_v55, %v5338_v60  ;;  %v5400_v2 = vadd.f32 %v730_v15, %v5340_v40 }
 0x137   : > { %v573_v6 = vpop.f32.mrf.mxu0  ;;  %v734_v63 = vpop.f32.mrf.mxu1 }
 0x138   : > { %7882 = vst [vmem:[#allocation57_spill] sm:$0xff] %v5397_v7  ;;  %7883 = vst [vmem:[#allocation58_spill] sm:$0xff] %v5400_v2  ;;  %v5403_v14 = vadd.f32 %v573_v6, %v5334_v1  ;;  %v5406_v25 = vadd.f32 %v734_v63, %v5336_v11 }
 0x139   : > { %v575_v45 = vpop.f32.mrf.mxu0  ;;  %v736_v20 = vpop.f32.mrf.mxu1 }
 0x13a   : > { %7884 = vst [vmem:[#allocation59_spill] sm:$0xff] %v5403_v14  ;;  %7885 = vst [vmem:[#allocation60_spill] sm:$0xff] %v5406_v25  ;;  %v5409_v8 = vadd.f32 %v575_v45, %v5338_v60  ;;  %v5412_v9 = vadd.f32 %v736_v20, %v5340_v40 }
 0x13b   : > { %v579_v55 = vpop.f32.mrf.mxu0  ;;  %v740_v7 = vpop.f32.mrf.mxu1 }
 0x13c   : > { %7886 = vst [vmem:[#allocation61_spill] sm:$0xff] %v5409_v8  ;;  %7887 = vst [vmem:[#allocation62_spill] sm:$0xff] %v5412_v9  ;;  %v5415_v15 = vadd.f32 %v579_v55, %v5334_v1  ;;  %v5418_v2 = vadd.f32 %v740_v7, %v5336_v11 }
 0x13d   : > { %v581_v6 = vpop.f32.mrf.mxu0  ;;  %v742_v14 = vpop.f32.mrf.mxu1 }
 0x13e   : > { %7888 = vst [vmem:[#allocation63_spill] sm:$0xff] %v5415_v15  ;;  %7889 = vst [vmem:[#allocation64_spill] sm:$0xff] %v5418_v2  ;;  %v5421_v63 = vadd.f32 %v581_v6, %v5338_v60  ;;  %v5424_v25 = vadd.f32 %v742_v14, %v5340_v40 }
 0x13f   : > { %v585_v45 = vpop.f32.mrf.mxu0  ;;  %v746_v8 = vpop.f32.mrf.mxu1 }
 0x140   : > { %7890 = vst [vmem:[#allocation65_spill] sm:$0xff] %v5421_v63  ;;  %7891 = vst [vmem:[#allocation66_spill] sm:$0xff] %v5424_v25  ;;  %v5427_v20 = vadd.f32 %v585_v45, %v5334_v1  ;;  %v5430_v9 = vadd.f32 %v746_v8, %v5336_v11 }
 0x141   : > { %v587_v55 = vpop.f32.mrf.mxu0  ;;  %v748_v15 = vpop.f32.mrf.mxu1 }
 0x142   : > { %7892 = vst [vmem:[#allocation67_spill] sm:$0xff] %v5427_v20  ;;  %7893 = vst [vmem:[#allocation68_spill] sm:$0xff] %v5430_v9  ;;  %v5433_v7 = vadd.f32 %v587_v55, %v5338_v60  ;;  %v5436_v2 = vadd.f32 %v748_v15, %v5340_v40 }
 0x143   : > { %v591_v6 = vpop.f32.mrf.mxu0  ;;  %v752_v63 = vpop.f32.mrf.mxu1 }
 0x144   : > { %7894 = vst [vmem:[#allocation69_spill] sm:$0xff] %v5433_v7  ;;  %7895 = vst [vmem:[#allocation70_spill] sm:$0xff] %v5436_v2  ;;  %v5439_v14 = vadd.f32 %v591_v6, %v5334_v1  ;;  %v5442_v25 = vadd.f32 %v752_v63, %v5336_v11 }
 0x145   : > { %v593_v45 = vpop.f32.mrf.mxu0  ;;  %v754_v20 = vpop.f32.mrf.mxu1 }
 0x146   : > { %7896 = vst [vmem:[#allocation71_spill] sm:$0xff] %v5439_v14  ;;  %7897 = vst [vmem:[#allocation72_spill] sm:$0xff] %v5442_v25  ;;  %v5445_v8 = vadd.f32 %v593_v45, %v5338_v60  ;;  %v5448_v9 = vadd.f32 %v754_v20, %v5340_v40 }
 0x147   : > { %v597_v55 = vpop.f32.mrf.mxu0  ;;  %v758_v7 = vpop.f32.mrf.mxu1 }
 0x148   : > { %7898 = vst [vmem:[#allocation73_spill] sm:$0xff] %v5445_v8  ;;  %7899 = vst [vmem:[#allocation74_spill] sm:$0xff] %v5448_v9  ;;  %v5451_v15 = vadd.f32 %v597_v55, %v5334_v1  ;;  %v5454_v2 = vadd.f32 %v758_v7, %v5336_v11 }
 0x149   : > { %v599_v6 = vpop.f32.mrf.mxu0  ;;  %v760_v14 = vpop.f32.mrf.mxu1 }
 0x14a   : > { %7900 = vst [vmem:[#allocation75_spill] sm:$0xff] %v5451_v15  ;;  %7901 = vst [vmem:[#allocation76_spill] sm:$0xff] %v5454_v2  ;;  %v5457_v63 = vadd.f32 %v599_v6, %v5338_v60  ;;  %v5460_v25 = vadd.f32 %v760_v14, %v5340_v40 }
 0x14b   : > { %v603_v45 = vpop.f32.mrf.mxu0  ;;  %v764_v8 = vpop.f32.mrf.mxu1 }
 0x14c   : > { %7902 = vst [vmem:[#allocation77_spill] sm:$0xff] %v5457_v63  ;;  %7903 = vst [vmem:[#allocation78_spill] sm:$0xff] %v5460_v25  ;;  %v5463_v20 = vadd.f32 %v603_v45, %v5334_v1  ;;  %v5466_v9 = vadd.f32 %v764_v8, %v5336_v11 }
 0x14d   : > { %v605_v55 = vpop.f32.mrf.mxu0  ;;  %v766_v15 = vpop.f32.mrf.mxu1 }
 0x14e   : > { %7904 = vst [vmem:[#allocation79_spill] sm:$0xff] %v5463_v20  ;;  %7905 = vst [vmem:[#allocation80_spill] sm:$0xff] %v5466_v9  ;;  %v5469_v7 = vadd.f32 %v605_v55, %v5338_v60  ;;  %v5472_v2 = vadd.f32 %v766_v15, %v5340_v40 }
 0x14f   : > { %v609_v6 = vpop.f32.mrf.mxu0  ;;  %v770_v63 = vpop.f32.mrf.mxu1 }
 0x150   : > { %7906 = vst [vmem:[#allocation81_spill] sm:$0xff] %v5469_v7  ;;  %7907 = vst [vmem:[#allocation82_spill] sm:$0xff] %v5472_v2  ;;  %v5475_v14 = vadd.f32 %v609_v6, %v5334_v1  ;;  %v5478_v25 = vadd.f32 %v770_v63, %v5336_v11 }
 0x151   : > { %v611_v45 = vpop.f32.mrf.mxu0  ;;  %v772_v20 = vpop.f32.mrf.mxu1 }
 0x152   : > { %7908 = vst [vmem:[#allocation83_spill] sm:$0xff] %v5475_v14  ;;  %7909 = vst [vmem:[#allocation84_spill] sm:$0xff] %v5478_v25  ;;  %v5481_v8 = vadd.f32 %v611_v45, %v5338_v60  ;;  %v5484_v9 = vadd.f32 %v772_v20, %v5340_v40 }
 0x153   : > { %v615_v55 = vpop.f32.mrf.mxu0  ;;  %v776_v7 = vpop.f32.mrf.mxu1 }
 0x154   : > { %7910 = vst [vmem:[#allocation85_spill] sm:$0xff] %v5481_v8  ;;  %7911 = vst [vmem:[#allocation86_spill] sm:$0xff] %v5484_v9  ;;  %v5487_v15 = vadd.f32 %v615_v55, %v5334_v1  ;;  %v5490_v2 = vadd.f32 %v776_v7, %v5336_v11 }
 0x155   : > { %v617_v6 = vpop.f32.mrf.mxu0  ;;  %v778_v14 = vpop.f32.mrf.mxu1 }
 0x156   : > { %7912 = vst [vmem:[#allocation87_spill] sm:$0xff] %v5487_v15  ;;  %7913 = vst [vmem:[#allocation88_spill] sm:$0xff] %v5490_v2  ;;  %v5493_v63 = vadd.f32 %v617_v6, %v5338_v60  ;;  %v5496_v25 = vadd.f32 %v778_v14, %v5340_v40 }
 0x157   : > { %v621_v45 = vpop.f32.mrf.mxu0  ;;  %v782_v8 = vpop.f32.mrf.mxu1 }
 0x158   : > { %7914 = vst [vmem:[#allocation89_spill] sm:$0xff] %v5493_v63  ;;  %7915 = vst [vmem:[#allocation90_spill] sm:$0xff] %v5496_v25  ;;  %v5499_v20 = vadd.f32 %v621_v45, %v5334_v1  ;;  %v5502_v9 = vadd.f32 %v782_v8, %v5336_v11  ;;  %v538_v8 = vadd.f32 %v5326_v30, %v5334_v1 }
 0x159   : > { %v623_v55 = vpop.f32.mrf.mxu0  ;;  %v784_v15 = vpop.f32.mrf.mxu1  ;;  %v699_v30 = vadd.f32 %v5328_v10, %v5336_v11  ;;  %v794_v10 = vld [vmem:[#allocation3] sm:$0xff] }
 0x15a   : > { %7916 = vst [vmem:[#allocation91_spill] sm:$0xff] %v5499_v20  ;;  %7917 = vst [vmem:[#allocation92_spill] sm:$0xff] %v5502_v9  ;;  %v5505_v7 = vadd.f32 %v623_v55, %v5338_v60  ;;  %v5508_v2 = vadd.f32 %v784_v15, %v5340_v40 }
 0x15b   : > { %v627_v6 = vpop.f32.mrf.mxu0  ;;  %v788_v63 = vpop.f32.mrf.mxu1 }
 0x15c   : > { %7918 = vst [vmem:[#allocation93_spill] sm:$0xff] %v5505_v7  ;;  %7919 = vst [vmem:[#allocation94_spill] sm:$0xff] %v5508_v2  ;;  %v5511_v14 = vadd.f32 %v627_v6, %v5334_v1  ;;  %v5514_v25 = vadd.f32 %v788_v63, %v5336_v11  ;;  %v540_v2 = vadd.f32 %v5330_v50, %v5338_v60 }
 0x15d   : > { %v629_v45 = vpop.f32.mrf.mxu0  ;;  %v790_v20 = vpop.f32.mrf.mxu1 }
 0x15e   : > { %7920 = vst [vmem:[#allocation95_spill] sm:$0xff] %v5511_v14  ;;  %7921 = vst [vmem:[#allocation96_spill] sm:$0xff] %v5514_v25  ;;  %v5519_v9 = vadd.f32 %v629_v45, %v5338_v60  ;;  %v5522_v55 = vadd.f32 %v790_v20, %v5340_v40  ;;  %v701_v20 = vadd.f32 %v5332_v35, %v5340_v40 }
 0x15f   : > { %v861_v15 = vpop.f32.mrf.mxu0  ;;  %v932_v4 = vpop.f32.mrf.mxu1 }
 0x160   : > { %7922 = vst [vmem:[#allocation97_spill] sm:$0xff] %v5519_v9  ;;  %7923 = vst [vmem:[#allocation98_spill] sm:$0xff] %v5522_v55  ;;  %v937_v6 = vadd.f32 %v861_v15, %v538_v8  ;;  %v939_v1 = vadd.f32 %v932_v4, %v699_v30  ;;  %v7947_v30 = vld [vmem:[#allocation39_spill] sm:$0xff] }
 0x161   : > { %v863_v14 = vpop.f32.mrf.mxu0  ;;  %v934_v45 = vpop.f32.mrf.mxu1 }
 0x162   : > { %v3771_v7 = vmul.f32 -1.442695, %v937_v6  ;;  %v938_v63 = vadd.f32 %v863_v14, %v540_v2  ;;  %v3773_v55 = vmul.f32 -1.442695, %v939_v1  ;;  %v940_v61 = vadd.f32 %v934_v45, %v701_v20 }
 0x164   : > { %3940 = vpow2.f32 %v3771_v7  ;;  %v3772_v25 = vmul.f32 -1.442695, %v938_v63 }
 0x166   : > { %3942 = vpow2.f32 %v3772_v25 }
 0x167   : > { %3944 = vpow2.f32 %v3773_v55 }
 0x171   : > { %v3941_v9 = vpop.eup %3940 }
 0x172   : > { %v950_v50 = vadd.f32 1.0, %v3941_v9  ;;  %v5537_v9 = vld [vmem:[%s4749_s13] sm:$0xff] }
 0x173   : > { %v3943_v60 = vpop.eup %3942 }
 0x174   : > { %3946 = vrcp.f32 %v950_v50  ;;  %v951_v2 = vadd.f32 1.0, %v3943_v60  ;;  %v3945_v25 = vpop.eup %3944  ;;  %v7948_v50 = vld [vmem:[#allocation41_spill] sm:$0xff] }
 0x175   : > { %3948 = vtanh.f32 %v940_v61  ;;  %v952_v14 = vadd.f32 1.0, %v3945_v25  ;;  %v965_v61 = vstv %s5534_s17 }
 0x176   : > { %3950 = vrcp.f32 %v951_v2  ;;  %vm966_vm1 = vcmp.lt.s32.totalorder %v965_v61, %v5537_v9 }
 0x177   : > { %3952 = vrcp.f32 %v952_v14  ;;  %v7950_v14 = vld [vmem:[#allocation42_spill] sm:$0xff] }
 0x181   : > { %v3947_v7 = vpop.eup %3946 }
 0x182   : > { %v3949_v4 = vpop.eup %3948 }
 0x183   : > { %v3951_v11 = vpop.eup %3950  ;;  %v961_v40 = vmul.f32 %v3949_v4, %v3947_v7  ;;  %v7949_v7 = vld [vmem:[#allocation40_spill] sm:$0xff] }
 0x184   : > { %v960_v35 = vmul.f32 %v3951_v11, %v794_v10  ;;  %v3953_v55 = vpop.eup %3952 }
 0x186   : > { %v5530_v8 = vadd.f32 %v961_v40, %v960_v35 }
 0x188   : > { %3954 = vtanh.f32 %v5530_v8 }
 0x195   : > { %v3955_v15 = vpop.eup %3954 }
 0x196   : > { %v964_v6 = vmul.f32 %v3955_v15, %v3953_v55 }
 0x198   : > { %v967_v63 = vsel %vm966_vm1, %v964_v6, 0.0  ;;  %1034 = vmatmul.mubr.f32.vlgmr.msra.gmra.mxu0 %v964_v6  ;;  %1105 = vmatmul.mubr.f32.vlgmr.msra.gmra.mxu1 %v964_v6 }
 0x199   : > { %968 = vst [vmem:[%s4765_s8] sm:$0xff] %v967_v63  ;;  %1145 = vmatpush1.msra.mxu0 %v4803_v12  ;;  %1216 = vmatpush1.msra.mxu1 %v4844_v19  ;;  %v7924_v12 = vld [vmem:[#allocation19_spill] sm:$0xff]  ;;  %v7929_v19 = vld [vmem:[#allocation28_spill] sm:$0xff] }
 0x19a   : > { %1146 = vmatprep.subr.mxu0 %v4810_v13  ;;  %1217 = vmatprep.subr.mxu1 %v4861_v22  ;;  %v7925_v13 = vld [vmem:[#allocation24_spill] sm:$0xff]  ;;  %v7931_v22 = vld [vmem:[#allocation30_spill] sm:$0xff] }
 0x19b   : > { %1147 = vmatpush1.msra.mxu0 %v4825_v16  ;;  %1218 = vmatpush1.msra.mxu1 %v4873_v24  ;;  %v7926_v16 = vld [vmem:[#allocation20_spill] sm:$0xff]  ;;  %v7933_v24 = vld [vmem:[#allocation31_spill] sm:$0xff] }
 0x19c   : > { %1148 = vmatprep.subr.mxu0 %v4831_v17  ;;  %1219 = vmatprep.subr.mxu1 %v4890_v27  ;;  %v7927_v17 = vld [vmem:[#allocation26_spill] sm:$0xff]  ;;  %v7935_v27 = vld [vmem:[#allocation32_spill] sm:$0xff] }
 0x19d   : > { %1149 = vmatpush1.msra.mxu0 %v4839_v18  ;;  %1220 = vmatpush1.msra.mxu1 %v4902_v29  ;;  %v7928_v18 = vld [vmem:[#allocation21_spill] sm:$0xff]  ;;  %v7937_v29 = vld [vmem:[#allocation34_spill] sm:$0xff] }
 0x19e   : > { %1150 = vmatprep.subr.mxu0 %v4855_v21  ;;  %1221 = vmatprep.subr.mxu1 %v4919_v32  ;;  %v7930_v21 = vld [vmem:[#allocation22_spill] sm:$0xff]  ;;  %v7939_v32 = vld [vmem:[#allocation36_spill] sm:$0xff] }
 0x19f   : > { %1151 = vmatpush1.msra.mxu0 %v4868_v23  ;;  %1222 = vmatpush1.msra.mxu1 %v4931_v34  ;;  %v7932_v23 = vld [vmem:[#allocation23_spill] sm:$0xff]  ;;  %v7941_v34 = vld [vmem:[#allocation37_spill] sm:$0xff] }
 0x1a0   : > { %1152 = vmatprep.subr.mxu0 %v4884_v26  ;;  %1223 = vmatprep.subr.mxu1 %v4948_v37  ;;  %v7934_v26 = vld [vmem:[#allocation25_spill] sm:$0xff]  ;;  %v7943_v37 = vmov 0.0  }
 0x1a1   : > { %1153 = vmatpush1.msra.mxu0 %v4897_v28  ;;  %1224 = vmatpush1.msra.mxu1 %v4960_v39  ;;  %v7936_v28 = vld [vmem:[#allocation27_spill] sm:$0xff] }
 0x1a2   : > { %1154 = vmatprep.subr.mxu0 %v4913_v31  ;;  %1225 = vmatprep.subr.mxu1 %v4977_v42  ;;  %v7938_v31 = vld [vmem:[#allocation29_spill] sm:$0xff]  ;;  %v5609_v39 = vld [vmem:[%s7839_s9 + $0x1e8] sm:$0xff] }
 0x1a3   : > { %1155 = vmatpush1.msra.mxu0 %v4926_v33  ;;  %1226 = vmatpush1.msra.mxu1 %v4989_v44  ;;  %v7940_v33 = vld [vmem:[#allocation33_spill] sm:$0xff]  ;;  %7945 = vst [vmem:[#allocation19_spill] sm:$0xff] %v5609_v39 }
 0x1a4   : > { %1156 = vmatprep.subr.mxu0 %v4942_v36  ;;  %1227 = vmatprep.subr.mxu1 %v5006_v47  ;;  %v7942_v36 = vld [vmem:[#allocation35_spill] sm:$0xff] }
 0x1a5   : > { %1157 = vmatpush1.msra.mxu0 %v4955_v38  ;;  %1228 = vmatpush1.msra.mxu1 %v5018_v49  ;;  %v7944_v38 = vld [vmem:[#allocation38_spill] sm:$0xff] }
 0x1a6   : > { %1158 = vmatprep.subr.mxu0 %v4971_v41  ;;  %1229 = vmatprep.subr.mxu1 %v5035_v52  ;;  %v5615_v41 = vld [vmem:[%s7839_s9 + $0x1f8] sm:$0xff] }
 0x1a7   : > { %1159 = vmatpush1.msra.mxu0 %v4984_v43  ;;  %1230 = vmatpush1.msra.mxu1 %v5047_v54  ;;  %7946 = vst [vmem:[#allocation24_spill] sm:$0xff] %v5615_v41 }
 0x1a8   : > { %1160 = vmatprep.subr.mxu0 %v5000_v46  ;;  %1231 = vmatprep.subr.mxu1 %v5064_v57 }
 0x1a9   : > { %1161 = vmatpush1.msra.mxu0 %v5013_v48  ;;  %1232 = vmatpush1.msra.mxu1 %v5076_v59 }
 0x1aa   : > { %1162 = vmatprep.subr.mxu0 %v5029_v51  ;;  %1233 = vmatprep.subr.mxu1 %v5093_v62 }
 0x1ab   : > { %1163 = vmatpush1.msra.mxu0 %v5042_v53  ;;  %1234 = vmatpush1.msra.mxu1 %v5105_v0 }
 0x1ac   : > { %1164 = vmatprep.subr.mxu0 %v5058_v56  ;;  %1235 = vmatprep.subr.mxu1 %v5122_v3 }
 0x1ad   : > { %1165 = vmatpush1.msra.mxu0 %v5071_v58  ;;  %1236 = vmatpush1.msra.mxu1 %v5134_v5 }
 0x1ae   : > { %1166 = vmatprep.subr.mxu0 %v7924_v12  ;;  %1237 = vmatprep.subr.mxu1 %v7925_v13 }
 0x1af   : > { %1167 = vmatpush1.msra.mxu0 %v7926_v16  ;;  %1238 = vmatpush1.msra.mxu1 %v7927_v17 }
 0x1b0   : > { %1168 = vmatprep.subr.mxu0 %v7928_v18  ;;  %1239 = vmatprep.subr.mxu1 %v7929_v19 }
 0x1b1   : > { %1169 = vmatpush1.msra.mxu0 %v7930_v21  ;;  %1240 = vmatpush1.msra.mxu1 %v7931_v22 }
 0x1b2   : > { %1170 = vmatprep.subr.mxu0 %v7932_v23  ;;  %1241 = vmatprep.subr.mxu1 %v7933_v24 }
 0x1b3   : > { %1171 = vmatpush1.msra.mxu0 %v7934_v26  ;;  %1242 = vmatpush1.msra.mxu1 %v7935_v27 }
 0x1b4   : > { %1172 = vmatprep.subr.mxu0 %v7936_v28  ;;  %1243 = vmatprep.subr.mxu1 %v7937_v29 }
 0x1b5   : > { %1173 = vmatpush1.msra.mxu0 %v7938_v31  ;;  %1244 = vmatpush1.msra.mxu1 %v7939_v32 }
 0x1b6   : > { %1174 = vmatprep.subr.mxu0 %v7940_v33  ;;  %1245 = vmatprep.subr.mxu1 %v7941_v34 }
 0x1b7   : > { %1175 = vmatpush1.msra.mxu0 %v7942_v36  ;;  %1208 = vmatprep.mubr.f32.mxu0 %v7943_v37 }
 0x1b8   : > { %1246 = vmatpush1.msra.mxu1 %v7944_v38  ;;  %1279 = vmatprep.mubr.f32.mxu1 %v7943_v37 }
 0x1b9   : > { %1319 = vmatprep.subr.mxu0 %v5609_v39  ;;  %1390 = vmatprep.subr.mxu1 %v5615_v41 }
 0x258   : > { %v1035_v43 = vpop.f32.mrf.mxu0  ;;  %v1106_v25 = vpop.f32.mrf.mxu1 }
 0x259   : > { %v1111_v1 = vadd.f32 %v1035_v43, %v7947_v30  ;;  %v1113_v10 = vadd.f32 %v1106_v25, %v7949_v7 }
 0x25a   : > { %v1037_v45 = vpop.f32.mrf.mxu0  ;;  %v1108_v4 = vpop.f32.mrf.mxu1 }
 0x25b   : > { %v3774_v20 = vmul.f32 -1.442695, %v1111_v1  ;;  %v1112_v60 = vadd.f32 %v1037_v45, %v7948_v50  ;;  %v3776_v11 = vmul.f32 -1.442695, %v1113_v10  ;;  %v1114_v35 = vadd.f32 %v1108_v4, %v7950_v14  ;;  %v5638_v4 = vld [vmem:[%s7839_s9 + $0x1f0] sm:$0xff]  ;;  %v5650_v14 = vld [vmem:[%s7839_s9 + $0x1d8] sm:$0xff] }
 0x25d   : > { %3956 = vpow2.f32 %v3774_v20  ;;  %v3775_v2 = vmul.f32 -1.442695, %v1112_v60  ;;  %v1140_v60 = vstv %s1139_s7  ;;  %s1489_s7 = sadd.s32 3, %s5534_s17 }
 0x25e   : > { %vm1141_vm2 = vcmp.lt.s32.totalorder %v1140_v60, %v5537_v9  ;;  %v5728_v60 = vld [vmem:[%s7839_s9 + $0x160] sm:$0xff] }
 0x25f   : > { %3958 = vpow2.f32 %v3775_v2 }
 0x260   : > { %3960 = vpow2.f32 %v3776_v11  ;;  %v5644_v11 = vld [vmem:[%s7839_s9 + $0x1c8] sm:$0xff] }
 0x261   : > { %3962 = vtanh.f32 %v1114_v35  ;;  %v5656_v35 = vld [vmem:[%s7839_s9 + $0x1c0] sm:$0xff] }
 0x26a   : > { %v3957_v40 = vpop.eup %3956 }
 0x26b   : > { %v1124_v61 = vadd.f32 1.0, %v3957_v40  ;;  %v5662_v40 = vld [vmem:[%s7839_s9 + $0x1d0] sm:$0xff] }
 0x26c   : > { %v3959_v55 = vpop.eup %3958 }
 0x26d   : > { %3964 = vrcp.f32 %v1124_v61  ;;  %v1125_v15 = vadd.f32 1.0, %v3959_v55  ;;  %v3961_v6 = vpop.eup %3960  ;;  %v5668_v61 = vld [vmem:[%s7839_s9 + $0x1a8] sm:$0xff]  ;;  %v5674_v55 = vld [vmem:[%s7839_s9 + $0x1b8] sm:$0xff] }
 0x26e   : > { %v3963_v63 = vpop.eup %3962  ;;  %v1126_v45 = vadd.f32 1.0, %v3961_v6  ;;  %v5686_v6 = vld [vmem:[%s7839_s9 + $0x1b0] sm:$0xff] }
 0x26f   : > { %3966 = vrcp.f32 %v1125_v15  ;;  %v5680_v15 = vld [vmem:[%s7839_s9 + $0x1a0] sm:$0xff] }
 0x270   : > { %3968 = vrcp.f32 %v1126_v45  ;;  %v5716_v45 = vld [vmem:[%s7839_s9 + $0x168] sm:$0xff] }
 0x27a   : > { %v3965_v43 = vpop.eup %3964 }
 0x27b   : > { %v1135_v30 = vmul.f32 %v3965_v43, %v3963_v63  ;;  %v5692_v63 = vld [vmem:[%s7839_s9 + $0x188] sm:$0xff]  ;;  %v5698_v43 = vld [vmem:[%s7839_s9 + $0x198] sm:$0xff] }
 0x27c   : > { %v3967_v1 = vpop.eup %3966 }
 0x27d   : > { %v1134_v20 = vmul.f32 %v3967_v1, %v5530_v8  ;;  %v3969_v2 = vpop.eup %3968  ;;  %v5632_v8 = vld [vmem:[%s7839_s9 + $0x1e0] sm:$0xff]  ;;  %v5710_v1 = vld [vmem:[%s7839_s9 + $0x190] sm:$0xff] }
 0x27f   : > { %v5623_v50 = vadd.f32 %v1135_v30, %v1134_v20  ;;  %v5704_v30 = vld [vmem:[%s7839_s9 + $0x180] sm:$0xff]  ;;  %v5722_v20 = vld [vmem:[%s7839_s9 + $0x178] sm:$0xff] }
 0x281   : > { %3970 = vtanh.f32 %v5623_v50 }
 0x28e   : > { %v3971_v25 = vpop.eup %3970 }
 0x28f   : > { %v1138_v7 = vmul.f32 %v3971_v25, %v3969_v2  ;;  %v5734_v2 = vld [vmem:[%s7839_s9 + $0x170] sm:$0xff]  ;;  %v5740_v25 = vld [vmem:[%s7839_s9 + $0x148] sm:$0xff] }
 0x291   : > { %v1142_v10 = vsel %vm1141_vm2, %v1138_v7, 0.0  ;;  %1209 = vmatmul.mubr.f32.vlgmr.msra.gmra.mxu0 %v1138_v7  ;;  %1280 = vmatmul.mubr.f32.vlgmr.msra.gmra.mxu1 %v1138_v7  ;;  %v5747_v7 = vld [vmem:[%s7839_s9 + $0x140] sm:$0xff] }
 0x292   : > { %1143 = vst [vmem:[%s4765_s8 + $0x8] sm:$0xff] %v1142_v10  ;;  %1320 = vmatpush1.msra.mxu0 %v5632_v8  ;;  %1391 = vmatpush1.msra.mxu1 %v5638_v4  ;;  %v5754_v10 = vld [vmem:[%s7839_s9 + $0x128] sm:$0xff] }
 0x293   : > { %1321 = vmatprep.subr.mxu0 %v5644_v11  ;;  %1392 = vmatprep.subr.mxu1 %v5650_v14 }
 0x294   : > { %1322 = vmatpush1.msra.mxu0 %v5656_v35  ;;  %1393 = vmatpush1.msra.mxu1 %v5662_v40 }
 0x295   : > { %1323 = vmatprep.subr.mxu0 %v5668_v61  ;;  %1394 = vmatprep.subr.mxu1 %v5674_v55 }
 0x296   : > { %1324 = vmatpush1.msra.mxu0 %v5680_v15  ;;  %1395 = vmatpush1.msra.mxu1 %v5686_v6 }
 0x297   : > { %1325 = vmatprep.subr.mxu0 %v5692_v63  ;;  %1396 = vmatprep.subr.mxu1 %v5698_v43 }
 0x298   : > { %1326 = vmatpush1.msra.mxu0 %v5704_v30  ;;  %1397 = vmatpush1.msra.mxu1 %v5710_v1 }
 0x299   : > { %1327 = vmatprep.subr.mxu0 %v5716_v45  ;;  %1398 = vmatprep.subr.mxu1 %v5722_v20 }
 0x29a   : > { %1328 = vmatpush1.msra.mxu0 %v5728_v60  ;;  %1399 = vmatpush1.msra.mxu1 %v5734_v2 }
 0x29b   : > { %1329 = vmatprep.subr.mxu0 %v5740_v25  ;;  %1400 = vmatprep.subr.mxu1 %v4977_v42  ;;  %v5761_v42 = vld [vmem:[%s7839_s9 + $0x120] sm:$0xff] }
 0x29c   : > { %1330 = vmatpush1.msra.mxu0 %v5747_v7  ;;  %1401 = vmatpush1.msra.mxu1 %v4989_v44  ;;  %v5768_v44 = vld [vmem:[%s7839_s9 + $0x108] sm:$0xff] }
 0x29d   : > { %1331 = vmatprep.subr.mxu0 %v5754_v10  ;;  %1402 = vmatprep.subr.mxu1 %v5006_v47  ;;  %v5775_v47 = vld [vmem:[%s7839_s9 + $0x100] sm:$0xff] }
 0x29e   : > { %1332 = vmatpush1.msra.mxu0 %v5761_v42  ;;  %1403 = vmatpush1.msra.mxu1 %v5018_v49 }
 0x29f   : > { %1333 = vmatprep.subr.mxu0 %v5768_v44  ;;  %1404 = vmatprep.subr.mxu1 %v5035_v52 }
 0x2a0   : > { %1334 = vmatpush1.msra.mxu0 %v5775_v47  ;;  %1405 = vmatpush1.msra.mxu1 %v5047_v54 }
 0x2a1   : > { %1335 = vmatprep.subr.mxu0 %v5000_v46  ;;  %1406 = vmatprep.subr.mxu1 %v5064_v57 }
 0x2a2   : > { %1336 = vmatpush1.msra.mxu0 %v5013_v48  ;;  %1407 = vmatpush1.msra.mxu1 %v5076_v59  ;;  %v7951_v48 = vld [vmem:[#allocation43_spill] sm:$0xff] }
 0x2a3   : > { %1337 = vmatprep.subr.mxu0 %v5029_v51  ;;  %1408 = vmatprep.subr.mxu1 %v5093_v62 }
 0x2a4   : > { %1338 = vmatpush1.msra.mxu0 %v5042_v53  ;;  %1409 = vmatpush1.msra.mxu1 %v5105_v0  ;;  %v7952_v53 = vld [vmem:[#allocation45_spill] sm:$0xff] }
 0x2a5   : > { %1339 = vmatprep.subr.mxu0 %v5058_v56  ;;  %1410 = vmatprep.subr.mxu1 %v5122_v3  ;;  %v7954_v3 = vld [vmem:[#allocation46_spill] sm:$0xff] }
 0x2a6   : > { %1340 = vmatpush1.msra.mxu0 %v5071_v58  ;;  %1411 = vmatpush1.msra.mxu1 %v5134_v5  ;;  %v7953_v58 = vld [vmem:[#allocation44_spill] sm:$0xff] }
 0x2a7   : > { %1341 = vmatprep.subr.mxu0 %v7924_v12  ;;  %1412 = vmatprep.subr.mxu1 %v7925_v13 }
 0x2a8   : > { %1342 = vmatpush1.msra.mxu0 %v7926_v16  ;;  %1413 = vmatpush1.msra.mxu1 %v7927_v17 }
 0x2a9   : > { %1343 = vmatprep.subr.mxu0 %v7928_v18  ;;  %1414 = vmatprep.subr.mxu1 %v7929_v19 }
 0x2aa   : > { %1344 = vmatpush1.msra.mxu0 %v7930_v21  ;;  %1415 = vmatpush1.msra.mxu1 %v7931_v22 }
 0x2ab   : > { %1345 = vmatprep.subr.mxu0 %v7932_v23  ;;  %1416 = vmatprep.subr.mxu1 %v7933_v24 }
 0x2ac   : > { %1346 = vmatpush1.msra.mxu0 %v7934_v26  ;;  %1417 = vmatpush1.msra.mxu1 %v7935_v27 }
 0x2ad   : > { %1347 = vmatprep.subr.mxu0 %v7936_v28  ;;  %1418 = vmatprep.subr.mxu1 %v7937_v29  ;;  %v1315_v28 = vstv %s1314_s30  ;;  %s2014_s30 = sadd.s32 6, %s5534_s17 }
 0x2ae   : > { %1348 = vmatpush1.msra.mxu0 %v7938_v31  ;;  %1419 = vmatpush1.msra.mxu1 %v7939_v32  ;;  %vm1316_vm3 = vcmp.lt.s32.totalorder %v1315_v28, %v5537_v9  ;;  %v6033_v28 = vld [vmem:[%s7839_s9 + $0x28] sm:$0xff] }
 0x2af   : > { %1349 = vmatprep.subr.mxu0 %v7940_v33  ;;  %1420 = vmatprep.subr.mxu1 %v7941_v34  ;;  %v5848_v34 = vld [vmem:[%s7839_s9 + $0x158] sm:$0xff]  ;;  %7965 = vst [vmem:[#allocation27_spill] sm:$0xff] %v6033_v28 }
 0x2b0   : > { %1350 = vmatpush1.msra.mxu0 %v7942_v36  ;;  %1383 = vmatprep.mubr.f32.mxu0 %v7943_v37  ;;  %v5855_v36 = vld [vmem:[%s7839_s9 + $0x150] sm:$0xff] }
 0x2b1   : > { %1421 = vmatpush1.msra.mxu1 %v7944_v38  ;;  %1454 = vmatprep.mubr.f32.mxu1 %v7943_v37  ;;  %v5862_v38 = vld [vmem:[%s7839_s9 + $0x138] sm:$0xff] }
 0x2b2   : > { %1494 = vmatprep.subr.mxu0 %v5609_v39  ;;  %1565 = vmatprep.subr.mxu1 %v5615_v41 }
 0x351   : > { %v1210_v46 = vpop.f32.mrf.mxu0  ;;  %v1281_v57 = vpop.f32.mrf.mxu1 }
 0x352   : > { %v1286_v49 = vadd.f32 %v1210_v46, %v7951_v48  ;;  %v1288_v59 = vadd.f32 %v1281_v57, %v7953_v58  ;;  %v5876_v46 = vld [vmem:[%s7839_s9 + $0x118] sm:$0xff]  ;;  %v5883_v48 = vld [vmem:[%s7839_s9 + $0x110] sm:$0xff]  ;;  %v5925_v57 = vld [vmem:[%s7839_s9 + $0xc0] sm:$0xff] }
 0x353   : > { %v1212_v51 = vpop.f32.mrf.mxu0  ;;  %v1283_v62 = vpop.f32.mrf.mxu1  ;;  %v5931_v58 = vld [vmem:[%s7839_s9 + $0xd0] sm:$0xff] }
 0x354   : > { %v3777_v52 = vmul.f32 -1.442695, %v1286_v49  ;;  %v1287_v54 = vadd.f32 %v1212_v51, %v7952_v53  ;;  %v3779_v0 = vmul.f32 -1.442695, %v1288_v59  ;;  %v1289_v5 = vadd.f32 %v1283_v62, %v7954_v3  ;;  %v5889_v49 = vld [vmem:[%s7839_s9 + $0xe8] sm:$0xff]  ;;  %v5895_v51 = vld [vmem:[%s7839_s9 + $0xf8] sm:$0xff] }
 0x355   : > { %v5907_v53 = vld [vmem:[%s7839_s9 + $0xf0] sm:$0xff]  ;;  %v5937_v59 = vld [vmem:[%s7839_s9 + $0xa8] sm:$0xff]  ;;  %v5943_v62 = vld [vmem:[%s7839_s9 + $0xb8] sm:$0xff] }
 0x356   : > { %3972 = vpow2.f32 %v3777_v52  ;;  %v3778_v56 = vmul.f32 -1.442695, %v1287_v54  ;;  %v5901_v52 = vld [vmem:[%s7839_s9 + $0xe0] sm:$0xff]  ;;  %v5913_v54 = vld [vmem:[%s7839_s9 + $0xc8] sm:$0xff]  ;;  %v5955_v3 = vld [vmem:[%s7839_s9 + $0xb0] sm:$0xff] }
 0x358   : > { %3974 = vpow2.f32 %v3778_v56  ;;  %v5919_v56 = vld [vmem:[%s7839_s9 + $0xd8] sm:$0xff] }
 0x359   : > { %3976 = vpow2.f32 %v3779_v0  ;;  %v5949_v0 = vld [vmem:[%s7839_s9 + $0xa0] sm:$0xff] }
 0x35a   : > { %3978 = vtanh.f32 %v1289_v5  ;;  %v5961_v5 = vld [vmem:[%s7839_s9 + $0x88] sm:$0xff] }
 0x363   : > { %v3973_v12 = vpop.eup %3972 }
 0x364   : > { %v1299_v13 = vadd.f32 1.0, %v3973_v12  ;;  %v5967_v12 = vld [vmem:[%s7839_s9 + $0x98] sm:$0xff] }
 0x365   : > { %v3975_v16 = vpop.eup %3974 }
 0x366   : > { %3980 = vrcp.f32 %v1299_v13  ;;  %v1300_v17 = vadd.f32 1.0, %v3975_v16  ;;  %v3977_v18 = vpop.eup %3976  ;;  %v5973_v13 = vld [vmem:[%s7839_s9 + $0x80] sm:$0xff]  ;;  %v5979_v16 = vld [vmem:[%s7839_s9 + $0x90] sm:$0xff] }
 0x367   : > { %v3979_v19 = vpop.eup %3978  ;;  %v1301_v24 = vadd.f32 1.0, %v3977_v18  ;;  %7955 = vst [vmem:[#allocation20_spill] sm:$0xff] %v5973_v13  ;;  %7956 = vst [vmem:[#allocation26_spill] sm:$0xff] %v5979_v16  ;;  %v5991_v18 = vld [vmem:[%s7839_s9 + $0x78] sm:$0xff] }
 0x368   : > { %3982 = vrcp.f32 %v1300_v17  ;;  %v5985_v17 = vld [vmem:[%s7839_s9 + $0x68] sm:$0xff]  ;;  %7958 = vst [vmem:[#allocation28_spill] sm:$0xff] %v5991_v18 }
 0x369   : > { %3984 = vrcp.f32 %v1301_v24  ;;  %7957 = vst [vmem:[#allocation21_spill] sm:$0xff] %v5985_v17  ;;  %v6021_v24 = vld [vmem:[%s7839_s9 + $0x40] sm:$0xff] }
 0x36a   : > { %7963 = vst [vmem:[#allocation25_spill] sm:$0xff] %v6021_v24 }
 0x373   : > { %v3981_v21 = vpop.eup %3980 }
 0x374   : > { %v1310_v22 = vmul.f32 %v3981_v21, %v3979_v19  ;;  %v5997_v19 = vld [vmem:[%s7839_s9 + $0x60] sm:$0xff]  ;;  %v6003_v21 = vld [vmem:[%s7839_s9 + $0x70] sm:$0xff] }
 0x375   : > { %v3983_v23 = vpop.eup %3982  ;;  %7959 = vst [vmem:[#allocation22_spill] sm:$0xff] %v5997_v19  ;;  %7960 = vst [vmem:[#allocation30_spill] sm:$0xff] %v6003_v21 }
 0x376   : > { %v1309_v26 = vmul.f32 %v3983_v23, %v5623_v50  ;;  %v3985_v29 = vpop.eup %3984  ;;  %v5869_v50 = vld [vmem:[%s7839_s9 + $0x130] sm:$0xff]  ;;  %v6015_v23 = vld [vmem:[%s7839_s9 + $0x58] sm:$0xff] }
 0x377   : > { %7962 = vst [vmem:[#allocation31_spill] sm:$0xff] %v6015_v23 }
 0x378   : > { %v5820_v27 = vadd.f32 %v1310_v22, %v1309_v26  ;;  %v6009_v22 = vld [vmem:[%s7839_s9 + $0x48] sm:$0xff]  ;;  %v6027_v26 = vld [vmem:[%s7839_s9 + $0x50] sm:$0xff] }
 0x379   : > { %7961 = vst [vmem:[#allocation23_spill] sm:$0xff] %v6009_v22  ;;  %7964 = vst [vmem:[#allocation32_spill] sm:$0xff] %v6027_v26 }
 0x37a   : > { %3986 = vtanh.f32 %v5820_v27 }
 0x387   : > { %v3987_v31 = vpop.eup %3986 }
 0x388   : > { %v1313_v32 = vmul.f32 %v3987_v31, %v3985_v29  ;;  %v6039_v29 = vld [vmem:[%s7839_s9 + $0x38] sm:$0xff]  ;;  %v6045_v31 = vld [vmem:[%s7839_s9 + $0x20] sm:$0xff] }
 0x389   : > { %7966 = vst [vmem:[#allocation34_spill] sm:$0xff] %v6039_v29  ;;  %7967 = vst [vmem:[#allocation29_spill] sm:$0xff] %v6045_v31 }
 0x38a   : > { %v1317_v33 = vsel %vm1316_vm3, %v1313_v32, 0.0  ;;  %1384 = vmatmul.mubr.f32.vlgmr.msra.gmra.mxu0 %v1313_v32  ;;  %1455 = vmatmul.mubr.f32.vlgmr.msra.gmra.mxu1 %v1313_v32  ;;  %v6051_v32 = vld [vmem:[%s7839_s9 + $0x30] sm:$0xff] }
 0x38b   : > { %1318 = vst [vmem:[%s4765_s8 + $0x10] sm:$0xff] %v1317_v33  ;;  %1495 = vmatpush1.msra.mxu0 %v5632_v8  ;;  %1566 = vmatpush1.msra.mxu1 %v5638_v4  ;;  %7968 = vst [vmem:[#allocation36_spill] sm:$0xff] %v6051_v32  ;;  %v6057_v33 = vld [vmem:[%s7839_s9 + $0x8] sm:$0xff] }
 0x38c   : > { %1496 = vmatprep.subr.mxu0 %v5644_v11  ;;  %1567 = vmatprep.subr.mxu1 %v5650_v14  ;;  %7969 = vst [vmem:[#allocation33_spill] sm:$0xff] %v6057_v33 }
 0x38d   : > { %1497 = vmatpush1.msra.mxu0 %v5656_v35  ;;  %1568 = vmatpush1.msra.mxu1 %v5662_v40 }
 0x38e   : > { %1498 = vmatprep.subr.mxu0 %v5668_v61  ;;  %1569 = vmatprep.subr.mxu1 %v5674_v55 }
 0x38f   : > { %1499 = vmatpush1.msra.mxu0 %v5680_v15  ;;  %1570 = vmatpush1.msra.mxu1 %v5686_v6 }
 0x390   : > { %1500 = vmatprep.subr.mxu0 %v5692_v63  ;;  %1571 = vmatprep.subr.mxu1 %v5698_v43 }
 0x391   : > { %1501 = vmatpush1.msra.mxu0 %v5704_v30  ;;  %1572 = vmatpush1.msra.mxu1 %v5710_v1 }
 0x392   : > { %1502 = vmatprep.subr.mxu0 %v5716_v45  ;;  %1573 = vmatprep.subr.mxu1 %v5722_v20 }
 0x393   : > { %1503 = vmatpush1.msra.mxu0 %v5728_v60  ;;  %1574 = vmatpush1.msra.mxu1 %v5734_v2 }
 0x394   : > { %1504 = vmatprep.subr.mxu0 %v5740_v25  ;;  %1575 = vmatprep.subr.mxu1 %v5848_v34 }
 0x395   : > { %1505 = vmatpush1.msra.mxu0 %v5747_v7  ;;  %1576 = vmatpush1.msra.mxu1 %v5855_v36 }
 0x396   : > { %1506 = vmatprep.subr.mxu0 %v5754_v10  ;;  %1577 = vmatprep.subr.mxu1 %v5862_v38 }
 0x397   : > { %1507 = vmatpush1.msra.mxu0 %v5761_v42  ;;  %1578 = vmatpush1.msra.mxu1 %v5869_v50 }
 0x398   : > { %1508 = vmatprep.subr.mxu0 %v5768_v44  ;;  %1579 = vmatprep.subr.mxu1 %v5876_v46 }
 0x399   : > { %1509 = vmatpush1.msra.mxu0 %v5775_v47  ;;  %1580 = vmatpush1.msra.mxu1 %v5883_v48 }
 0x39a   : > { %1510 = vmatprep.subr.mxu0 %v5889_v49  ;;  %1581 = vmatprep.subr.mxu1 %v5895_v51 }
 0x39b   : > { %1511 = vmatpush1.msra.mxu0 %v5901_v52  ;;  %1582 = vmatpush1.msra.mxu1 %v5907_v53 }
 0x39c   : > { %1512 = vmatprep.subr.mxu0 %v5913_v54  ;;  %1583 = vmatprep.subr.mxu1 %v5919_v56 }
 0x39d   : > { %1513 = vmatpush1.msra.mxu0 %v5925_v57  ;;  %1584 = vmatpush1.msra.mxu1 %v5931_v58 }
 0x39e   : > { %1514 = vmatprep.subr.mxu0 %v5937_v59  ;;  %1585 = vmatprep.subr.mxu1 %v5943_v62 }
 0x39f   : > { %1515 = vmatpush1.msra.mxu0 %v5949_v0  ;;  %1586 = vmatpush1.msra.mxu1 %v5955_v3 }
 0x3a0   : > { %1516 = vmatprep.subr.mxu0 %v5961_v5  ;;  %1587 = vmatprep.subr.mxu1 %v5967_v12 }
 0x3a1   : > { %1517 = vmatpush1.msra.mxu0 %v5973_v13  ;;  %1588 = vmatpush1.msra.mxu1 %v5979_v16 }
 0x3a2   : > { %1518 = vmatprep.subr.mxu0 %v5985_v17  ;;  %1589 = vmatprep.subr.mxu1 %v5991_v18 }
 0x3a3   : > { %1519 = vmatpush1.msra.mxu0 %v5997_v19  ;;  %1590 = vmatpush1.msra.mxu1 %v6003_v21  ;;  %v7975_v19 = vld [vmem:[#allocation48_spill] sm:$0xff] }
 0x3a4   : > { %1520 = vmatprep.subr.mxu0 %v6009_v22  ;;  %1591 = vmatprep.subr.mxu1 %v6015_v23 }
 0x3a5   : > { %1521 = vmatpush1.msra.mxu0 %v6021_v24  ;;  %1592 = vmatpush1.msra.mxu1 %v6027_v26  ;;  %v7974_v24 = vld [vmem:[#allocation49_spill] sm:$0xff] }
 0x3a6   : > { %1522 = vmatprep.subr.mxu0 %v6033_v28  ;;  %1593 = vmatprep.subr.mxu1 %v6039_v29  ;;  %v6063_v29 = vld [vmem:[%s7839_s9 + $0x18] sm:$0xff] }
 0x3a7   : > { %1523 = vmatpush1.msra.mxu0 %v6045_v31  ;;  %1594 = vmatpush1.msra.mxu1 %v6051_v32  ;;  %7970 = vst [vmem:[#allocation37_spill] sm:$0xff] %v6063_v29  ;;  %v6069_v31 = vld [vmem:[%s7839_s9] sm:$0xff] }
 0x3a8   : > { %1524 = vmatprep.subr.mxu0 %v6057_v33  ;;  %1595 = vmatprep.subr.mxu1 %v6063_v29  ;;  %7971 = vst [vmem:[#allocation35_spill] sm:$0xff] %v6069_v31  ;;  %v6076_v33 = vld [vmem:[%s7839_s9 + $0x10] sm:$0xff]  ;;  %v7973_v32 = vld [vmem:[#allocation47_spill] sm:$0xff] }
 0x3a9   : > { %1525 = vmatpush1.msra.mxu0 %v6069_v31  ;;  %1558 = vmatprep.mubr.f32.mxu0 %v7943_v37  ;;  %7972 = vst [vmem:[#allocation38_spill] sm:$0xff] %v6076_v33 }
 0x3aa   : > { %1596 = vmatpush1.msra.mxu1 %v6076_v33  ;;  %1629 = vmatprep.mubr.f32.mxu1 %v7943_v37  ;;  %v7976_v37 = vld [vmem:[#allocation50_spill] sm:$0xff] }
 0x3ab   : > { %1669 = vmatprep.subr.mxu0 %v5609_v39  ;;  %1740 = vmatprep.subr.mxu1 %v5615_v41 }
 0x44a   : > { %v1385_v29 = vpop.f32.mrf.mxu0  ;;  %v1456_v21 = vpop.f32.mrf.mxu1 }
 0x44b   : > { %v1461_v28 = vadd.f32 %v1385_v29, %v7973_v32  ;;  %v1463_v18 = vadd.f32 %v1456_v21, %v7975_v19  ;;  %v7980_v32 = vld [vmem:[#allocation28_spill] sm:$0xff] }
 0x44c   : > { %v1387_v26 = vpop.f32.mrf.mxu0  ;;  %v1458_v33 = vpop.f32.mrf.mxu1 }
 0x44d   : > { %v3780_v31 = vmul.f32 -1.442695, %v1461_v28  ;;  %v1462_v23 = vadd.f32 %v1387_v26, %v7974_v24  ;;  %v3782_v17 = vmul.f32 -1.442695, %v1463_v18  ;;  %v1464_v16 = vadd.f32 %v1458_v33, %v7976_v37  ;;  %v7981_v33 = vld [vmem:[#allocation22_spill] sm:$0xff] }
 0x44e   : > { %v1490_v37 = vstv %s1489_s7  ;;  %s2189_s7 = sadd.s32 7, %s5534_s17 }
 0x44f   : > { %3988 = vpow2.f32 %v3780_v31  ;;  %v3781_v22 = vmul.f32 -1.442695, %v1462_v23  ;;  %vm1491_vm4 = vcmp.lt.s32.totalorder %v1490_v37, %v5537_v9  ;;  %v7979_v31 = vld [vmem:[#allocation21_spill] sm:$0xff]  ;;  %v7990_v37 = vld [vmem:[#allocation36_spill] sm:$0xff] }
 0x451   : > { %3990 = vpow2.f32 %v3781_v22 }
 0x452   : > { %3992 = vpow2.f32 %v3782_v17  ;;  %v7978_v17 = vld [vmem:[#allocation26_spill] sm:$0xff] }
 0x453   : > { %3994 = vtanh.f32 %v1464_v16 }
 0x45c   : > { %v3989_v39 = vpop.eup %3988 }
 0x45d   : > { %v1474_v13 = vadd.f32 1.0, %v3989_v39 }
 0x45e   : > { %v3991_v41 = vpop.eup %3990 }
 0x45f   : > { %3996 = vrcp.f32 %v1474_v13  ;;  %v1475_v28 = vadd.f32 1.0, %v3991_v41  ;;  %v3993_v24 = vpop.eup %3992 }
 0x460   : > { %v3995_v26 = vpop.eup %3994  ;;  %v1476_v19 = vadd.f32 1.0, %v3993_v24  ;;  %v7983_v24 = vld [vmem:[#allocation23_spill] sm:$0xff] }
 0x461   : > { %3998 = vrcp.f32 %v1475_v28  ;;  %v7982_v28 = vld [vmem:[#allocation30_spill] sm:$0xff] }
 0x462   : > { %4000 = vrcp.f32 %v1476_v19  ;;  %v7988_v19 = vld [vmem:[#allocation34_spill] sm:$0xff] }
 0x46c   : > { %v3997_v23 = vpop.eup %3996 }
 0x46d   : > { %v1485_v22 = vmul.f32 %v3997_v23, %v3995_v26  ;;  %v7984_v26 = vld [vmem:[#allocation31_spill] sm:$0xff]  ;;  %v7985_v23 = vld [vmem:[#allocation25_spill] sm:$0xff] }
 0x46e   : > { %v3999_v29 = vpop.eup %3998 }
 0x46f   : > { %v1484_v18 = vmul.f32 %v3999_v29, %v5820_v27  ;;  %v4001_v39 = vpop.eup %4000  ;;  %v7977_v27 = vld [vmem:[#allocation20_spill] sm:$0xff]  ;;  %v7987_v29 = vld [vmem:[#allocation27_spill] sm:$0xff] }
 0x471   : > { %v6087_v21 = vadd.f32 %v1485_v22, %v1484_v18  ;;  %v7986_v22 = vld [vmem:[#allocation32_spill] sm:$0xff]  ;;  %v7989_v18 = vld [vmem:[#allocation29_spill] sm:$0xff] }
 0x473   : > { %4002 = vtanh.f32 %v6087_v21 }
 0x480   : > { %v4003_v13 = vpop.eup %4002 }
 0x481   : > { %v1488_v41 = vmul.f32 %v4003_v13, %v4001_v39  ;;  %v7991_v39 = vld [vmem:[#allocation33_spill] sm:$0xff] }
 0x482   : > { %v7992_v13 = vld [vmem:[#allocation37_spill] sm:$0xff] }
 0x483   : > { %v1492_v16 = vsel %vm1491_vm4, %v1488_v41, 0.0  ;;  %1559 = vmatmul.mubr.f32.vlgmr.msra.gmra.mxu0 %v1488_v41  ;;  %1630 = vmatmul.mubr.f32.vlgmr.msra.gmra.mxu1 %v1488_v41  ;;  %v7993_v41 = vld [vmem:[#allocation35_spill] sm:$0xff] }
 0x484   : > { %1493 = vst [vmem:[%s4765_s8 + $0x18] sm:$0xff] %v1492_v16  ;;  %1670 = vmatpush1.msra.mxu0 %v5632_v8  ;;  %1741 = vmatpush1.msra.mxu1 %v5638_v4  ;;  %v7994_v16 = vmov 0.0  }
 0x485   : > { %1671 = vmatprep.subr.mxu0 %v5644_v11  ;;  %1742 = vmatprep.subr.mxu1 %v5650_v14 }
 0x486   : > { %1672 = vmatpush1.msra.mxu0 %v5656_v35  ;;  %1743 = vmatpush1.msra.mxu1 %v5662_v40 }
 0x487   : > { %1673 = vmatprep.subr.mxu0 %v5668_v61  ;;  %1744 = vmatprep.subr.mxu1 %v5674_v55 }
 0x488   : > { %1674 = vmatpush1.msra.mxu0 %v5680_v15  ;;  %1745 = vmatpush1.msra.mxu1 %v5686_v6 }
 0x489   : > { %1675 = vmatprep.subr.mxu0 %v5692_v63  ;;  %1746 = vmatprep.subr.mxu1 %v5698_v43 }
 0x48a   : > { %1676 = vmatpush1.msra.mxu0 %v5704_v30  ;;  %1747 = vmatpush1.msra.mxu1 %v5710_v1 }
 0x48b   : > { %1677 = vmatprep.subr.mxu0 %v5716_v45  ;;  %1748 = vmatprep.subr.mxu1 %v5722_v20 }
 0x48c   : > { %1678 = vmatpush1.msra.mxu0 %v5728_v60  ;;  %1749 = vmatpush1.msra.mxu1 %v5734_v2 }
 0x48d   : > { %1679 = vmatprep.subr.mxu0 %v5740_v25  ;;  %1750 = vmatprep.subr.mxu1 %v5848_v34 }
 0x48e   : > { %1680 = vmatpush1.msra.mxu0 %v5747_v7  ;;  %1751 = vmatpush1.msra.mxu1 %v5855_v36 }
 0x48f   : > { %1681 = vmatprep.subr.mxu0 %v5754_v10  ;;  %1752 = vmatprep.subr.mxu1 %v5862_v38 }
 0x490   : > { %1682 = vmatpush1.msra.mxu0 %v5761_v42  ;;  %1753 = vmatpush1.msra.mxu1 %v5869_v50 }
 0x491   : > { %1683 = vmatprep.subr.mxu0 %v5768_v44  ;;  %1754 = vmatprep.subr.mxu1 %v5876_v46 }
 0x492   : > { %1684 = vmatpush1.msra.mxu0 %v5775_v47  ;;  %1755 = vmatpush1.msra.mxu1 %v5883_v48 }
 0x493   : > { %1685 = vmatprep.subr.mxu0 %v5889_v49  ;;  %1756 = vmatprep.subr.mxu1 %v5895_v51 }
 0x494   : > { %1686 = vmatpush1.msra.mxu0 %v5901_v52  ;;  %1757 = vmatpush1.msra.mxu1 %v5907_v53 }
 0x495   : > { %1687 = vmatprep.subr.mxu0 %v5913_v54  ;;  %1758 = vmatprep.subr.mxu1 %v5919_v56 }
 0x496   : > { %1688 = vmatpush1.msra.mxu0 %v5925_v57  ;;  %1759 = vmatpush1.msra.mxu1 %v5931_v58 }
 0x497   : > { %1689 = vmatprep.subr.mxu0 %v5937_v59  ;;  %1760 = vmatprep.subr.mxu1 %v5943_v62 }
 0x498   : > { %1690 = vmatpush1.msra.mxu0 %v5949_v0  ;;  %1761 = vmatpush1.msra.mxu1 %v5955_v3 }
 0x499   : > { %1691 = vmatprep.subr.mxu0 %v5961_v5  ;;  %1762 = vmatprep.subr.mxu1 %v5967_v12 }
 0x49a   : > { %1692 = vmatpush1.msra.mxu0 %v7977_v27  ;;  %1763 = vmatpush1.msra.mxu1 %v7978_v17 }
 0x49b   : > { %1693 = vmatprep.subr.mxu0 %v7979_v31  ;;  %1764 = vmatprep.subr.mxu1 %v7980_v32 }
 0x49c   : > { %1694 = vmatpush1.msra.mxu0 %v7981_v33  ;;  %1765 = vmatpush1.msra.mxu1 %v7982_v28  ;;  %v8000_v33 = vld [vmem:[#allocation52_spill] sm:$0xff] }
 0x49d   : > { %1695 = vmatprep.subr.mxu0 %v7983_v24  ;;  %1766 = vmatprep.subr.mxu1 %v7984_v26  ;;  %v7995_v26 = vld [vmem:[#allocation38_spill] sm:$0xff] }
 0x49e   : > { %1696 = vmatpush1.msra.mxu0 %v7985_v23  ;;  %1767 = vmatpush1.msra.mxu1 %v7986_v22  ;;  %v7996_v22 = vld [vmem:[#allocation19_spill] sm:$0xff] }
 0x49f   : > { %1697 = vmatprep.subr.mxu0 %v7987_v29  ;;  %1768 = vmatprep.subr.mxu1 %v7988_v19  ;;  %v7997_v29 = vld [vmem:[#allocation24_spill] sm:$0xff] }
 0x4a0   : > { %1698 = vmatpush1.msra.mxu0 %v7989_v18  ;;  %1769 = vmatpush1.msra.mxu1 %v7990_v37  ;;  %v7998_v18 = vld [vmem:[#allocation51_spill] sm:$0xff] }
 0x4a1   : > { %1699 = vmatprep.subr.mxu0 %v7991_v39  ;;  %1770 = vmatprep.subr.mxu1 %v7992_v13  ;;  %v7999_v39 = vld [vmem:[#allocation53_spill] sm:$0xff] }
 0x4a2   : > { %1700 = vmatpush1.msra.mxu0 %v7993_v41  ;;  %1733 = vmatprep.mubr.f32.mxu0 %v7994_v16 }
 0x4a3   : > { %1771 = vmatpush1.msra.mxu1 %v7995_v26  ;;  %1804 = vmatprep.mubr.f32.mxu1 %v7994_v16  ;;  %v8001_v16 = vld [vmem:[#allocation54_spill] sm:$0xff] }
 0x4a4   : > { %1844 = vmatprep.subr.mxu0 %v7996_v22  ;;  %1915 = vmatprep.subr.mxu1 %v7997_v29 }
 0x543   : > { %v1560_v19 = vpop.f32.mrf.mxu0  ;;  %v1631_v41 = vpop.f32.mrf.mxu1 }
 0x544   : > { %v1636_v23 = vadd.f32 %v1560_v19, %v7998_v18  ;;  %v1638_v32 = vadd.f32 %v1631_v41, %v8000_v33  ;;  %v8006_v41 = vld [vmem:[#allocation22_spill] sm:$0xff] }
 0x545   : > { %v1562_v37 = vpop.f32.mrf.mxu0  ;;  %v1633_v26 = vpop.f32.mrf.mxu1 }
 0x546   : > { %v3783_v24 = vmul.f32 -1.442695, %v1636_v23  ;;  %v1637_v28 = vadd.f32 %v1562_v37, %v7999_v39  ;;  %v3785_v31 = vmul.f32 -1.442695, %v1638_v32  ;;  %v1639_v17 = vadd.f32 %v1633_v26, %v8001_v16  ;;  %v8007_v16 = vld [vmem:[#allocation30_spill] sm:$0xff] }
 0x548   : > { %4004 = vpow2.f32 %v3783_v24  ;;  %v3784_v13 = vmul.f32 -1.442695, %v1637_v28 }
 0x54a   : > { %4006 = vpow2.f32 %v3784_v13  ;;  %v8005_v13 = vld [vmem:[#allocation28_spill] sm:$0xff] }
 0x54b   : > { %4008 = vpow2.f32 %v3785_v31  ;;  %v1665_v31 = vstv %s1664_s10 }
 0x54c   : > { %4010 = vtanh.f32 %v1639_v17  ;;  %vm1666_vm5 = vcmp.lt.s32.totalorder %v1665_v31, %v5537_v9  ;;  %v8002_v9 = vld [vmem:[#allocation20_spill] sm:$0xff]  ;;  %v8016_v31 = vld [vmem:[#allocation33_spill] sm:$0xff] }
 0x555   : > { %v4005_v22 = vpop.eup %4004 }
 0x556   : > { %v1649_v27 = vadd.f32 1.0, %v4005_v22 }
 0x557   : > { %v4007_v29 = vpop.eup %4006 }
 0x558   : > { %4012 = vrcp.f32 %v1649_v27  ;;  %v1650_v23 = vadd.f32 1.0, %v4007_v29  ;;  %v4009_v19 = vpop.eup %4008  ;;  %v8004_v29 = vld [vmem:[#allocation21_spill] sm:$0xff] }
 0x559   : > { %v4011_v24 = vpop.eup %4010  ;;  %v1651_v33 = vadd.f32 1.0, %v4009_v19  ;;  %v8009_v19 = vld [vmem:[#allocation31_spill] sm:$0xff] }
 0x55a   : > { %4014 = vrcp.f32 %v1650_v23  ;;  %v8008_v23 = vld [vmem:[#allocation23_spill] sm:$0xff] }
 0x55b   : > { %4016 = vrcp.f32 %v1651_v33  ;;  %v8014_v33 = vld [vmem:[#allocation29_spill] sm:$0xff] }
 0x565   : > { %v4013_v28 = vpop.eup %4012 }
 0x566   : > { %v1660_v18 = vmul.f32 %v4013_v28, %v4011_v24  ;;  %v8010_v24 = vld [vmem:[#allocation25_spill] sm:$0xff]  ;;  %v8011_v28 = vld [vmem:[#allocation32_spill] sm:$0xff] }
 0x567   : > { %v4015_v37 = vpop.eup %4014 }
 0x568   : > { %v1659_v32 = vmul.f32 %v4015_v37, %v6087_v21  ;;  %v4017_v17 = vpop.eup %4016  ;;  %v8003_v21 = vld [vmem:[#allocation26_spill] sm:$0xff] }
 0x569   : > { %v8013_v37 = vld [vmem:[#allocation34_spill] sm:$0xff] }
 0x56a   : > { %v6164_v39 = vadd.f32 %v1660_v18, %v1659_v32  ;;  %v8012_v18 = vld [vmem:[#allocation27_spill] sm:$0xff]  ;;  %v8015_v32 = vld [vmem:[#allocation36_spill] sm:$0xff] }
 0x56c   : > { %4018 = vtanh.f32 %v6164_v39 }
 0x579   : > { %v4019_v27 = vpop.eup %4018 }
 0x57a   : > { %v1663_v26 = vmul.f32 %v4019_v27, %v4017_v17  ;;  %v8017_v17 = vld [vmem:[#allocation37_spill] sm:$0xff]  ;;  %v8018_v27 = vld [vmem:[#allocation35_spill] sm:$0xff] }
 0x57c   : > { %v1667_v22 = vsel %vm1666_vm5, %v1663_v26, 0.0  ;;  %1734 = vmatmul.mubr.f32.vlgmr.msra.gmra.mxu0 %v1663_v26  ;;  %1805 = vmatmul.mubr.f32.vlgmr.msra.gmra.mxu1 %v1663_v26  ;;  %v8019_v26 = vmov 0.0  }
 0x57d   : > { %1668 = vst [vmem:[%s4765_s8 + $0x20] sm:$0xff] %v1667_v22  ;;  %1845 = vmatpush1.msra.mxu0 %v5632_v8  ;;  %1916 = vmatpush1.msra.mxu1 %v5638_v4  ;;  %v8020_v22 = vld [vmem:[#allocation38_spill] sm:$0xff] }
 0x57e   : > { %1846 = vmatprep.subr.mxu0 %v5644_v11  ;;  %1917 = vmatprep.subr.mxu1 %v5650_v14 }
 0x57f   : > { %1847 = vmatpush1.msra.mxu0 %v5656_v35  ;;  %1918 = vmatpush1.msra.mxu1 %v5662_v40 }
 0x580   : > { %1848 = vmatprep.subr.mxu0 %v5668_v61  ;;  %1919 = vmatprep.subr.mxu1 %v5674_v55 }
 0x581   : > { %1849 = vmatpush1.msra.mxu0 %v5680_v15  ;;  %1920 = vmatpush1.msra.mxu1 %v5686_v6 }
 0x582   : > { %1850 = vmatprep.subr.mxu0 %v5692_v63  ;;  %1921 = vmatprep.subr.mxu1 %v5698_v43 }
 0x583   : > { %1851 = vmatpush1.msra.mxu0 %v5704_v30  ;;  %1922 = vmatpush1.msra.mxu1 %v5710_v1 }
 0x584   : > { %1852 = vmatprep.subr.mxu0 %v5716_v45  ;;  %1923 = vmatprep.subr.mxu1 %v5722_v20 }
 0x585   : > { %1853 = vmatpush1.msra.mxu0 %v5728_v60  ;;  %1924 = vmatpush1.msra.mxu1 %v5734_v2 }
 0x586   : > { %1854 = vmatprep.subr.mxu0 %v5740_v25  ;;  %1925 = vmatprep.subr.mxu1 %v5848_v34 }
 0x587   : > { %1855 = vmatpush1.msra.mxu0 %v5747_v7  ;;  %1926 = vmatpush1.msra.mxu1 %v5855_v36 }
 0x588   : > { %1856 = vmatprep.subr.mxu0 %v5754_v10  ;;  %1927 = vmatprep.subr.mxu1 %v5862_v38 }
 0x589   : > { %1857 = vmatpush1.msra.mxu0 %v5761_v42  ;;  %1928 = vmatpush1.msra.mxu1 %v5869_v50 }
 0x58a   : > { %1858 = vmatprep.subr.mxu0 %v5768_v44  ;;  %1929 = vmatprep.subr.mxu1 %v5876_v46 }
 0x58b   : > { %1859 = vmatpush1.msra.mxu0 %v5775_v47  ;;  %1930 = vmatpush1.msra.mxu1 %v5883_v48 }
 0x58c   : > { %1860 = vmatprep.subr.mxu0 %v5889_v49  ;;  %1931 = vmatprep.subr.mxu1 %v5895_v51 }
 0x58d   : > { %1861 = vmatpush1.msra.mxu0 %v5901_v52  ;;  %1932 = vmatpush1.msra.mxu1 %v5907_v53 }
 0x58e   : > { %1862 = vmatprep.subr.mxu0 %v5913_v54  ;;  %1933 = vmatprep.subr.mxu1 %v5919_v56 }
 0x58f   : > { %1863 = vmatpush1.msra.mxu0 %v5925_v57  ;;  %1934 = vmatpush1.msra.mxu1 %v5931_v58 }
 0x590   : > { %1864 = vmatprep.subr.mxu0 %v5937_v59  ;;  %1935 = vmatprep.subr.mxu1 %v5943_v62 }
 0x591   : > { %1865 = vmatpush1.msra.mxu0 %v5949_v0  ;;  %1936 = vmatpush1.msra.mxu1 %v5955_v3 }
 0x592   : > { %1866 = vmatprep.subr.mxu0 %v5961_v5  ;;  %1937 = vmatprep.subr.mxu1 %v5967_v12 }
 0x593   : > { %1867 = vmatpush1.msra.mxu0 %v8002_v9  ;;  %1938 = vmatpush1.msra.mxu1 %v8003_v21 }
 0x594   : > { %1868 = vmatprep.subr.mxu0 %v8004_v29  ;;  %1939 = vmatprep.subr.mxu1 %v8005_v13 }
 0x595   : > { %1869 = vmatpush1.msra.mxu0 %v8006_v41  ;;  %1940 = vmatpush1.msra.mxu1 %v8007_v16  ;;  %v8025_v16 = vld [vmem:[#allocation56_spill] sm:$0xff] }
 0x596   : > { %1870 = vmatprep.subr.mxu0 %v8008_v23  ;;  %1941 = vmatprep.subr.mxu1 %v8009_v19 }
 0x597   : > { %1871 = vmatpush1.msra.mxu0 %v8010_v24  ;;  %1942 = vmatpush1.msra.mxu1 %v8011_v28  ;;  %v8021_v28 = vld [vmem:[#allocation19_spill] sm:$0xff] }
 0x598   : > { %1872 = vmatprep.subr.mxu0 %v8012_v18  ;;  %1943 = vmatprep.subr.mxu1 %v8013_v37  ;;  %v8022_v18 = vld [vmem:[#allocation24_spill] sm:$0xff] }
 0x599   : > { %1873 = vmatpush1.msra.mxu0 %v8014_v33  ;;  %1944 = vmatpush1.msra.mxu1 %v8015_v32  ;;  %v8023_v33 = vld [vmem:[#allocation55_spill] sm:$0xff] }
 0x59a   : > { %1874 = vmatprep.subr.mxu0 %v8016_v31  ;;  %1945 = vmatprep.subr.mxu1 %v8017_v17  ;;  %v8024_v31 = vld [vmem:[#allocation57_spill] sm:$0xff] }
 0x59b   : > { %1875 = vmatpush1.msra.mxu0 %v8018_v27  ;;  %1908 = vmatprep.mubr.f32.mxu0 %v8019_v26 }
 0x59c   : > { %1946 = vmatpush1.msra.mxu1 %v8020_v22  ;;  %1979 = vmatprep.mubr.f32.mxu1 %v8019_v26  ;;  %v8026_v26 = vld [vmem:[#allocation58_spill] sm:$0xff] }
 0x59d   : > { %2019 = vmatprep.subr.mxu0 %v8021_v28  ;;  %2090 = vmatprep.subr.mxu1 %v8022_v18 }
 0x63c   : > { %v1735_v37 = vpop.f32.mrf.mxu0  ;;  %v1806_v27 = vpop.f32.mrf.mxu1 }
 0x63d   : > { %v1811_v24 = vadd.f32 %v1735_v37, %v8023_v33  ;;  %v1813_v41 = vadd.f32 %v1806_v27, %v8025_v16 }
 0x63e   : > { %v1737_v32 = vpop.f32.mrf.mxu0  ;;  %v1808_v22 = vpop.f32.mrf.mxu1 }
 0x63f   : > { %v3786_v19 = vmul.f32 -1.442695, %v1811_v24  ;;  %v1812_v23 = vadd.f32 %v1737_v32, %v8024_v31  ;;  %v3788_v13 = vmul.f32 -1.442695, %v1813_v41  ;;  %v1814_v29 = vadd.f32 %v1808_v22, %v8026_v26  ;;  %v8048_v22 = vld [vmem:[#allocation61_spill] sm:$0xff] }
 0x641   : > { %4020 = vpow2.f32 %v3786_v19  ;;  %v3787_v17 = vmul.f32 -1.442695, %v1812_v23 }
 0x643   : > { %4022 = vpow2.f32 %v3787_v17  ;;  %v6246_v17 = vld [vmem:[%s4749_s13] sm:$0xff] }
 0x644   : > { %4024 = vpow2.f32 %v3788_v13 }
 0x645   : > { %4026 = vtanh.f32 %v1814_v29  ;;  %v1840_v29 = vstv %s1839_s12  ;;  %s4574_s12 = smov [#allocation9]  }
 0x646   : > { %vm1841_vm6 = vcmp.lt.s32.totalorder %v1840_v29, %v6246_v17 }
 0x64e   : > { %v4021_v28 = vpop.eup %4020 }
 0x64f   : > { %v1824_v21 = vadd.f32 1.0, %v4021_v28 }
 0x650   : > { %v4023_v18 = vpop.eup %4022 }
 0x651   : > { %4028 = vrcp.f32 %v1824_v21  ;;  %v1825_v24 = vadd.f32 1.0, %v4023_v18  ;;  %v4025_v19 = vpop.eup %4024 }
 0x652   : > { %v4027_v23 = vpop.eup %4026  ;;  %v1826_v16 = vadd.f32 1.0, %v4025_v19  ;;  %v8049_v19 = vld [vmem:[#allocation60_spill] sm:$0xff] }
 0x653   : > { %4030 = vrcp.f32 %v1825_v24 }
 0x654   : > { %4032 = vrcp.f32 %v1826_v16 }
 0x65e   : > { %v4029_v37 = vpop.eup %4028 }
 0x65f   : > { %v1835_v33 = vmul.f32 %v4029_v37, %v4027_v23 }
 0x660   : > { %v4031_v32 = vpop.eup %4030 }
 0x661   : > { %v1834_v41 = vmul.f32 %v4031_v32, %v6164_v39  ;;  %v4033_v21 = vpop.eup %4032  ;;  %v8050_v32 = vld [vmem:[#allocation62_spill] sm:$0xff] }
 0x663   : > { %v6241_v31 = vadd.f32 %v1835_v33, %v1834_v41 }
 0x665   : > { %4034 = vtanh.f32 %v6241_v31 }
 0x672   : > { %v4035_v13 = vpop.eup %4034 }
 0x673   : > { %v1838_v27 = vmul.f32 %v4035_v13, %v4033_v21 }
 0x675   : > { %v1842_v26 = vsel %vm1841_vm6, %v1838_v27, 0.0  ;;  %1909 = vmatmul.mubr.f32.vlgmr.msra.gmra.mxu0 %v1838_v27  ;;  %1980 = vmatmul.mubr.f32.vlgmr.msra.gmra.mxu1 %v1838_v27 }
 0x676   : > { %1843 = vst [vmem:[%s4765_s8 + $0x28] sm:$0xff] %v1842_v26  ;;  %2020 = vmatpush1.msra.mxu0 %v5632_v8  ;;  %2091 = vmatpush1.msra.mxu1 %v5638_v4  ;;  %v8027_v8 = vld [vmem:[#allocation26_spill] sm:$0xff]  ;;  %v8028_v4 = vld [vmem:[#allocation21_spill] sm:$0xff] }
 0x677   : > { %2021 = vmatprep.subr.mxu0 %v5644_v11  ;;  %2092 = vmatprep.subr.mxu1 %v5650_v14  ;;  %v8029_v11 = vld [vmem:[#allocation28_spill] sm:$0xff]  ;;  %v8030_v14 = vld [vmem:[#allocation22_spill] sm:$0xff] }
 0x678   : > { %2022 = vmatpush1.msra.mxu0 %v5656_v35  ;;  %2093 = vmatpush1.msra.mxu1 %v5662_v40  ;;  %v8031_v35 = vld [vmem:[#allocation30_spill] sm:$0xff]  ;;  %v8032_v40 = vld [vmem:[#allocation23_spill] sm:$0xff] }
 0x679   : > { %2023 = vmatprep.subr.mxu0 %v5668_v61  ;;  %2094 = vmatprep.subr.mxu1 %v5674_v55  ;;  %v8033_v61 = vld [vmem:[#allocation31_spill] sm:$0xff]  ;;  %v8034_v55 = vld [vmem:[#allocation25_spill] sm:$0xff] }
 0x67a   : > { %2024 = vmatpush1.msra.mxu0 %v5680_v15  ;;  %2095 = vmatpush1.msra.mxu1 %v5686_v6  ;;  %v8035_v15 = vld [vmem:[#allocation32_spill] sm:$0xff]  ;;  %v8036_v6 = vld [vmem:[#allocation27_spill] sm:$0xff] }
 0x67b   : > { %2025 = vmatprep.subr.mxu0 %v5692_v63  ;;  %2096 = vmatprep.subr.mxu1 %v5698_v43  ;;  %v8037_v63 = vld [vmem:[#allocation34_spill] sm:$0xff]  ;;  %v8038_v43 = vld [vmem:[#allocation29_spill] sm:$0xff] }
 0x67c   : > { %2026 = vmatpush1.msra.mxu0 %v5704_v30  ;;  %2097 = vmatpush1.msra.mxu1 %v5710_v1  ;;  %v8039_v30 = vld [vmem:[#allocation36_spill] sm:$0xff]  ;;  %v8040_v1 = vld [vmem:[#allocation33_spill] sm:$0xff] }
 0x67d   : > { %2027 = vmatprep.subr.mxu0 %v5716_v45  ;;  %2098 = vmatprep.subr.mxu1 %v5722_v20  ;;  %v8041_v45 = vld [vmem:[#allocation37_spill] sm:$0xff]  ;;  %v8042_v20 = vld [vmem:[#allocation35_spill] sm:$0xff] }
 0x67e   : > { %2028 = vmatpush1.msra.mxu0 %v5728_v60  ;;  %2099 = vmatpush1.msra.mxu1 %v5734_v2  ;;  %v8043_v60 = vmov 0.0   ;;  %v8044_v2 = vld [vmem:[#allocation38_spill] sm:$0xff] }
 0x67f   : > { %2029 = vmatprep.subr.mxu0 %v5740_v25  ;;  %2100 = vmatprep.subr.mxu1 %v5848_v34  ;;  %v6317_v25 = vld [vmem:[%s7839_s9 + $0x1e8] sm:$0xff] }
 0x680   : > { %2030 = vmatpush1.msra.mxu0 %v5747_v7  ;;  %2101 = vmatpush1.msra.mxu1 %v5855_v36  ;;  %8045 = vst [vmem:[#allocation39_spill] sm:$0xff] %v6317_v25  ;;  %v6323_v7 = vld [vmem:[%s7839_s9 + $0x1f8] sm:$0xff] }
 0x681   : > { %2031 = vmatprep.subr.mxu0 %v5754_v10  ;;  %2102 = vmatprep.subr.mxu1 %v5862_v38  ;;  %8046 = vst [vmem:[#allocation41_spill] sm:$0xff] %v6323_v7 }
 0x682   : > { %2032 = vmatpush1.msra.mxu0 %v5761_v42  ;;  %2103 = vmatpush1.msra.mxu1 %v5869_v50  ;;  %v8047_v42 = vld [vmem:[#allocation59_spill] sm:$0xff] }
 0x683   : > { %2033 = vmatprep.subr.mxu0 %v5768_v44  ;;  %2104 = vmatprep.subr.mxu1 %v5876_v46 }
 0x684   : > { %2034 = vmatpush1.msra.mxu0 %v5775_v47  ;;  %2105 = vmatpush1.msra.mxu1 %v5883_v48 }
 0x685   : > { %2035 = vmatprep.subr.mxu0 %v5889_v49  ;;  %2106 = vmatprep.subr.mxu1 %v5895_v51 }
 0x686   : > { %2036 = vmatpush1.msra.mxu0 %v5901_v52  ;;  %2107 = vmatpush1.msra.mxu1 %v5907_v53 }
 0x687   : > { %2037 = vmatprep.subr.mxu0 %v5913_v54  ;;  %2108 = vmatprep.subr.mxu1 %v5919_v56 }
 0x688   : > { %2038 = vmatpush1.msra.mxu0 %v5925_v57  ;;  %2109 = vmatpush1.msra.mxu1 %v5931_v58 }
 0x689   : > { %2039 = vmatprep.subr.mxu0 %v5937_v59  ;;  %2110 = vmatprep.subr.mxu1 %v5943_v62 }
 0x68a   : > { %2040 = vmatpush1.msra.mxu0 %v5949_v0  ;;  %2111 = vmatpush1.msra.mxu1 %v5955_v3 }
 0x68b   : > { %2041 = vmatprep.subr.mxu0 %v5961_v5  ;;  %2112 = vmatprep.subr.mxu1 %v5967_v12 }
 0x68c   : > { %2042 = vmatpush1.msra.mxu0 %v8002_v9  ;;  %2113 = vmatpush1.msra.mxu1 %v8027_v8 }
 0x68d   : > { %2043 = vmatprep.subr.mxu0 %v8028_v4  ;;  %2114 = vmatprep.subr.mxu1 %v8029_v11 }
 0x68e   : > { %2044 = vmatpush1.msra.mxu0 %v8030_v14  ;;  %2115 = vmatpush1.msra.mxu1 %v8031_v35 }
 0x68f   : > { %2045 = vmatprep.subr.mxu0 %v8032_v40  ;;  %2116 = vmatprep.subr.mxu1 %v8033_v61 }
 0x690   : > { %2046 = vmatpush1.msra.mxu0 %v8034_v55  ;;  %2117 = vmatpush1.msra.mxu1 %v8035_v15 }
 0x691   : > { %2047 = vmatprep.subr.mxu0 %v8036_v6  ;;  %2118 = vmatprep.subr.mxu1 %v8037_v63 }
 0x692   : > { %2048 = vmatpush1.msra.mxu0 %v8038_v43  ;;  %2119 = vmatpush1.msra.mxu1 %v8039_v30 }
 0x693   : > { %2049 = vmatprep.subr.mxu0 %v8040_v1  ;;  %2120 = vmatprep.subr.mxu1 %v8041_v45 }
 0x694   : > { %2050 = vmatpush1.msra.mxu0 %v8042_v20  ;;  %2083 = vmatprep.mubr.f32.mxu0 %v8043_v60 }
 0x695   : > { %2121 = vmatpush1.msra.mxu1 %v8044_v2  ;;  %2154 = vmatprep.mubr.f32.mxu1 %v8043_v60 }
 0x696   : > { %2194 = vmatprep.subr.mxu0 %v6317_v25  ;;  %2265 = vmatprep.subr.mxu1 %v6323_v7 }
 0x735   : > { %v1910_v10 = vpop.f32.mrf.mxu0  ;;  %v1981_v24 = vpop.f32.mrf.mxu1 }
 0x736   : > { %v1986_v44 = vadd.f32 %v1910_v10, %v8047_v42  ;;  %v1988_v23 = vadd.f32 %v1981_v24, %v8049_v19 }
 0x737   : > { %v1912_v47 = vpop.f32.mrf.mxu0  ;;  %v1983_v37 = vpop.f32.mrf.mxu1 }
 0x738   : > { %v3789_v39 = vmul.f32 -1.442695, %v1986_v44  ;;  %v1987_v28 = vadd.f32 %v1912_v47, %v8048_v22  ;;  %v3791_v33 = vmul.f32 -1.442695, %v1988_v23  ;;  %v1989_v16 = vadd.f32 %v1983_v37, %v8050_v32  ;;  %v6346_v37 = vld [vmem:[%s7839_s9 + $0x1f0] sm:$0xff]  ;;  %v6358_v32 = vld [vmem:[%s7839_s9 + $0x1d8] sm:$0xff] }
 0x73a   : > { %4036 = vpow2.f32 %v3789_v39  ;;  %v3790_v18 = vmul.f32 -1.442695, %v1987_v28  ;;  %v2015_v28 = vstv %s2014_s30  ;;  %s2364_s30 = sadd.s32 8, %s5534_s17 }
 0x73b   : > { %vm2016_vm7 = vcmp.lt.s32.totalorder %v2015_v28, %v6246_v17  ;;  %v6436_v28 = vld [vmem:[%s7839_s9 + $0x160] sm:$0xff] }
 0x73c   : > { %4038 = vpow2.f32 %v3790_v18 }
 0x73d   : > { %4040 = vpow2.f32 %v3791_v33  ;;  %v6352_v33 = vld [vmem:[%s7839_s9 + $0x1c8] sm:$0xff] }
 0x73e   : > { %4042 = vtanh.f32 %v1989_v16  ;;  %v6364_v16 = vld [vmem:[%s7839_s9 + $0x1c0] sm:$0xff] }
 0x747   : > { %v4037_v41 = vpop.eup %4036 }
 0x748   : > { %v1999_v29 = vadd.f32 1.0, %v4037_v41  ;;  %v6370_v41 = vld [vmem:[%s7839_s9 + $0x1d0] sm:$0xff] }
 0x749   : > { %v4039_v21 = vpop.eup %4038 }
 0x74a   : > { %4044 = vrcp.f32 %v1999_v29  ;;  %v2000_v13 = vadd.f32 1.0, %v4039_v21  ;;  %v4041_v27 = vpop.eup %4040  ;;  %v6376_v29 = vld [vmem:[%s7839_s9 + $0x1a8] sm:$0xff]  ;;  %v6382_v21 = vld [vmem:[%s7839_s9 + $0x1b8] sm:$0xff] }
 0x74b   : > { %v4043_v26 = vpop.eup %4042  ;;  %v2001_v47 = vadd.f32 1.0, %v4041_v27  ;;  %v6394_v27 = vld [vmem:[%s7839_s9 + $0x1b0] sm:$0xff] }
 0x74c   : > { %4046 = vrcp.f32 %v2000_v13  ;;  %v6388_v13 = vld [vmem:[%s7839_s9 + $0x1a0] sm:$0xff] }
 0x74d   : > { %4048 = vrcp.f32 %v2001_v47  ;;  %v6424_v47 = vld [vmem:[%s7839_s9 + $0x168] sm:$0xff] }
 0x757   : > { %v4045_v10 = vpop.eup %4044 }
 0x758   : > { %v2010_v42 = vmul.f32 %v4045_v10, %v4043_v26  ;;  %v6400_v26 = vld [vmem:[%s7839_s9 + $0x188] sm:$0xff]  ;;  %v6406_v10 = vld [vmem:[%s7839_s9 + $0x198] sm:$0xff] }
 0x759   : > { %v4047_v44 = vpop.eup %4046 }
 0x75a   : > { %v2009_v39 = vmul.f32 %v4047_v44, %v6241_v31  ;;  %v4049_v18 = vpop.eup %4048  ;;  %v6340_v31 = vld [vmem:[%s7839_s9 + $0x1e0] sm:$0xff]  ;;  %v6418_v44 = vld [vmem:[%s7839_s9 + $0x190] sm:$0xff] }
 0x75c   : > { %v6331_v22 = vadd.f32 %v2010_v42, %v2009_v39  ;;  %v6412_v42 = vld [vmem:[%s7839_s9 + $0x180] sm:$0xff]  ;;  %v6430_v39 = vld [vmem:[%s7839_s9 + $0x178] sm:$0xff] }
 0x75e   : > { %4050 = vtanh.f32 %v6331_v22 }
 0x76b   : > { %v4051_v24 = vpop.eup %4050 }
 0x76c   : > { %v2013_v19 = vmul.f32 %v4051_v24, %v4049_v18  ;;  %v6442_v18 = vld [vmem:[%s7839_s9 + $0x170] sm:$0xff]  ;;  %v6448_v24 = vld [vmem:[%s7839_s9 + $0x148] sm:$0xff] }
 0x76e   : > { %v2017_v23 = vsel %vm2016_vm7, %v2013_v19, 0.0  ;;  %2084 = vmatmul.mubr.f32.vlgmr.msra.gmra.mxu0 %v2013_v19  ;;  %2155 = vmatmul.mubr.f32.vlgmr.msra.gmra.mxu1 %v2013_v19  ;;  %v6455_v19 = vld [vmem:[%s7839_s9 + $0x140] sm:$0xff] }
 0x76f   : > { %2018 = vst [vmem:[%s4765_s8 + $0x30] sm:$0xff] %v2017_v23  ;;  %2195 = vmatpush1.msra.mxu0 %v6340_v31  ;;  %2266 = vmatpush1.msra.mxu1 %v6346_v37  ;;  %v6462_v23 = vld [vmem:[%s7839_s9 + $0x128] sm:$0xff] }
 0x770   : > { %2196 = vmatprep.subr.mxu0 %v6352_v33  ;;  %2267 = vmatprep.subr.mxu1 %v6358_v32 }
 0x771   : > { %2197 = vmatpush1.msra.mxu0 %v6364_v16  ;;  %2268 = vmatpush1.msra.mxu1 %v6370_v41 }
 0x772   : > { %2198 = vmatprep.subr.mxu0 %v6376_v29  ;;  %2269 = vmatprep.subr.mxu1 %v6382_v21 }
 0x773   : > { %2199 = vmatpush1.msra.mxu0 %v6388_v13  ;;  %2270 = vmatpush1.msra.mxu1 %v6394_v27 }
 0x774   : > { %2200 = vmatprep.subr.mxu0 %v6400_v26  ;;  %2271 = vmatprep.subr.mxu1 %v6406_v10 }
 0x775   : > { %2201 = vmatpush1.msra.mxu0 %v6412_v42  ;;  %2272 = vmatpush1.msra.mxu1 %v6418_v44 }
 0x776   : > { %2202 = vmatprep.subr.mxu0 %v6424_v47  ;;  %2273 = vmatprep.subr.mxu1 %v6430_v39 }
 0x777   : > { %2203 = vmatpush1.msra.mxu0 %v6436_v28  ;;  %2274 = vmatpush1.msra.mxu1 %v6442_v18 }
 0x778   : > { %2204 = vmatprep.subr.mxu0 %v6448_v24  ;;  %2275 = vmatprep.subr.mxu1 %v5848_v34  ;;  %v6469_v34 = vld [vmem:[%s7839_s9 + $0x120] sm:$0xff] }
 0x779   : > { %2205 = vmatpush1.msra.mxu0 %v6455_v19  ;;  %2276 = vmatpush1.msra.mxu1 %v5855_v36  ;;  %v6476_v36 = vld [vmem:[%s7839_s9 + $0x108] sm:$0xff] }
 0x77a   : > { %2206 = vmatprep.subr.mxu0 %v6462_v23  ;;  %2277 = vmatprep.subr.mxu1 %v5862_v38  ;;  %v6483_v38 = vld [vmem:[%s7839_s9 + $0x100] sm:$0xff] }
 0x77b   : > { %2207 = vmatpush1.msra.mxu0 %v6469_v34  ;;  %2278 = vmatpush1.msra.mxu1 %v5869_v50 }
 0x77c   : > { %2208 = vmatprep.subr.mxu0 %v6476_v36  ;;  %2279 = vmatprep.subr.mxu1 %v5876_v46  ;;  %v8051_v46 = vld [vmem:[#allocation63_spill] sm:$0xff] }
 0x77d   : > { %2209 = vmatpush1.msra.mxu0 %v6483_v38  ;;  %2280 = vmatpush1.msra.mxu1 %v5883_v48 }
 0x77e   : > { %2210 = vmatprep.subr.mxu0 %v5889_v49  ;;  %2281 = vmatprep.subr.mxu1 %v5895_v51 }
 0x77f   : > { %2211 = vmatpush1.msra.mxu0 %v5901_v52  ;;  %2282 = vmatpush1.msra.mxu1 %v5907_v53  ;;  %v8052_v52 = vld [vmem:[#allocation65_spill] sm:$0xff] }
 0x780   : > { %2212 = vmatprep.subr.mxu0 %v5913_v54  ;;  %2283 = vmatprep.subr.mxu1 %v5919_v56 }
 0x781   : > { %2213 = vmatpush1.msra.mxu0 %v5925_v57  ;;  %2284 = vmatpush1.msra.mxu1 %v5931_v58  ;;  %v8053_v57 = vld [vmem:[#allocation64_spill] sm:$0xff] }
 0x782   : > { %2214 = vmatprep.subr.mxu0 %v5937_v59  ;;  %2285 = vmatprep.subr.mxu1 %v5943_v62 }
 0x783   : > { %2215 = vmatpush1.msra.mxu0 %v5949_v0  ;;  %2286 = vmatpush1.msra.mxu1 %v5955_v3  ;;  %v8054_v0 = vld [vmem:[#allocation66_spill] sm:$0xff] }
 0x784   : > { %2216 = vmatprep.subr.mxu0 %v5961_v5  ;;  %2287 = vmatprep.subr.mxu1 %v5967_v12 }
 0x785   : > { %2217 = vmatpush1.msra.mxu0 %v8002_v9  ;;  %2288 = vmatpush1.msra.mxu1 %v8027_v8 }
 0x786   : > { %2218 = vmatprep.subr.mxu0 %v8028_v4  ;;  %2289 = vmatprep.subr.mxu1 %v8029_v11 }
 0x787   : > { %2219 = vmatpush1.msra.mxu0 %v8030_v14  ;;  %2290 = vmatpush1.msra.mxu1 %v8031_v35 }
 0x788   : > { %2220 = vmatprep.subr.mxu0 %v8032_v40  ;;  %2291 = vmatprep.subr.mxu1 %v8033_v61 }
 0x789   : > { %2221 = vmatpush1.msra.mxu0 %v8034_v55  ;;  %2292 = vmatpush1.msra.mxu1 %v8035_v15 }
 0x78a   : > { %2222 = vmatprep.subr.mxu0 %v8036_v6  ;;  %2293 = vmatprep.subr.mxu1 %v8037_v63  ;;  %v2190_v6 = vstv %s2189_s7  ;;  %s8203_s7 = sld [smem:[#allocation101_spill]] }
 0x78b   : > { %2223 = vmatpush1.msra.mxu0 %v8038_v43  ;;  %2294 = vmatpush1.msra.mxu1 %v8039_v30  ;;  %vm2191_vm8 = vcmp.lt.s32.totalorder %v2190_v6, %v6246_v17  ;;  %v6741_v6 = vld [vmem:[%s7839_s9 + $0x28] sm:$0xff] }
 0x78c   : > { %2224 = vmatprep.subr.mxu0 %v8040_v1  ;;  %2295 = vmatprep.subr.mxu1 %v8041_v45  ;;  %v6556_v45 = vld [vmem:[%s7839_s9 + $0x158] sm:$0xff]  ;;  %8065 = vst [vmem:[#allocation51_spill] sm:$0xff] %v6741_v6 }
 0x78d   : > { %2225 = vmatpush1.msra.mxu0 %v8042_v20  ;;  %2258 = vmatprep.mubr.f32.mxu0 %v8043_v60  ;;  %v6563_v20 = vld [vmem:[%s7839_s9 + $0x150] sm:$0xff] }
 0x78e   : > { %2296 = vmatpush1.msra.mxu1 %v8044_v2  ;;  %2329 = vmatprep.mubr.f32.mxu1 %v8043_v60  ;;  %v6570_v2 = vld [vmem:[%s7839_s9 + $0x138] sm:$0xff] }
 0x78f   : > { %2369 = vmatprep.subr.mxu0 %v6317_v25  ;;  %2440 = vmatprep.subr.mxu1 %v6323_v7 }
 0x82e   : > { %v2085_v50 = vpop.f32.mrf.mxu0  ;;  %v2156_v56 = vpop.f32.mrf.mxu1 }
 0x82f   : > { %v2161_v48 = vadd.f32 %v2085_v50, %v8051_v46  ;;  %v2163_v58 = vadd.f32 %v2156_v56, %v8053_v57  ;;  %v6584_v50 = vld [vmem:[%s7839_s9 + $0x118] sm:$0xff]  ;;  %v6591_v46 = vld [vmem:[%s7839_s9 + $0x110] sm:$0xff]  ;;  %v6633_v56 = vld [vmem:[%s7839_s9 + $0xc0] sm:$0xff] }
 0x830   : > { %v2087_v49 = vpop.f32.mrf.mxu0  ;;  %v2158_v59 = vpop.f32.mrf.mxu1  ;;  %v6639_v57 = vld [vmem:[%s7839_s9 + $0xd0] sm:$0xff] }
 0x831   : > { %v3792_v51 = vmul.f32 -1.442695, %v2161_v48  ;;  %v2162_v53 = vadd.f32 %v2087_v49, %v8052_v52  ;;  %v3794_v62 = vmul.f32 -1.442695, %v2163_v58  ;;  %v2164_v3 = vadd.f32 %v2158_v59, %v8054_v0  ;;  %v6597_v48 = vld [vmem:[%s7839_s9 + $0xe8] sm:$0xff]  ;;  %v6603_v49 = vld [vmem:[%s7839_s9 + $0xf8] sm:$0xff] }
 0x832   : > { %v6615_v52 = vld [vmem:[%s7839_s9 + $0xf0] sm:$0xff]  ;;  %v6645_v58 = vld [vmem:[%s7839_s9 + $0xa8] sm:$0xff]  ;;  %v6651_v59 = vld [vmem:[%s7839_s9 + $0xb8] sm:$0xff] }
 0x833   : > { %4052 = vpow2.f32 %v3792_v51  ;;  %v3793_v54 = vmul.f32 -1.442695, %v2162_v53  ;;  %v6609_v51 = vld [vmem:[%s7839_s9 + $0xe0] sm:$0xff]  ;;  %v6621_v53 = vld [vmem:[%s7839_s9 + $0xc8] sm:$0xff]  ;;  %v6663_v0 = vld [vmem:[%s7839_s9 + $0xb0] sm:$0xff] }
 0x835   : > { %4054 = vpow2.f32 %v3793_v54  ;;  %v6627_v54 = vld [vmem:[%s7839_s9 + $0xd8] sm:$0xff] }
 0x836   : > { %4056 = vpow2.f32 %v3794_v62  ;;  %v6657_v62 = vld [vmem:[%s7839_s9 + $0xa0] sm:$0xff] }
 0x837   : > { %4058 = vtanh.f32 %v2164_v3  ;;  %v6669_v3 = vld [vmem:[%s7839_s9 + $0x88] sm:$0xff] }
 0x840   : > { %v4053_v5 = vpop.eup %4052 }
 0x841   : > { %v2174_v12 = vadd.f32 1.0, %v4053_v5  ;;  %v6675_v5 = vld [vmem:[%s7839_s9 + $0x98] sm:$0xff] }
 0x842   : > { %v4055_v9 = vpop.eup %4054 }
 0x843   : > { %4060 = vrcp.f32 %v2174_v12  ;;  %v2175_v8 = vadd.f32 1.0, %v4055_v9  ;;  %v4057_v4 = vpop.eup %4056  ;;  %v6681_v12 = vld [vmem:[%s7839_s9 + $0x80] sm:$0xff]  ;;  %v6687_v9 = vld [vmem:[%s7839_s9 + $0x90] sm:$0xff] }
 0x844   : > { %v4059_v11 = vpop.eup %4058  ;;  %v2176_v61 = vadd.f32 1.0, %v4057_v4  ;;  %8055 = vst [vmem:[#allocation40_spill] sm:$0xff] %v6681_v12  ;;  %8056 = vst [vmem:[#allocation42_spill] sm:$0xff] %v6687_v9  ;;  %v6699_v4 = vld [vmem:[%s7839_s9 + $0x78] sm:$0xff] }
 0x845   : > { %4062 = vrcp.f32 %v2175_v8  ;;  %v6693_v8 = vld [vmem:[%s7839_s9 + $0x68] sm:$0xff]  ;;  %8058 = vst [vmem:[#allocation45_spill] sm:$0xff] %v6699_v4 }
 0x846   : > { %4064 = vrcp.f32 %v2176_v61  ;;  %8057 = vst [vmem:[#allocation43_spill] sm:$0xff] %v6693_v8  ;;  %v6729_v61 = vld [vmem:[%s7839_s9 + $0x40] sm:$0xff] }
 0x847   : > { %8063 = vst [vmem:[#allocation48_spill] sm:$0xff] %v6729_v61 }
 0x850   : > { %v4061_v14 = vpop.eup %4060 }
 0x851   : > { %v2185_v35 = vmul.f32 %v4061_v14, %v4059_v11  ;;  %v6705_v11 = vld [vmem:[%s7839_s9 + $0x60] sm:$0xff]  ;;  %v6711_v14 = vld [vmem:[%s7839_s9 + $0x70] sm:$0xff] }
 0x852   : > { %v4063_v40 = vpop.eup %4062  ;;  %8059 = vst [vmem:[#allocation44_spill] sm:$0xff] %v6705_v11  ;;  %8060 = vst [vmem:[#allocation46_spill] sm:$0xff] %v6711_v14 }
 0x853   : > { %v2184_v55 = vmul.f32 %v4063_v40, %v6331_v22  ;;  %v4065_v63 = vpop.eup %4064  ;;  %v6577_v22 = vld [vmem:[%s7839_s9 + $0x130] sm:$0xff]  ;;  %v6723_v40 = vld [vmem:[%s7839_s9 + $0x58] sm:$0xff] }
 0x854   : > { %8062 = vst [vmem:[#allocation49_spill] sm:$0xff] %v6723_v40 }
 0x855   : > { %v6528_v15 = vadd.f32 %v2185_v35, %v2184_v55  ;;  %v6717_v35 = vld [vmem:[%s7839_s9 + $0x48] sm:$0xff]  ;;  %v6735_v55 = vld [vmem:[%s7839_s9 + $0x50] sm:$0xff] }
 0x856   : > { %8061 = vst [vmem:[#allocation47_spill] sm:$0xff] %v6717_v35  ;;  %8064 = vst [vmem:[#allocation50_spill] sm:$0xff] %v6735_v55 }
 0x857   : > { %4066 = vtanh.f32 %v6528_v15 }
 0x864   : > { %v4067_v43 = vpop.eup %4066 }
 0x865   : > { %v2188_v30 = vmul.f32 %v4067_v43, %v4065_v63  ;;  %v6747_v63 = vld [vmem:[%s7839_s9 + $0x38] sm:$0xff]  ;;  %v6753_v43 = vld [vmem:[%s7839_s9 + $0x20] sm:$0xff] }
 0x866   : > { %8066 = vst [vmem:[#allocation53_spill] sm:$0xff] %v6747_v63  ;;  %8067 = vst [vmem:[#allocation52_spill] sm:$0xff] %v6753_v43 }
 0x867   : > { %v2192_v1 = vsel %vm2191_vm8, %v2188_v30, 0.0  ;;  %2259 = vmatmul.mubr.f32.vlgmr.msra.gmra.mxu0 %v2188_v30  ;;  %2330 = vmatmul.mubr.f32.vlgmr.msra.gmra.mxu1 %v2188_v30  ;;  %v6759_v30 = vld [vmem:[%s7839_s9 + $0x30] sm:$0xff] }
 0x868   : > { %2193 = vst [vmem:[%s4765_s8 + $0x38] sm:$0xff] %v2192_v1  ;;  %2370 = vmatpush1.msra.mxu0 %v6340_v31  ;;  %2441 = vmatpush1.msra.mxu1 %v6346_v37  ;;  %8068 = vst [vmem:[#allocation54_spill] sm:$0xff] %v6759_v30  ;;  %v6765_v1 = vld [vmem:[%s7839_s9 + $0x8] sm:$0xff] }
 0x869   : > { %2371 = vmatprep.subr.mxu0 %v6352_v33  ;;  %2442 = vmatprep.subr.mxu1 %v6358_v32  ;;  %8069 = vst [vmem:[#allocation20_spill] sm:$0xff] %v6765_v1 }
 0x86a   : > { %2372 = vmatpush1.msra.mxu0 %v6364_v16  ;;  %2443 = vmatpush1.msra.mxu1 %v6370_v41 }
 0x86b   : > { %2373 = vmatprep.subr.mxu0 %v6376_v29  ;;  %2444 = vmatprep.subr.mxu1 %v6382_v21 }
 0x86c   : > { %2374 = vmatpush1.msra.mxu0 %v6388_v13  ;;  %2445 = vmatpush1.msra.mxu1 %v6394_v27 }
 0x86d   : > { %2375 = vmatprep.subr.mxu0 %v6400_v26  ;;  %2446 = vmatprep.subr.mxu1 %v6406_v10 }
 0x86e   : > { %2376 = vmatpush1.msra.mxu0 %v6412_v42  ;;  %2447 = vmatpush1.msra.mxu1 %v6418_v44 }
 0x86f   : > { %2377 = vmatprep.subr.mxu0 %v6424_v47  ;;  %2448 = vmatprep.subr.mxu1 %v6430_v39 }
 0x870   : > { %2378 = vmatpush1.msra.mxu0 %v6436_v28  ;;  %2449 = vmatpush1.msra.mxu1 %v6442_v18 }
 0x871   : > { %2379 = vmatprep.subr.mxu0 %v6448_v24  ;;  %2450 = vmatprep.subr.mxu1 %v6556_v45 }
 0x872   : > { %2380 = vmatpush1.msra.mxu0 %v6455_v19  ;;  %2451 = vmatpush1.msra.mxu1 %v6563_v20 }
 0x873   : > { %2381 = vmatprep.subr.mxu0 %v6462_v23  ;;  %2452 = vmatprep.subr.mxu1 %v6570_v2 }
 0x874   : > { %2382 = vmatpush1.msra.mxu0 %v6469_v34  ;;  %2453 = vmatpush1.msra.mxu1 %v6577_v22 }
 0x875   : > { %2383 = vmatprep.subr.mxu0 %v6476_v36  ;;  %2454 = vmatprep.subr.mxu1 %v6584_v50 }
 0x876   : > { %2384 = vmatpush1.msra.mxu0 %v6483_v38  ;;  %2455 = vmatpush1.msra.mxu1 %v6591_v46 }
 0x877   : > { %2385 = vmatprep.subr.mxu0 %v6597_v48  ;;  %2456 = vmatprep.subr.mxu1 %v6603_v49 }
 0x878   : > { %2386 = vmatpush1.msra.mxu0 %v6609_v51  ;;  %2457 = vmatpush1.msra.mxu1 %v6615_v52 }
 0x879   : > { %2387 = vmatprep.subr.mxu0 %v6621_v53  ;;  %2458 = vmatprep.subr.mxu1 %v6627_v54 }
 0x87a   : > { %2388 = vmatpush1.msra.mxu0 %v6633_v56  ;;  %2459 = vmatpush1.msra.mxu1 %v6639_v57 }
 0x87b   : > { %2389 = vmatprep.subr.mxu0 %v6645_v58  ;;  %2460 = vmatprep.subr.mxu1 %v6651_v59 }
 0x87c   : > { %2390 = vmatpush1.msra.mxu0 %v6657_v62  ;;  %2461 = vmatpush1.msra.mxu1 %v6663_v0 }
 0x87d   : > { %2391 = vmatprep.subr.mxu0 %v6669_v3  ;;  %2462 = vmatprep.subr.mxu1 %v6675_v5 }
 0x87e   : > { %2392 = vmatpush1.msra.mxu0 %v6681_v12  ;;  %2463 = vmatpush1.msra.mxu1 %v6687_v9 }
 0x87f   : > { %2393 = vmatprep.subr.mxu0 %v6693_v8  ;;  %2464 = vmatprep.subr.mxu1 %v6699_v4 }
 0x880   : > { %2394 = vmatpush1.msra.mxu0 %v6705_v11  ;;  %2465 = vmatpush1.msra.mxu1 %v6711_v14  ;;  %v8075_v11 = vld [vmem:[#allocation68_spill] sm:$0xff] }
 0x881   : > { %2395 = vmatprep.subr.mxu0 %v6717_v35  ;;  %2466 = vmatprep.subr.mxu1 %v6723_v40 }
 0x882   : > { %2396 = vmatpush1.msra.mxu0 %v6729_v61  ;;  %2467 = vmatpush1.msra.mxu1 %v6735_v55  ;;  %v8074_v61 = vld [vmem:[#allocation69_spill] sm:$0xff] }
 0x883   : > { %2397 = vmatprep.subr.mxu0 %v6741_v6  ;;  %2468 = vmatprep.subr.mxu1 %v6747_v63  ;;  %v6771_v63 = vld [vmem:[%s7839_s9 + $0x18] sm:$0xff] }
 0x884   : > { %2398 = vmatpush1.msra.mxu0 %v6753_v43  ;;  %2469 = vmatpush1.msra.mxu1 %v6759_v30  ;;  %8070 = vst [vmem:[#allocation19_spill] sm:$0xff] %v6771_v63  ;;  %v6777_v43 = vld [vmem:[%s7839_s9] sm:$0xff] }
 0x885   : > { %2399 = vmatprep.subr.mxu0 %v6765_v1  ;;  %2470 = vmatprep.subr.mxu1 %v6771_v63  ;;  %8071 = vst [vmem:[#allocation24_spill] sm:$0xff] %v6777_v43  ;;  %v6784_v1 = vld [vmem:[%s7839_s9 + $0x10] sm:$0xff]  ;;  %v8073_v30 = vld [vmem:[#allocation67_spill] sm:$0xff] }
 0x886   : > { %2400 = vmatpush1.msra.mxu0 %v6777_v43  ;;  %2433 = vmatprep.mubr.f32.mxu0 %v8043_v60  ;;  %8072 = vst [vmem:[#allocation55_spill] sm:$0xff] %v6784_v1 }
 0x887   : > { %2471 = vmatpush1.msra.mxu1 %v6784_v1  ;;  %2504 = vmatprep.mubr.f32.mxu1 %v8043_v60  ;;  %v8076_v60 = vld [vmem:[#allocation70_spill] sm:$0xff] }
 0x888   : > { %2544 = vmatprep.subr.mxu0 %v6317_v25  ;;  %2615 = vmatprep.subr.mxu1 %v6323_v7 }
 0x927   : > { %v2260_v63 = vpop.f32.mrf.mxu0  ;;  %v2331_v14 = vpop.f32.mrf.mxu1 }
 0x928   : > { %v2336_v6 = vadd.f32 %v2260_v63, %v8073_v30  ;;  %v2338_v4 = vadd.f32 %v2331_v14, %v8075_v11  ;;  %v8080_v30 = vld [vmem:[#allocation45_spill] sm:$0xff] }
 0x929   : > { %v2262_v55 = vpop.f32.mrf.mxu0  ;;  %v2333_v1 = vpop.f32.mrf.mxu1 }
 0x92a   : > { %v3795_v43 = vmul.f32 -1.442695, %v2336_v6  ;;  %v2337_v40 = vadd.f32 %v2262_v55, %v8074_v61  ;;  %v3797_v8 = vmul.f32 -1.442695, %v2338_v4  ;;  %v2339_v9 = vadd.f32 %v2333_v1, %v8076_v60  ;;  %v8081_v1 = vld [vmem:[#allocation44_spill] sm:$0xff] }
 0x92b   : > { %v2365_v60 = vstv %s2364_s30  ;;  %s3821_s30 = sshll.u32 %s4556_s25, 5  ;;  %s3597_s25 = scalar_lea.sflag [#allocation6], %s290_s2 }
 0x92c   : > { %4068 = vpow2.f32 %v3795_v43  ;;  %v3796_v35 = vmul.f32 -1.442695, %v2337_v40  ;;  %vm2366_vm9 = vcmp.lt.s32.totalorder %v2365_v60, %v6246_v17  ;;  %v8079_v43 = vld [vmem:[#allocation43_spill] sm:$0xff]  ;;  %v8090_v60 = vld [vmem:[#allocation54_spill] sm:$0xff] }
 0x92e   : > { %4070 = vpow2.f32 %v3796_v35 }
 0x92f   : > { %4072 = vpow2.f32 %v3797_v8  ;;  %v8078_v8 = vld [vmem:[#allocation42_spill] sm:$0xff] }
 0x930   : > { %4074 = vtanh.f32 %v2339_v9 }
 0x939   : > { %v4069_v25 = vpop.eup %4068 }
 0x93a   : > { %v2349_v12 = vadd.f32 1.0, %v4069_v25 }
 0x93b   : > { %v4071_v7 = vpop.eup %4070 }
 0x93c   : > { %4076 = vrcp.f32 %v2349_v12  ;;  %v2350_v6 = vadd.f32 1.0, %v4071_v7  ;;  %v4073_v61 = vpop.eup %4072 }
 0x93d   : > { %v4075_v55 = vpop.eup %4074  ;;  %v2351_v11 = vadd.f32 1.0, %v4073_v61  ;;  %v8083_v61 = vld [vmem:[#allocation47_spill] sm:$0xff] }
 0x93e   : > { %4078 = vrcp.f32 %v2350_v6  ;;  %v8082_v6 = vld [vmem:[#allocation46_spill] sm:$0xff] }
 0x93f   : > { %4080 = vrcp.f32 %v2351_v11  ;;  %v8088_v11 = vld [vmem:[#allocation53_spill] sm:$0xff] }
 0x949   : > { %v4077_v40 = vpop.eup %4076 }
 0x94a   : > { %v2360_v35 = vmul.f32 %v4077_v40, %v4075_v55  ;;  %v8084_v55 = vld [vmem:[#allocation49_spill] sm:$0xff]  ;;  %v8085_v40 = vld [vmem:[#allocation48_spill] sm:$0xff] }
 0x94b   : > { %v4079_v63 = vpop.eup %4078 }
 0x94c   : > { %v2359_v4 = vmul.f32 %v4079_v63, %v6528_v15  ;;  %v4081_v25 = vpop.eup %4080  ;;  %v8077_v15 = vld [vmem:[#allocation40_spill] sm:$0xff]  ;;  %v8087_v63 = vld [vmem:[#allocation51_spill] sm:$0xff] }
 0x94e   : > { %v6795_v14 = vadd.f32 %v2360_v35, %v2359_v4  ;;  %v8086_v35 = vld [vmem:[#allocation50_spill] sm:$0xff]  ;;  %v8089_v4 = vld [vmem:[#allocation52_spill] sm:$0xff] }
 0x950   : > { %4082 = vtanh.f32 %v6795_v14 }
 0x95d   : > { %v4083_v12 = vpop.eup %4082 }
 0x95e   : > { %v2363_v7 = vmul.f32 %v4083_v12, %v4081_v25  ;;  %v8091_v25 = vld [vmem:[#allocation20_spill] sm:$0xff]  ;;  %v8092_v12 = vld [vmem:[#allocation19_spill] sm:$0xff] }
 0x960   : > { %v2367_v9 = vsel %vm2366_vm9, %v2363_v7, 0.0  ;;  %2434 = vmatmul.mubr.f32.vlgmr.msra.gmra.mxu0 %v2363_v7  ;;  %2505 = vmatmul.mubr.f32.vlgmr.msra.gmra.mxu1 %v2363_v7  ;;  %v8093_v7 = vld [vmem:[#allocation24_spill] sm:$0xff] }
 0x961   : > { %2368 = vst [vmem:[%s4765_s8 + $0x40] sm:$0xff] %v2367_v9  ;;  %2545 = vmatpush1.msra.mxu0 %v6340_v31  ;;  %2616 = vmatpush1.msra.mxu1 %v6346_v37  ;;  %v8094_v9 = vmov 0.0  }
 0x962   : > { %2546 = vmatprep.subr.mxu0 %v6352_v33  ;;  %2617 = vmatprep.subr.mxu1 %v6358_v32 }
 0x963   : > { %2547 = vmatpush1.msra.mxu0 %v6364_v16  ;;  %2618 = vmatpush1.msra.mxu1 %v6370_v41 }
 0x964   : > { %2548 = vmatprep.subr.mxu0 %v6376_v29  ;;  %2619 = vmatprep.subr.mxu1 %v6382_v21 }
 0x965   : > { %2549 = vmatpush1.msra.mxu0 %v6388_v13  ;;  %2620 = vmatpush1.msra.mxu1 %v6394_v27 }
 0x966   : > { %2550 = vmatprep.subr.mxu0 %v6400_v26  ;;  %2621 = vmatprep.subr.mxu1 %v6406_v10 }
 0x967   : > { %2551 = vmatpush1.msra.mxu0 %v6412_v42  ;;  %2622 = vmatpush1.msra.mxu1 %v6418_v44 }
 0x968   : > { %2552 = vmatprep.subr.mxu0 %v6424_v47  ;;  %2623 = vmatprep.subr.mxu1 %v6430_v39 }
 0x969   : > { %2553 = vmatpush1.msra.mxu0 %v6436_v28  ;;  %2624 = vmatpush1.msra.mxu1 %v6442_v18 }
 0x96a   : > { %2554 = vmatprep.subr.mxu0 %v6448_v24  ;;  %2625 = vmatprep.subr.mxu1 %v6556_v45 }
 0x96b   : > { %2555 = vmatpush1.msra.mxu0 %v6455_v19  ;;  %2626 = vmatpush1.msra.mxu1 %v6563_v20 }
 0x96c   : > { %2556 = vmatprep.subr.mxu0 %v6462_v23  ;;  %2627 = vmatprep.subr.mxu1 %v6570_v2 }
 0x96d   : > { %2557 = vmatpush1.msra.mxu0 %v6469_v34  ;;  %2628 = vmatpush1.msra.mxu1 %v6577_v22 }
 0x96e   : > { %2558 = vmatprep.subr.mxu0 %v6476_v36  ;;  %2629 = vmatprep.subr.mxu1 %v6584_v50 }
 0x96f   : > { %2559 = vmatpush1.msra.mxu0 %v6483_v38  ;;  %2630 = vmatpush1.msra.mxu1 %v6591_v46 }
 0x970   : > { %2560 = vmatprep.subr.mxu0 %v6597_v48  ;;  %2631 = vmatprep.subr.mxu1 %v6603_v49 }
 0x971   : > { %2561 = vmatpush1.msra.mxu0 %v6609_v51  ;;  %2632 = vmatpush1.msra.mxu1 %v6615_v52 }
 0x972   : > { %2562 = vmatprep.subr.mxu0 %v6621_v53  ;;  %2633 = vmatprep.subr.mxu1 %v6627_v54 }
 0x973   : > { %2563 = vmatpush1.msra.mxu0 %v6633_v56  ;;  %2634 = vmatpush1.msra.mxu1 %v6639_v57 }
 0x974   : > { %2564 = vmatprep.subr.mxu0 %v6645_v58  ;;  %2635 = vmatprep.subr.mxu1 %v6651_v59 }
 0x975   : > { %2565 = vmatpush1.msra.mxu0 %v6657_v62  ;;  %2636 = vmatpush1.msra.mxu1 %v6663_v0 }
 0x976   : > { %2566 = vmatprep.subr.mxu0 %v6669_v3  ;;  %2637 = vmatprep.subr.mxu1 %v6675_v5 }
 0x977   : > { %2567 = vmatpush1.msra.mxu0 %v8077_v15  ;;  %2638 = vmatpush1.msra.mxu1 %v8078_v8 }
 0x978   : > { %2568 = vmatprep.subr.mxu0 %v8079_v43  ;;  %2639 = vmatprep.subr.mxu1 %v8080_v30 }
 0x979   : > { %2569 = vmatpush1.msra.mxu0 %v8081_v1  ;;  %2640 = vmatpush1.msra.mxu1 %v8082_v6  ;;  %v8100_v1 = vld [vmem:[#allocation72_spill] sm:$0xff] }
 0x97a   : > { %2570 = vmatprep.subr.mxu0 %v8083_v61  ;;  %2641 = vmatprep.subr.mxu1 %v8084_v55  ;;  %v8095_v55 = vld [vmem:[#allocation55_spill] sm:$0xff] }
 0x97b   : > { %2571 = vmatpush1.msra.mxu0 %v8085_v40  ;;  %2642 = vmatpush1.msra.mxu1 %v8086_v35  ;;  %v8096_v35 = vld [vmem:[#allocation39_spill] sm:$0xff] }
 0x97c   : > { %2572 = vmatprep.subr.mxu0 %v8087_v63  ;;  %2643 = vmatprep.subr.mxu1 %v8088_v11  ;;  %v8097_v63 = vld [vmem:[#allocation41_spill] sm:$0xff] }
 0x97d   : > { %2573 = vmatpush1.msra.mxu0 %v8089_v4  ;;  %2644 = vmatpush1.msra.mxu1 %v8090_v60  ;;  %v8098_v4 = vld [vmem:[#allocation71_spill] sm:$0xff] }
 0x97e   : > { %2574 = vmatprep.subr.mxu0 %v8091_v25  ;;  %2645 = vmatprep.subr.mxu1 %v8092_v12  ;;  %v8099_v25 = vld [vmem:[#allocation73_spill] sm:$0xff] }
 0x97f   : > { %2575 = vmatpush1.msra.mxu0 %v8093_v7  ;;  %2608 = vmatprep.mubr.f32.mxu0 %v8094_v9 }
 0x980   : > { %2646 = vmatpush1.msra.mxu1 %v8095_v55  ;;  %2679 = vmatprep.mubr.f32.mxu1 %v8094_v9  ;;  %v8101_v9 = vld [vmem:[#allocation74_spill] sm:$0xff] }
 0x981   : > { %2719 = vmatprep.subr.mxu0 %v8096_v35  ;;  %2790 = vmatprep.subr.mxu1 %v8097_v63 }
 0xa20   : > { %v2435_v11 = vpop.f32.mrf.mxu0  ;;  %v2506_v7 = vpop.f32.mrf.mxu1 }
 0xa21   : > { %v2511_v40 = vadd.f32 %v2435_v11, %v8098_v4  ;;  %v2513_v30 = vadd.f32 %v2506_v7, %v8100_v1  ;;  %v8106_v7 = vld [vmem:[#allocation44_spill] sm:$0xff] }
 0xa22   : > { %v2437_v60 = vpop.f32.mrf.mxu0  ;;  %v2508_v55 = vpop.f32.mrf.mxu1 }
 0xa23   : > { %v3798_v61 = vmul.f32 -1.442695, %v2511_v40  ;;  %v2512_v6 = vadd.f32 %v2437_v60, %v8099_v25  ;;  %v3800_v43 = vmul.f32 -1.442695, %v2513_v30  ;;  %v2514_v8 = vadd.f32 %v2508_v55, %v8101_v9  ;;  %v8107_v9 = vld [vmem:[#allocation46_spill] sm:$0xff] }
 0xa25   : > { %4084 = vpow2.f32 %v3798_v61  ;;  %v3799_v12 = vmul.f32 -1.442695, %v2512_v6 }
 0xa27   : > { %4086 = vpow2.f32 %v3799_v12  ;;  %v8105_v12 = vld [vmem:[#allocation45_spill] sm:$0xff] }
 0xa28   : > { %4088 = vpow2.f32 %v3800_v43  ;;  %v2540_v43 = vstv %s2539_s15  ;;  %s3589_s15 = sadd.s32 15, %s5534_s17 }
 0xa29   : > { %4090 = vtanh.f32 %v2514_v8  ;;  %vm2541_vm10 = vcmp.lt.s32.totalorder %v2540_v43, %v6246_v17  ;;  %v8102_v17 = vld [vmem:[#allocation40_spill] sm:$0xff] }
 0xa2a   : > { %v8116_v43 = vld [vmem:[#allocation20_spill] sm:$0xff] }
 0xa32   : > { %v4085_v35 = vpop.eup %4084 }
 0xa33   : > { %v2524_v15 = vadd.f32 1.0, %v4085_v35 }
 0xa34   : > { %v4087_v63 = vpop.eup %4086 }
 0xa35   : > { %4092 = vrcp.f32 %v2524_v15  ;;  %v2525_v40 = vadd.f32 1.0, %v4087_v63  ;;  %v4089_v11 = vpop.eup %4088  ;;  %v8104_v63 = vld [vmem:[#allocation43_spill] sm:$0xff] }
 0xa36   : > { %v4091_v61 = vpop.eup %4090  ;;  %v2526_v1 = vadd.f32 1.0, %v4089_v11  ;;  %v8109_v11 = vld [vmem:[#allocation49_spill] sm:$0xff] }
 0xa37   : > { %4094 = vrcp.f32 %v2525_v40  ;;  %v8108_v40 = vld [vmem:[#allocation47_spill] sm:$0xff] }
 0xa38   : > { %4096 = vrcp.f32 %v2526_v1  ;;  %v8114_v1 = vld [vmem:[#allocation52_spill] sm:$0xff] }
 0xa42   : > { %v4093_v6 = vpop.eup %4092 }
 0xa43   : > { %v2535_v4 = vmul.f32 %v4093_v6, %v4091_v61  ;;  %v8110_v61 = vld [vmem:[#allocation48_spill] sm:$0xff]  ;;  %v8111_v6 = vld [vmem:[#allocation50_spill] sm:$0xff] }
 0xa44   : > { %v4095_v60 = vpop.eup %4094 }
 0xa45   : > { %v2534_v30 = vmul.f32 %v4095_v60, %v6795_v14  ;;  %v4097_v8 = vpop.eup %4096  ;;  %v8103_v14 = vld [vmem:[#allocation42_spill] sm:$0xff]  ;;  %v8113_v60 = vld [vmem:[#allocation53_spill] sm:$0xff] }
 0xa47   : > { %v6872_v25 = vadd.f32 %v2535_v4, %v2534_v30  ;;  %v8112_v4 = vld [vmem:[#allocation51_spill] sm:$0xff]  ;;  %v8115_v30 = vld [vmem:[#allocation54_spill] sm:$0xff] }
 0xa49   : > { %4098 = vtanh.f32 %v6872_v25 }
 0xa56   : > { %v4099_v15 = vpop.eup %4098 }
 0xa57   : > { %v2538_v55 = vmul.f32 %v4099_v15, %v4097_v8  ;;  %v8117_v8 = vld [vmem:[#allocation19_spill] sm:$0xff]  ;;  %v8118_v15 = vld [vmem:[#allocation24_spill] sm:$0xff] }
 0xa59   : > { %v2542_v35 = vsel %vm2541_vm10, %v2538_v55, 0.0  ;;  %2609 = vmatmul.mubr.f32.vlgmr.msra.gmra.mxu0 %v2538_v55  ;;  %2680 = vmatmul.mubr.f32.vlgmr.msra.gmra.mxu1 %v2538_v55  ;;  %v8119_v55 = vmov 0.0  }
 0xa5a   : > { %2543 = vst [vmem:[%s4765_s8 + $0x48] sm:$0xff] %v2542_v35  ;;  %2720 = vmatpush1.msra.mxu0 %v6340_v31  ;;  %2791 = vmatpush1.msra.mxu1 %v6346_v37  ;;  %v8120_v35 = vld [vmem:[#allocation55_spill] sm:$0xff] }
 0xa5b   : > { %2721 = vmatprep.subr.mxu0 %v6352_v33  ;;  %2792 = vmatprep.subr.mxu1 %v6358_v32 }
 0xa5c   : > { %2722 = vmatpush1.msra.mxu0 %v6364_v16  ;;  %2793 = vmatpush1.msra.mxu1 %v6370_v41 }
 0xa5d   : > { %2723 = vmatprep.subr.mxu0 %v6376_v29  ;;  %2794 = vmatprep.subr.mxu1 %v6382_v21 }
 0xa5e   : > { %2724 = vmatpush1.msra.mxu0 %v6388_v13  ;;  %2795 = vmatpush1.msra.mxu1 %v6394_v27 }
 0xa5f   : > { %2725 = vmatprep.subr.mxu0 %v6400_v26  ;;  %2796 = vmatprep.subr.mxu1 %v6406_v10 }
 0xa60   : > { %2726 = vmatpush1.msra.mxu0 %v6412_v42  ;;  %2797 = vmatpush1.msra.mxu1 %v6418_v44 }
 0xa61   : > { %2727 = vmatprep.subr.mxu0 %v6424_v47  ;;  %2798 = vmatprep.subr.mxu1 %v6430_v39 }
 0xa62   : > { %2728 = vmatpush1.msra.mxu0 %v6436_v28  ;;  %2799 = vmatpush1.msra.mxu1 %v6442_v18 }
 0xa63   : > { %2729 = vmatprep.subr.mxu0 %v6448_v24  ;;  %2800 = vmatprep.subr.mxu1 %v6556_v45 }
 0xa64   : > { %2730 = vmatpush1.msra.mxu0 %v6455_v19  ;;  %2801 = vmatpush1.msra.mxu1 %v6563_v20 }
 0xa65   : > { %2731 = vmatprep.subr.mxu0 %v6462_v23  ;;  %2802 = vmatprep.subr.mxu1 %v6570_v2 }
 0xa66   : > { %2732 = vmatpush1.msra.mxu0 %v6469_v34  ;;  %2803 = vmatpush1.msra.mxu1 %v6577_v22 }
 0xa67   : > { %2733 = vmatprep.subr.mxu0 %v6476_v36  ;;  %2804 = vmatprep.subr.mxu1 %v6584_v50 }
 0xa68   : > { %2734 = vmatpush1.msra.mxu0 %v6483_v38  ;;  %2805 = vmatpush1.msra.mxu1 %v6591_v46 }
 0xa69   : > { %2735 = vmatprep.subr.mxu0 %v6597_v48  ;;  %2806 = vmatprep.subr.mxu1 %v6603_v49 }
 0xa6a   : > { %2736 = vmatpush1.msra.mxu0 %v6609_v51  ;;  %2807 = vmatpush1.msra.mxu1 %v6615_v52 }
 0xa6b   : > { %2737 = vmatprep.subr.mxu0 %v6621_v53  ;;  %2808 = vmatprep.subr.mxu1 %v6627_v54 }
 0xa6c   : > { %2738 = vmatpush1.msra.mxu0 %v6633_v56  ;;  %2809 = vmatpush1.msra.mxu1 %v6639_v57 }
 0xa6d   : > { %2739 = vmatprep.subr.mxu0 %v6645_v58  ;;  %2810 = vmatprep.subr.mxu1 %v6651_v59 }
 0xa6e   : > { %2740 = vmatpush1.msra.mxu0 %v6657_v62  ;;  %2811 = vmatpush1.msra.mxu1 %v6663_v0 }
 0xa6f   : > { %2741 = vmatprep.subr.mxu0 %v6669_v3  ;;  %2812 = vmatprep.subr.mxu1 %v6675_v5 }
 0xa70   : > { %2742 = vmatpush1.msra.mxu0 %v8102_v17  ;;  %2813 = vmatpush1.msra.mxu1 %v8103_v14 }
 0xa71   : > { %2743 = vmatprep.subr.mxu0 %v8104_v63  ;;  %2814 = vmatprep.subr.mxu1 %v8105_v12 }
 0xa72   : > { %2744 = vmatpush1.msra.mxu0 %v8106_v7  ;;  %2815 = vmatpush1.msra.mxu1 %v8107_v9  ;;  %v8125_v9 = vld [vmem:[#allocation76_spill] sm:$0xff] }
 0xa73   : > { %2745 = vmatprep.subr.mxu0 %v8108_v40  ;;  %2816 = vmatprep.subr.mxu1 %v8109_v11 }
 0xa74   : > { %2746 = vmatpush1.msra.mxu0 %v8110_v61  ;;  %2817 = vmatpush1.msra.mxu1 %v8111_v6  ;;  %v8121_v6 = vld [vmem:[#allocation39_spill] sm:$0xff] }
 0xa75   : > { %2747 = vmatprep.subr.mxu0 %v8112_v4  ;;  %2818 = vmatprep.subr.mxu1 %v8113_v60  ;;  %v8122_v4 = vld [vmem:[#allocation41_spill] sm:$0xff] }
 0xa76   : > { %2748 = vmatpush1.msra.mxu0 %v8114_v1  ;;  %2819 = vmatpush1.msra.mxu1 %v8115_v30  ;;  %v8123_v1 = vld [vmem:[#allocation75_spill] sm:$0xff] }
 0xa77   : > { %2749 = vmatprep.subr.mxu0 %v8116_v43  ;;  %2820 = vmatprep.subr.mxu1 %v8117_v8  ;;  %v8124_v43 = vld [vmem:[#allocation77_spill] sm:$0xff] }
 0xa78   : > { %2750 = vmatpush1.msra.mxu0 %v8118_v15  ;;  %2783 = vmatprep.mubr.f32.mxu0 %v8119_v55 }
 0xa79   : > { %2821 = vmatpush1.msra.mxu1 %v8120_v35  ;;  %2854 = vmatprep.mubr.f32.mxu1 %v8119_v55  ;;  %v8126_v55 = vld [vmem:[#allocation78_spill] sm:$0xff] }
 0xa7a   : > { %2894 = vmatprep.subr.mxu0 %v8121_v6  ;;  %2965 = vmatprep.subr.mxu1 %v8122_v4 }
 0xb19   : > { %v2610_v60 = vpop.f32.mrf.mxu0  ;;  %v2681_v15 = vpop.f32.mrf.mxu1 }
 0xb1a   : > { %v2686_v61 = vadd.f32 %v2610_v60, %v8123_v1  ;;  %v2688_v7 = vadd.f32 %v2681_v15, %v8125_v9 }
 0xb1b   : > { %v2612_v30 = vpop.f32.mrf.mxu0  ;;  %v2683_v35 = vpop.f32.mrf.mxu1 }
 0xb1c   : > { %v3801_v11 = vmul.f32 -1.442695, %v2686_v61  ;;  %v2687_v40 = vadd.f32 %v2612_v30, %v8124_v43  ;;  %v3803_v12 = vmul.f32 -1.442695, %v2688_v7  ;;  %v2689_v63 = vadd.f32 %v2683_v35, %v8126_v55  ;;  %v8146_v35 = vld [vmem:[#allocation81_spill] sm:$0xff] }
 0xb1e   : > { %4100 = vpow2.f32 %v3801_v11  ;;  %v3802_v8 = vmul.f32 -1.442695, %v2687_v40 }
 0xb20   : > { %4102 = vpow2.f32 %v3802_v8  ;;  %v6954_v8 = vld [vmem:[%s4749_s13] sm:$0xff]  ;;  %s8202_s13 = sld [smem:[#allocation15_spill]] }
 0xb21   : > { %4104 = vpow2.f32 %v3803_v12 }
 0xb22   : > { %4106 = vtanh.f32 %v2689_v63  ;;  %v2715_v63 = vstv %s2714_s16  ;;  %s3609_s16 = sadd.s32 %s3821_s30, %s5534_s17  ;;  %s4444_s17 = scalar_lea.vmem %s7595_s29, 2048 }
 0xb23   : > { %vm2716_vm11 = vcmp.lt.s32.totalorder %v2715_v63, %v6954_v8  ;;  %s3822_s24 = sshll.u32 %s3609_s16, 7  ;;  %p4445_p7 = scmp.ne.s32.totalorder %s7595_s29, %s4444_s17 }
 0xb24   : > { %s7593_s10 = scalar_lea.hbm %s8203_s7, %s3822_s24 }
 0xb26   : > { %p8204_p11 = scmp.ne.s32.totalorder %s8202_s13, 0 }
 0xb28   : > { %p4446_p4 = pnand %p4445_p7, %p8204_p11 }
 0xb2a   : > { %p4447_p5 = pneg %p4446_p4 }
 0xb2b   : > { %v4101_v6 = vpop.eup %4100 }
 0xb2c   : > { %v2699_v14 = vadd.f32 1.0, %v4101_v6 }
 0xb2d   : > { %v4103_v4 = vpop.eup %4102 }
 0xb2e   : > { %4108 = vrcp.f32 %v2699_v14  ;;  %v2700_v61 = vadd.f32 1.0, %v4103_v4  ;;  %v4105_v11 = vpop.eup %4104 }
 0xb2f   : > { %v4107_v40 = vpop.eup %4106  ;;  %v2701_v9 = vadd.f32 1.0, %v4105_v11  ;;  %v8147_v11 = vld [vmem:[#allocation80_spill] sm:$0xff] }
 0xb30   : > { %4110 = vrcp.f32 %v2700_v61 }
 0xb31   : > { %4112 = vrcp.f32 %v2701_v9 }
 0xb3b   : > { %v4109_v60 = vpop.eup %4108 }
 0xb3c   : > { %v2710_v1 = vmul.f32 %v4109_v60, %v4107_v40 }
 0xb3d   : > { %v4111_v30 = vpop.eup %4110 }
 0xb3e   : > { %v2709_v7 = vmul.f32 %v4111_v30, %v6872_v25  ;;  %v4113_v14 = vpop.eup %4112  ;;  %v8148_v30 = vld [vmem:[#allocation82_spill] sm:$0xff] }
 0xb40   : > { %v6949_v43 = vadd.f32 %v2710_v1, %v2709_v7 }
 0xb42   : > { %4114 = vtanh.f32 %v6949_v43 }
 0xb4f   : > { %v4115_v12 = vpop.eup %4114 }
 0xb50   : > { %v2713_v15 = vmul.f32 %v4115_v12, %v4113_v14 }
 0xb52   : > { %v2717_v55 = vsel %vm2716_vm11, %v2713_v15, 0.0  ;;  %2784 = vmatmul.mubr.f32.vlgmr.msra.gmra.mxu0 %v2713_v15  ;;  %2855 = vmatmul.mubr.f32.vlgmr.msra.gmra.mxu1 %v2713_v15 }
 0xb53   : > { %2718 = vst [vmem:[%s4765_s8 + $0x50] sm:$0xff] %v2717_v55  ;;  %2895 = vmatpush1.msra.mxu0 %v6340_v31  ;;  %2966 = vmatpush1.msra.mxu1 %v6346_v37  ;;  %v8127_v31 = vld [vmem:[#allocation42_spill] sm:$0xff]  ;;  %v8128_v37 = vld [vmem:[#allocation43_spill] sm:$0xff] }
 0xb54   : > { %2896 = vmatprep.subr.mxu0 %v6352_v33  ;;  %2967 = vmatprep.subr.mxu1 %v6358_v32  ;;  %v8129_v33 = vld [vmem:[#allocation45_spill] sm:$0xff]  ;;  %v8130_v32 = vld [vmem:[#allocation44_spill] sm:$0xff] }
 0xb55   : > { %2897 = vmatpush1.msra.mxu0 %v6364_v16  ;;  %2968 = vmatpush1.msra.mxu1 %v6370_v41  ;;  %v8131_v16 = vld [vmem:[#allocation46_spill] sm:$0xff]  ;;  %v8132_v41 = vld [vmem:[#allocation47_spill] sm:$0xff] }
 0xb56   : > { %2898 = vmatprep.subr.mxu0 %v6376_v29  ;;  %2969 = vmatprep.subr.mxu1 %v6382_v21  ;;  %v8133_v29 = vld [vmem:[#allocation49_spill] sm:$0xff]  ;;  %v8134_v21 = vld [vmem:[#allocation48_spill] sm:$0xff] }
 0xb57   : > { %2899 = vmatpush1.msra.mxu0 %v6388_v13  ;;  %2970 = vmatpush1.msra.mxu1 %v6394_v27  ;;  %v8135_v13 = vld [vmem:[#allocation50_spill] sm:$0xff]  ;;  %v8136_v27 = vld [vmem:[#allocation51_spill] sm:$0xff] }
 0xb58   : > { %2900 = vmatprep.subr.mxu0 %v6400_v26  ;;  %2971 = vmatprep.subr.mxu1 %v6406_v10  ;;  %v8137_v26 = vld [vmem:[#allocation53_spill] sm:$0xff]  ;;  %v8138_v10 = vld [vmem:[#allocation52_spill] sm:$0xff] }
 0xb59   : > { %2901 = vmatpush1.msra.mxu0 %v6412_v42  ;;  %2972 = vmatpush1.msra.mxu1 %v6418_v44  ;;  %v8139_v42 = vld [vmem:[#allocation54_spill] sm:$0xff]  ;;  %v8140_v44 = vld [vmem:[#allocation20_spill] sm:$0xff] }
 0xb5a   : > { %2902 = vmatprep.subr.mxu0 %v6424_v47  ;;  %2973 = vmatprep.subr.mxu1 %v6430_v39  ;;  %v8141_v47 = vld [vmem:[#allocation19_spill] sm:$0xff]  ;;  %v8142_v39 = vld [vmem:[#allocation24_spill] sm:$0xff] }
 0xb5b   : > { %2903 = vmatpush1.msra.mxu0 %v6436_v28  ;;  %2974 = vmatpush1.msra.mxu1 %v6442_v18  ;;  %v8143_v28 = vmov 0.0   ;;  %v8144_v18 = vld [vmem:[#allocation55_spill] sm:$0xff] }
 0xb5c   : > { %2904 = vmatprep.subr.mxu0 %v6448_v24  ;;  %2975 = vmatprep.subr.mxu1 %v6556_v45  ;;  %v7025_v24 = vld [vmem:[%s7839_s9 + $0x1e8] sm:$0xff] }
 0xb5d   : > { %2905 = vmatpush1.msra.mxu0 %v6455_v19  ;;  %2976 = vmatpush1.msra.mxu1 %v6563_v20  ;;  %v7031_v19 = vld [vmem:[%s7839_s9 + $0x1f8] sm:$0xff] }
 0xb5e   : > { %2906 = vmatprep.subr.mxu0 %v6462_v23  ;;  %2977 = vmatprep.subr.mxu1 %v6570_v2 }
 0xb5f   : > { %2907 = vmatpush1.msra.mxu0 %v6469_v34  ;;  %2978 = vmatpush1.msra.mxu1 %v6577_v22  ;;  %v8145_v34 = vld [vmem:[#allocation79_spill] sm:$0xff] }
 0xb60   : > { %2908 = vmatprep.subr.mxu0 %v6476_v36  ;;  %2979 = vmatprep.subr.mxu1 %v6584_v50 }
 0xb61   : > { %2909 = vmatpush1.msra.mxu0 %v6483_v38  ;;  %2980 = vmatpush1.msra.mxu1 %v6591_v46 }
 0xb62   : > { %2910 = vmatprep.subr.mxu0 %v6597_v48  ;;  %2981 = vmatprep.subr.mxu1 %v6603_v49 }
 0xb63   : > { %2911 = vmatpush1.msra.mxu0 %v6609_v51  ;;  %2982 = vmatpush1.msra.mxu1 %v6615_v52 }
 0xb64   : > { %2912 = vmatprep.subr.mxu0 %v6621_v53  ;;  %2983 = vmatprep.subr.mxu1 %v6627_v54 }
 0xb65   : > { %2913 = vmatpush1.msra.mxu0 %v6633_v56  ;;  %2984 = vmatpush1.msra.mxu1 %v6639_v57 }
 0xb66   : > { %2914 = vmatprep.subr.mxu0 %v6645_v58  ;;  %2985 = vmatprep.subr.mxu1 %v6651_v59 }
 0xb67   : > { %2915 = vmatpush1.msra.mxu0 %v6657_v62  ;;  %2986 = vmatpush1.msra.mxu1 %v6663_v0 }
 0xb68   : > { %2916 = vmatprep.subr.mxu0 %v6669_v3  ;;  %2987 = vmatprep.subr.mxu1 %v6675_v5 }
 0xb69   : > { %2917 = vmatpush1.msra.mxu0 %v8102_v17  ;;  %2988 = vmatpush1.msra.mxu1 %v8127_v31 }
 0xb6a   : > { %2918 = vmatprep.subr.mxu0 %v8128_v37  ;;  %2989 = vmatprep.subr.mxu1 %v8129_v33 }
 0xb6b   : > { %2919 = vmatpush1.msra.mxu0 %v8130_v32  ;;  %2990 = vmatpush1.msra.mxu1 %v8131_v16 }
 0xb6c   : > { %2920 = vmatprep.subr.mxu0 %v8132_v41  ;;  %2991 = vmatprep.subr.mxu1 %v8133_v29 }
 0xb6d   : > { %2921 = vmatpush1.msra.mxu0 %v8134_v21  ;;  %2992 = vmatpush1.msra.mxu1 %v8135_v13 }
 0xb6e   : > { %2922 = vmatprep.subr.mxu0 %v8136_v27  ;;  %2993 = vmatprep.subr.mxu1 %v8137_v26 }
 0xb6f   : > { %2923 = vmatpush1.msra.mxu0 %v8138_v10  ;;  %2994 = vmatpush1.msra.mxu1 %v8139_v42 }
 0xb70   : > { %2924 = vmatprep.subr.mxu0 %v8140_v44  ;;  %2995 = vmatprep.subr.mxu1 %v8141_v47 }
 0xb71   : > { %2925 = vmatpush1.msra.mxu0 %v8142_v39  ;;  %2958 = vmatprep.mubr.f32.mxu0 %v8143_v28 }
 0xb72   : > { %2996 = vmatpush1.msra.mxu1 %v8144_v18  ;;  %3029 = vmatprep.mubr.f32.mxu1 %v8143_v28 }
 0xb73   : > { %3069 = vmatprep.subr.mxu0 %v7025_v24  ;;  %3140 = vmatprep.subr.mxu1 %v7031_v19 }
 0xc12   : > { %v2785_v23 = vpop.f32.mrf.mxu0  ;;  %v2856_v61 = vpop.f32.mrf.mxu1 }
 0xc13   : > { %v2861_v36 = vadd.f32 %v2785_v23, %v8145_v34  ;;  %v2863_v40 = vadd.f32 %v2856_v61, %v8147_v11 }
 0xc14   : > { %v2787_v38 = vpop.f32.mrf.mxu0  ;;  %v2858_v60 = vpop.f32.mrf.mxu1 }
 0xc15   : > { %v3804_v25 = vmul.f32 -1.442695, %v2861_v36  ;;  %v2862_v6 = vadd.f32 %v2787_v38, %v8146_v35  ;;  %v3806_v1 = vmul.f32 -1.442695, %v2863_v40  ;;  %v2864_v9 = vadd.f32 %v2858_v60, %v8148_v30  ;;  %v7054_v60 = vld [vmem:[%s7839_s9 + $0x1f0] sm:$0xff]  ;;  %v7066_v30 = vld [vmem:[%s7839_s9 + $0x1d8] sm:$0xff] }
 0xc17   : > { %4116 = vpow2.f32 %v3804_v25  ;;  %v3805_v4 = vmul.f32 -1.442695, %v2862_v6  ;;  %v2890_v6 = vstv %s2889_s18 }
 0xc18   : > { %vm2891_vm12 = vcmp.lt.s32.totalorder %v2890_v6, %v6954_v8  ;;  %v7144_v6 = vld [vmem:[%s7839_s9 + $0x160] sm:$0xff] }
 0xc19   : > { %4118 = vpow2.f32 %v3805_v4 }
 0xc1a   : > { %4120 = vpow2.f32 %v3806_v1  ;;  %v7060_v1 = vld [vmem:[%s7839_s9 + $0x1c8] sm:$0xff] }
 0xc1b   : > { %4122 = vtanh.f32 %v2864_v9  ;;  %v7072_v9 = vld [vmem:[%s7839_s9 + $0x1c0] sm:$0xff] }
 0xc24   : > { %v4117_v7 = vpop.eup %4116 }
 0xc25   : > { %v2874_v63 = vadd.f32 1.0, %v4117_v7  ;;  %v7078_v7 = vld [vmem:[%s7839_s9 + $0x1d0] sm:$0xff] }
 0xc26   : > { %v4119_v14 = vpop.eup %4118 }
 0xc27   : > { %4124 = vrcp.f32 %v2874_v63  ;;  %v2875_v12 = vadd.f32 1.0, %v4119_v14  ;;  %v4121_v15 = vpop.eup %4120  ;;  %v7084_v63 = vld [vmem:[%s7839_s9 + $0x1a8] sm:$0xff]  ;;  %v7090_v14 = vld [vmem:[%s7839_s9 + $0x1b8] sm:$0xff] }
 0xc28   : > { %v4123_v55 = vpop.eup %4122  ;;  %v2876_v38 = vadd.f32 1.0, %v4121_v15  ;;  %v7102_v15 = vld [vmem:[%s7839_s9 + $0x1b0] sm:$0xff] }
 0xc29   : > { %4126 = vrcp.f32 %v2875_v12  ;;  %v7096_v12 = vld [vmem:[%s7839_s9 + $0x1a0] sm:$0xff] }
 0xc2a   : > { %4128 = vrcp.f32 %v2876_v38  ;;  %v7132_v38 = vld [vmem:[%s7839_s9 + $0x168] sm:$0xff] }
 0xc34   : > { %v4125_v23 = vpop.eup %4124 }
 0xc35   : > { %v2885_v34 = vmul.f32 %v4125_v23, %v4123_v55  ;;  %v7108_v55 = vld [vmem:[%s7839_s9 + $0x188] sm:$0xff]  ;;  %v7114_v23 = vld [vmem:[%s7839_s9 + $0x198] sm:$0xff] }
 0xc36   : > { %v4127_v36 = vpop.eup %4126 }
 0xc37   : > { %v2884_v25 = vmul.f32 %v4127_v36, %v6949_v43  ;;  %v4129_v4 = vpop.eup %4128  ;;  %v7048_v43 = vld [vmem:[%s7839_s9 + $0x1e0] sm:$0xff]  ;;  %v7126_v36 = vld [vmem:[%s7839_s9 + $0x190] sm:$0xff] }
 0xc39   : > { %v7039_v35 = vadd.f32 %v2885_v34, %v2884_v25  ;;  %v7120_v34 = vld [vmem:[%s7839_s9 + $0x180] sm:$0xff]  ;;  %v7138_v25 = vld [vmem:[%s7839_s9 + $0x178] sm:$0xff] }
 0xc3b   : > { %4130 = vtanh.f32 %v7039_v35 }
 0xc48   : > { %v4131_v61 = vpop.eup %4130 }
 0xc49   : > { %v2888_v11 = vmul.f32 %v4131_v61, %v4129_v4  ;;  %v7150_v4 = vld [vmem:[%s7839_s9 + $0x170] sm:$0xff]  ;;  %v7156_v61 = vld [vmem:[%s7839_s9 + $0x148] sm:$0xff] }
 0xc4b   : > { %v2892_v40 = vsel %vm2891_vm12, %v2888_v11, 0.0  ;;  %2959 = vmatmul.mubr.f32.vlgmr.msra.gmra.mxu0 %v2888_v11  ;;  %3030 = vmatmul.mubr.f32.vlgmr.msra.gmra.mxu1 %v2888_v11  ;;  %v7163_v11 = vld [vmem:[%s7839_s9 + $0x140] sm:$0xff] }
 0xc4c   : > { %2893 = vst [vmem:[%s4765_s8 + $0x58] sm:$0xff] %v2892_v40  ;;  %3070 = vmatpush1.msra.mxu0 %v7048_v43  ;;  %3141 = vmatpush1.msra.mxu1 %v7054_v60  ;;  %v7170_v40 = vld [vmem:[%s7839_s9 + $0x128] sm:$0xff] }
 0xc4d   : > { %3071 = vmatprep.subr.mxu0 %v7060_v1  ;;  %3142 = vmatprep.subr.mxu1 %v7066_v30 }
 0xc4e   : > { %3072 = vmatpush1.msra.mxu0 %v7072_v9  ;;  %3143 = vmatpush1.msra.mxu1 %v7078_v7 }
 0xc4f   : > { %3073 = vmatprep.subr.mxu0 %v7084_v63  ;;  %3144 = vmatprep.subr.mxu1 %v7090_v14 }
 0xc50   : > { %3074 = vmatpush1.msra.mxu0 %v7096_v12  ;;  %3145 = vmatpush1.msra.mxu1 %v7102_v15 }
 0xc51   : > { %3075 = vmatprep.subr.mxu0 %v7108_v55  ;;  %3146 = vmatprep.subr.mxu1 %v7114_v23 }
 0xc52   : > { %3076 = vmatpush1.msra.mxu0 %v7120_v34  ;;  %3147 = vmatpush1.msra.mxu1 %v7126_v36 }
 0xc53   : > { %3077 = vmatprep.subr.mxu0 %v7132_v38  ;;  %3148 = vmatprep.subr.mxu1 %v7138_v25 }
 0xc54   : > { %3078 = vmatpush1.msra.mxu0 %v7144_v6  ;;  %3149 = vmatpush1.msra.mxu1 %v7150_v4 }
 0xc55   : > { %3079 = vmatprep.subr.mxu0 %v7156_v61  ;;  %3150 = vmatprep.subr.mxu1 %v6556_v45  ;;  %v7177_v45 = vld [vmem:[%s7839_s9 + $0x120] sm:$0xff] }
 0xc56   : > { %3080 = vmatpush1.msra.mxu0 %v7163_v11  ;;  %3151 = vmatpush1.msra.mxu1 %v6563_v20  ;;  %v7184_v20 = vld [vmem:[%s7839_s9 + $0x108] sm:$0xff] }
 0xc57   : > { %3081 = vmatprep.subr.mxu0 %v7170_v40  ;;  %3152 = vmatprep.subr.mxu1 %v6570_v2  ;;  %v7191_v2 = vld [vmem:[%s7839_s9 + $0x100] sm:$0xff] }
 0xc58   : > { %3082 = vmatpush1.msra.mxu0 %v7177_v45  ;;  %3153 = vmatpush1.msra.mxu1 %v6577_v22 }
 0xc59   : > { %3083 = vmatprep.subr.mxu0 %v7184_v20  ;;  %3154 = vmatprep.subr.mxu1 %v6584_v50  ;;  %v8149_v50 = vld [vmem:[#allocation83_spill] sm:$0xff] }
 0xc5a   : > { %3084 = vmatpush1.msra.mxu0 %v7191_v2  ;;  %3155 = vmatpush1.msra.mxu1 %v6591_v46 }
 0xc5b   : > { %3085 = vmatprep.subr.mxu0 %v6597_v48  ;;  %3156 = vmatprep.subr.mxu1 %v6603_v49 }
 0xc5c   : > { %3086 = vmatpush1.msra.mxu0 %v6609_v51  ;;  %3157 = vmatpush1.msra.mxu1 %v6615_v52  ;;  %v8150_v51 = vld [vmem:[#allocation85_spill] sm:$0xff] }
 0xc5d   : > { %3087 = vmatprep.subr.mxu0 %v6621_v53  ;;  %3158 = vmatprep.subr.mxu1 %v6627_v54 }
 0xc5e   : > { %3088 = vmatpush1.msra.mxu0 %v6633_v56  ;;  %3159 = vmatpush1.msra.mxu1 %v6639_v57  ;;  %v8151_v56 = vld [vmem:[#allocation84_spill] sm:$0xff] }
 0xc5f   : > { %3089 = vmatprep.subr.mxu0 %v6645_v58  ;;  %3160 = vmatprep.subr.mxu1 %v6651_v59 }
 0xc60   : > { %3090 = vmatpush1.msra.mxu0 %v6657_v62  ;;  %3161 = vmatpush1.msra.mxu1 %v6663_v0  ;;  %v8152_v62 = vld [vmem:[#allocation86_spill] sm:$0xff] }
 0xc61   : > { %3091 = vmatprep.subr.mxu0 %v6669_v3  ;;  %3162 = vmatprep.subr.mxu1 %v6675_v5 }
 0xc62   : > { %3092 = vmatpush1.msra.mxu0 %v8102_v17  ;;  %3163 = vmatpush1.msra.mxu1 %v8127_v31 }
 0xc63   : > { %3093 = vmatprep.subr.mxu0 %v8128_v37  ;;  %3164 = vmatprep.subr.mxu1 %v8129_v33 }
 0xc64   : > { %3094 = vmatpush1.msra.mxu0 %v8130_v32  ;;  %3165 = vmatpush1.msra.mxu1 %v8131_v16 }
 0xc65   : > { %3095 = vmatprep.subr.mxu0 %v8132_v41  ;;  %3166 = vmatprep.subr.mxu1 %v8133_v29 }
 0xc66   : > { %3096 = vmatpush1.msra.mxu0 %v8134_v21  ;;  %3167 = vmatpush1.msra.mxu1 %v8135_v13 }
 0xc67   : > { %3097 = vmatprep.subr.mxu0 %v8136_v27  ;;  %3168 = vmatprep.subr.mxu1 %v8137_v26  ;;  %v3065_v27 = vstv %s3064_s5  ;;  %s4448_s5 = sshll.u32 %s4574_s12, 4  ;;  %s4449_s5 = int_to_ptr.vmem [resolvable:$false] %s4448_s5 }
 0xc68   : > { %3098 = vmatpush1.msra.mxu0 %v8138_v10  ;;  %3169 = vmatpush1.msra.mxu1 %v8139_v42  ;;  %vm3066_vm13 = vcmp.lt.s32.totalorder %v3065_v27, %v6954_v8  ;;  %v7449_v27 = vld [vmem:[%s7839_s9 + $0x28] sm:$0xff]  ;;  %s4450_s6 = scalar_lea.vmem %s4449_s5, 4096  ;;  %p4451_p8 = scmp.lt.s32.totalorder %s7595_s29, %s4449_s5 }
 0xc69   : > { %3099 = vmatprep.subr.mxu0 %v8140_v44  ;;  %3170 = vmatprep.subr.mxu1 %v8141_v47  ;;  %v7264_v47 = vld [vmem:[%s7839_s9 + $0x158] sm:$0xff]  ;;  %8163 = vst [vmem:[#allocation25_spill] sm:$0xff] %v7449_v27  ;;  %p4452_p10 = scmp.lt.s32.totalorder %s4450_s6, %s4444_s17 }
 0xc6a   : > { %3100 = vmatpush1.msra.mxu0 %v8142_v39  ;;  %3133 = vmatprep.mubr.f32.mxu0 %v8143_v28  ;;  %v7271_v39 = vld [vmem:[%s7839_s9 + $0x150] sm:$0xff] }
 0xc6b   : > { %3171 = vmatpush1.msra.mxu1 %v8144_v18  ;;  %3204 = vmatprep.mubr.f32.mxu1 %v8143_v28  ;;  %v7278_v18 = vld [vmem:[%s7839_s9 + $0x138] sm:$0xff]  ;;  %p4453_p12 = por %p4452_p10, %p4451_p8 }
 0xc6c   : > { %3244 = vmatprep.subr.mxu0 %v7025_v24  ;;  %3315 = vmatprep.subr.mxu1 %v7031_v19 }
 0xc6d   : > { %p4454_p9 = pnand %p4453_p12, %p4447_p5 }
 0xd0b   : > { %v2960_v22 = vpop.f32.mrf.mxu0  ;;  %v3031_v54 = vpop.f32.mrf.mxu1 }
 0xd0c   : > { %v3036_v46 = vadd.f32 %v2960_v22, %v8149_v50  ;;  %v3038_v57 = vadd.f32 %v3031_v54, %v8151_v56  ;;  %v7292_v22 = vld [vmem:[%s7839_s9 + $0x118] sm:$0xff]  ;;  %v7299_v50 = vld [vmem:[%s7839_s9 + $0x110] sm:$0xff]  ;;  %v7341_v54 = vld [vmem:[%s7839_s9 + $0xc0] sm:$0xff] }
 0xd0d   : > { %v2962_v48 = vpop.f32.mrf.mxu0  ;;  %v3033_v58 = vpop.f32.mrf.mxu1  ;;  %v7347_v56 = vld [vmem:[%s7839_s9 + $0xd0] sm:$0xff] }
 0xd0e   : > { %v3807_v49 = vmul.f32 -1.442695, %v3036_v46  ;;  %v3037_v52 = vadd.f32 %v2962_v48, %v8150_v51  ;;  %v3809_v59 = vmul.f32 -1.442695, %v3038_v57  ;;  %v3039_v0 = vadd.f32 %v3033_v58, %v8152_v62  ;;  %v7305_v46 = vld [vmem:[%s7839_s9 + $0xe8] sm:$0xff]  ;;  %v7311_v48 = vld [vmem:[%s7839_s9 + $0xf8] sm:$0xff] }
 0xd0f   : > { %v7323_v51 = vld [vmem:[%s7839_s9 + $0xf0] sm:$0xff]  ;;  %v7353_v57 = vld [vmem:[%s7839_s9 + $0xa8] sm:$0xff]  ;;  %v7359_v58 = vld [vmem:[%s7839_s9 + $0xb8] sm:$0xff] }
 0xd10   : > { %4132 = vpow2.f32 %v3807_v49  ;;  %v3808_v53 = vmul.f32 -1.442695, %v3037_v52  ;;  %v7317_v49 = vld [vmem:[%s7839_s9 + $0xe0] sm:$0xff]  ;;  %v7329_v52 = vld [vmem:[%s7839_s9 + $0xc8] sm:$0xff]  ;;  %v7371_v62 = vld [vmem:[%s7839_s9 + $0xb0] sm:$0xff] }
 0xd12   : > { %4134 = vpow2.f32 %v3808_v53  ;;  %v7335_v53 = vld [vmem:[%s7839_s9 + $0xd8] sm:$0xff] }
 0xd13   : > { %4136 = vpow2.f32 %v3809_v59  ;;  %v7365_v59 = vld [vmem:[%s7839_s9 + $0xa0] sm:$0xff] }
 0xd14   : > { %4138 = vtanh.f32 %v3039_v0  ;;  %v7377_v0 = vld [vmem:[%s7839_s9 + $0x88] sm:$0xff] }
 0xd1d   : > { %v4133_v3 = vpop.eup %4132 }
 0xd1e   : > { %v3049_v5 = vadd.f32 1.0, %v4133_v3  ;;  %v7383_v3 = vld [vmem:[%s7839_s9 + $0x98] sm:$0xff] }
 0xd1f   : > { %v4135_v17 = vpop.eup %4134 }
 0xd20   : > { %4140 = vrcp.f32 %v3049_v5  ;;  %v3050_v31 = vadd.f32 1.0, %v4135_v17  ;;  %v4137_v37 = vpop.eup %4136  ;;  %v7389_v5 = vld [vmem:[%s7839_s9 + $0x80] sm:$0xff]  ;;  %v7395_v17 = vld [vmem:[%s7839_s9 + $0x90] sm:$0xff] }
 0xd21   : > { %v4139_v33 = vpop.eup %4138  ;;  %v3051_v29 = vadd.f32 1.0, %v4137_v37  ;;  %8153 = vst [vmem:[#allocation57_spill] sm:$0xff] %v7389_v5  ;;  %8154 = vst [vmem:[#allocation56_spill] sm:$0xff] %v7395_v17  ;;  %v7407_v37 = vld [vmem:[%s7839_s9 + $0x78] sm:$0xff] }
 0xd22   : > { %4142 = vrcp.f32 %v3050_v31  ;;  %v7401_v31 = vld [vmem:[%s7839_s9 + $0x68] sm:$0xff]  ;;  %8156 = vst [vmem:[#allocation26_spill] sm:$0xff] %v7407_v37 }
 0xd23   : > { %4144 = vrcp.f32 %v3051_v29  ;;  %8155 = vst [vmem:[#allocation58_spill] sm:$0xff] %v7401_v31  ;;  %v7437_v29 = vld [vmem:[%s7839_s9 + $0x40] sm:$0xff] }
 0xd24   : > { %8161 = vst [vmem:[#allocation23_spill] sm:$0xff] %v7437_v29 }
 0xd2d   : > { %v4141_v32 = vpop.eup %4140 }
 0xd2e   : > { %v3060_v16 = vmul.f32 %v4141_v32, %v4139_v33  ;;  %v7413_v33 = vld [vmem:[%s7839_s9 + $0x60] sm:$0xff]  ;;  %v7419_v32 = vld [vmem:[%s7839_s9 + $0x70] sm:$0xff] }
 0xd2f   : > { %v4143_v41 = vpop.eup %4142  ;;  %8157 = vst [vmem:[#allocation21_spill] sm:$0xff] %v7413_v33  ;;  %8158 = vst [vmem:[#allocation28_spill] sm:$0xff] %v7419_v32 }
 0xd30   : > { %v3059_v21 = vmul.f32 %v4143_v41, %v7039_v35  ;;  %v4145_v26 = vpop.eup %4144  ;;  %v7285_v35 = vld [vmem:[%s7839_s9 + $0x130] sm:$0xff]  ;;  %v7431_v41 = vld [vmem:[%s7839_s9 + $0x58] sm:$0xff] }
 0xd31   : > { %8160 = vst [vmem:[#allocation30_spill] sm:$0xff] %v7431_v41 }
 0xd32   : > { %v7236_v13 = vadd.f32 %v3060_v16, %v3059_v21  ;;  %v7425_v16 = vld [vmem:[%s7839_s9 + $0x48] sm:$0xff]  ;;  %v7443_v21 = vld [vmem:[%s7839_s9 + $0x50] sm:$0xff] }
 0xd33   : > { %8159 = vst [vmem:[#allocation22_spill] sm:$0xff] %v7425_v16  ;;  %8162 = vst [vmem:[#allocation31_spill] sm:$0xff] %v7443_v21 }
 0xd34   : > { %4146 = vtanh.f32 %v7236_v13 }
 0xd41   : > { %v4147_v10 = vpop.eup %4146 }
 0xd42   : > { %v3063_v42 = vmul.f32 %v4147_v10, %v4145_v26  ;;  %v7455_v26 = vld [vmem:[%s7839_s9 + $0x38] sm:$0xff]  ;;  %v7461_v10 = vld [vmem:[%s7839_s9 + $0x20] sm:$0xff] }
 0xd43   : > { %8164 = vst [vmem:[#allocation32_spill] sm:$0xff] %v7455_v26  ;;  %8165 = vst [vmem:[#allocation27_spill] sm:$0xff] %v7461_v10 }
 0xd44   : > { %v3067_v44 = vsel %vm3066_vm13, %v3063_v42, 0.0  ;;  %3134 = vmatmul.mubr.f32.vlgmr.msra.gmra.mxu0 %v3063_v42  ;;  %3205 = vmatmul.mubr.f32.vlgmr.msra.gmra.mxu1 %v3063_v42  ;;  %v7467_v42 = vld [vmem:[%s7839_s9 + $0x30] sm:$0xff] }
 0xd45   : > { %3068 = vst [vmem:[%s4765_s8 + $0x60] sm:$0xff] %v3067_v44  ;;  %3245 = vmatpush1.msra.mxu0 %v7048_v43  ;;  %3316 = vmatpush1.msra.mxu1 %v7054_v60  ;;  %8166 = vst [vmem:[#allocation34_spill] sm:$0xff] %v7467_v42  ;;  %v7473_v44 = vld [vmem:[%s7839_s9 + $0x8] sm:$0xff] }
 0xd46   : > { %3246 = vmatprep.subr.mxu0 %v7060_v1  ;;  %3317 = vmatprep.subr.mxu1 %v7066_v30  ;;  %8167 = vst [vmem:[#allocation29_spill] sm:$0xff] %v7473_v44 }
 0xd47   : > { %3247 = vmatpush1.msra.mxu0 %v7072_v9  ;;  %3318 = vmatpush1.msra.mxu1 %v7078_v7 }
 0xd48   : > { %3248 = vmatprep.subr.mxu0 %v7084_v63  ;;  %3319 = vmatprep.subr.mxu1 %v7090_v14 }
 0xd49   : > { %3249 = vmatpush1.msra.mxu0 %v7096_v12  ;;  %3320 = vmatpush1.msra.mxu1 %v7102_v15 }
 0xd4a   : > { %3250 = vmatprep.subr.mxu0 %v7108_v55  ;;  %3321 = vmatprep.subr.mxu1 %v7114_v23 }
 0xd4b   : > { %3251 = vmatpush1.msra.mxu0 %v7120_v34  ;;  %3322 = vmatpush1.msra.mxu1 %v7126_v36 }
 0xd4c   : > { %3252 = vmatprep.subr.mxu0 %v7132_v38  ;;  %3323 = vmatprep.subr.mxu1 %v7138_v25 }
 0xd4d   : > { %3253 = vmatpush1.msra.mxu0 %v7144_v6  ;;  %3324 = vmatpush1.msra.mxu1 %v7150_v4 }
 0xd4e   : > { %3254 = vmatprep.subr.mxu0 %v7156_v61  ;;  %3325 = vmatprep.subr.mxu1 %v7264_v47 }
 0xd4f   : > { %3255 = vmatpush1.msra.mxu0 %v7163_v11  ;;  %3326 = vmatpush1.msra.mxu1 %v7271_v39 }
 0xd50   : > { %3256 = vmatprep.subr.mxu0 %v7170_v40  ;;  %3327 = vmatprep.subr.mxu1 %v7278_v18 }
 0xd51   : > { %3257 = vmatpush1.msra.mxu0 %v7177_v45  ;;  %3328 = vmatpush1.msra.mxu1 %v7285_v35 }
 0xd52   : > { %3258 = vmatprep.subr.mxu0 %v7184_v20  ;;  %3329 = vmatprep.subr.mxu1 %v7292_v22 }
 0xd53   : > { %3259 = vmatpush1.msra.mxu0 %v7191_v2  ;;  %3330 = vmatpush1.msra.mxu1 %v7299_v50 }
 0xd54   : > { %3260 = vmatprep.subr.mxu0 %v7305_v46  ;;  %3331 = vmatprep.subr.mxu1 %v7311_v48 }
 0xd55   : > { %3261 = vmatpush1.msra.mxu0 %v7317_v49  ;;  %3332 = vmatpush1.msra.mxu1 %v7323_v51 }
 0xd56   : > { %3262 = vmatprep.subr.mxu0 %v7329_v52  ;;  %3333 = vmatprep.subr.mxu1 %v7335_v53 }
 0xd57   : > { %3263 = vmatpush1.msra.mxu0 %v7341_v54  ;;  %3334 = vmatpush1.msra.mxu1 %v7347_v56 }
 0xd58   : > { %3264 = vmatprep.subr.mxu0 %v7353_v57  ;;  %3335 = vmatprep.subr.mxu1 %v7359_v58 }
 0xd59   : > { %3265 = vmatpush1.msra.mxu0 %v7365_v59  ;;  %3336 = vmatpush1.msra.mxu1 %v7371_v62 }
 0xd5a   : > { %3266 = vmatprep.subr.mxu0 %v7377_v0  ;;  %3337 = vmatprep.subr.mxu1 %v7383_v3 }
 0xd5b   : > { %3267 = vmatpush1.msra.mxu0 %v7389_v5  ;;  %3338 = vmatpush1.msra.mxu1 %v7395_v17 }
 0xd5c   : > { %3268 = vmatprep.subr.mxu0 %v7401_v31  ;;  %3339 = vmatprep.subr.mxu1 %v7407_v37 }
 0xd5d   : > { %3269 = vmatpush1.msra.mxu0 %v7413_v33  ;;  %3340 = vmatpush1.msra.mxu1 %v7419_v32  ;;  %v8173_v33 = vld [vmem:[#allocation88_spill] sm:$0xff] }
 0xd5e   : > { %3270 = vmatprep.subr.mxu0 %v7425_v16  ;;  %3341 = vmatprep.subr.mxu1 %v7431_v41 }
 0xd5f   : > { %3271 = vmatpush1.msra.mxu0 %v7437_v29  ;;  %3342 = vmatpush1.msra.mxu1 %v7443_v21  ;;  %v8172_v29 = vld [vmem:[#allocation89_spill] sm:$0xff] }
 0xd60   : > { %3272 = vmatprep.subr.mxu0 %v7449_v27  ;;  %3343 = vmatprep.subr.mxu1 %v7455_v26  ;;  %v7479_v26 = vld [vmem:[%s7839_s9 + $0x18] sm:$0xff] }
 0xd61   : > { %3273 = vmatpush1.msra.mxu0 %v7461_v10  ;;  %3344 = vmatpush1.msra.mxu1 %v7467_v42  ;;  %8168 = vst [vmem:[#allocation36_spill] sm:$0xff] %v7479_v26  ;;  %v7485_v10 = vld [vmem:[%s7839_s9] sm:$0xff] }
 0xd62   : > { %3274 = vmatprep.subr.mxu0 %v7473_v44  ;;  %3345 = vmatprep.subr.mxu1 %v7479_v26  ;;  %8169 = vst [vmem:[#allocation33_spill] sm:$0xff] %v7485_v10  ;;  %v7492_v44 = vld [vmem:[%s7839_s9 + $0x10] sm:$0xff]  ;;  %v8171_v42 = vld [vmem:[#allocation87_spill] sm:$0xff] }
 0xd63   : > { %3275 = vmatpush1.msra.mxu0 %v7485_v10  ;;  %3308 = vmatprep.mubr.f32.mxu0 %v8143_v28  ;;  %8170 = vst [vmem:[#allocation37_spill] sm:$0xff] %v7492_v44 }
 0xd64   : > { %3346 = vmatpush1.msra.mxu1 %v7492_v44  ;;  %3379 = vmatprep.mubr.f32.mxu1 %v8143_v28  ;;  %v8174_v28 = vld [vmem:[#allocation90_spill] sm:$0xff] }
 0xd65   : > { %3419 = vmatprep.subr.mxu0 %v7025_v24  ;;  %3490 = vmatprep.subr.mxu1 %v7031_v19 }
 0xe04   : > { %v3135_v26 = vpop.f32.mrf.mxu0  ;;  %v3206_v32 = vpop.f32.mrf.mxu1 }
 0xe05   : > { %v3211_v27 = vadd.f32 %v3135_v26, %v8171_v42  ;;  %v3213_v37 = vadd.f32 %v3206_v32, %v8173_v33 }
 0xe06   : > { %v3137_v21 = vpop.f32.mrf.mxu0  ;;  %v3208_v44 = vpop.f32.mrf.mxu1 }
 0xe07   : > { %v3810_v10 = vmul.f32 -1.442695, %v3211_v27  ;;  %v3212_v41 = vadd.f32 %v3137_v21, %v8172_v29  ;;  %v3812_v31 = vmul.f32 -1.442695, %v3213_v37  ;;  %v3214_v17 = vadd.f32 %v3208_v44, %v8174_v28 }
 0xe08   : > { %v3240_v28 = vstv %s3239_s11  ;;  %v3415_v44 = vstv %s3414_s21 }
 0xe09   : > { %4148 = vpow2.f32 %v3810_v10  ;;  %v3811_v16 = vmul.f32 -1.442695, %v3212_v41  ;;  %vm3241_vm14 = vcmp.lt.s32.totalorder %v3240_v28, %v6954_v8  ;;  %vm3416_vm15 = vcmp.lt.s32.totalorder %v3415_v44, %v6954_v8 }
 0xe0b   : > { %4150 = vpow2.f32 %v3811_v16 }
 0xe0c   : > { %4152 = vpow2.f32 %v3812_v31 }
 0xe0d   : > { %4154 = vtanh.f32 %v3214_v17 }
 0xe16   : > { %v4149_v24 = vpop.eup %4148 }
 0xe17   : > { %v3224_v5 = vadd.f32 1.0, %v4149_v24 }
 0xe18   : > { %v4151_v19 = vpop.eup %4150 }
 0xe19   : > { %4156 = vrcp.f32 %v3224_v5  ;;  %v3225_v27 = vadd.f32 1.0, %v4151_v19  ;;  %v4153_v29 = vpop.eup %4152 }
 0xe1a   : > { %v4155_v21 = vpop.eup %4154  ;;  %v3226_v33 = vadd.f32 1.0, %v4153_v29 }
 0xe1b   : > { %4158 = vrcp.f32 %v3225_v27 }
 0xe1c   : > { %4160 = vrcp.f32 %v3226_v33 }
 0xe26   : > { %v4157_v41 = vpop.eup %4156 }
 0xe27   : > { %v3235_v16 = vmul.f32 %v4157_v41, %v4155_v21  ;;  %v8198_v41 = vld [vmem:[#allocation95_spill] sm:$0xff] }
 0xe28   : > { %v4159_v26 = vpop.eup %4158 }
 0xe29   : > { %v3234_v37 = vmul.f32 %v4159_v26, %v7236_v13  ;;  %v4161_v17 = vpop.eup %4160  ;;  %v8195_v13 = vld [vmem:[#allocation93_spill] sm:$0xff] }
 0xe2b   : > { %v7503_v32 = vadd.f32 %v3235_v16, %v3234_v37  ;;  %v8199_v37 = vld [vmem:[#allocation97_spill] sm:$0xff] }
 0xe2d   : > { %4162 = vtanh.f32 %v7503_v32 }
 0xe3a   : > { %v4163_v5 = vpop.eup %4162 }
 0xe3b   : > { %v3238_v31 = vmul.f32 %v4163_v5, %v4161_v17  ;;  %v8200_v5 = vld [vmem:[#allocation96_spill] sm:$0xff] }
 0xe3d   : > { %v3242_v10 = vsel %vm3241_vm14, %v3238_v31, 0.0  ;;  %3309 = vmatmul.mubr.f32.vlgmr.msra.gmra.mxu0 %v3238_v31  ;;  %3380 = vmatmul.mubr.f32.vlgmr.msra.gmra.mxu1 %v3238_v31 }
 0xe3e   : > { %3243 = vst [vmem:[%s4765_s8 + $0x68] sm:$0xff] %v3242_v10  ;;  %3420 = vmatpush1.msra.mxu0 %v7048_v43  ;;  %3491 = vmatpush1.msra.mxu1 %v7054_v60  ;;  %v8175_v43 = vld [vmem:[#allocation57_spill] sm:$0xff]  ;;  %v8176_v60 = vld [vmem:[#allocation56_spill] sm:$0xff] }
 0xe3f   : > { %3421 = vmatprep.subr.mxu0 %v7060_v1  ;;  %3492 = vmatprep.subr.mxu1 %v7066_v30  ;;  %v8177_v1 = vld [vmem:[#allocation58_spill] sm:$0xff] }
 0xe40   : > { %3422 = vmatpush1.msra.mxu0 %v7072_v9  ;;  %3493 = vmatpush1.msra.mxu1 %v7078_v7  ;;  %v8178_v30 = vld [vmem:[#allocation26_spill] sm:$0xff]  ;;  %v8179_v9 = vld [vmem:[#allocation21_spill] sm:$0xff]  ;;  %v8180_v7 = vld [vmem:[#allocation28_spill] sm:$0xff] }
 0xe41   : > { %3423 = vmatprep.subr.mxu0 %v7084_v63  ;;  %3494 = vmatprep.subr.mxu1 %v7090_v14  ;;  %v8181_v63 = vld [vmem:[#allocation22_spill] sm:$0xff] }
 0xe42   : > { %3424 = vmatpush1.msra.mxu0 %v7096_v12  ;;  %3495 = vmatpush1.msra.mxu1 %v7102_v15  ;;  %v8182_v14 = vld [vmem:[#allocation30_spill] sm:$0xff]  ;;  %v8183_v12 = vld [vmem:[#allocation23_spill] sm:$0xff] }
 0xe43   : > { %3425 = vmatprep.subr.mxu0 %v7108_v55  ;;  %3496 = vmatprep.subr.mxu1 %v7114_v23  ;;  %v8184_v15 = vld [vmem:[#allocation31_spill] sm:$0xff]  ;;  %v8185_v55 = vld [vmem:[#allocation25_spill] sm:$0xff]  ;;  %v8186_v23 = vld [vmem:[#allocation32_spill] sm:$0xff] }
 0xe44   : > { %3426 = vmatpush1.msra.mxu0 %v7120_v34  ;;  %3497 = vmatpush1.msra.mxu1 %v7126_v36  ;;  %v8187_v34 = vld [vmem:[#allocation27_spill] sm:$0xff]  ;;  %v8188_v36 = vld [vmem:[#allocation34_spill] sm:$0xff] }
 0xe45   : > { %3427 = vmatprep.subr.mxu0 %v7132_v38  ;;  %3498 = vmatprep.subr.mxu1 %v7138_v25  ;;  %v8189_v38 = vld [vmem:[#allocation29_spill] sm:$0xff]  ;;  %v8190_v25 = vld [vmem:[#allocation36_spill] sm:$0xff] }
 0xe46   : > { %3428 = vmatpush1.msra.mxu0 %v7144_v6  ;;  %3499 = vmatpush1.msra.mxu1 %v7150_v4  ;;  %v8191_v6 = vld [vmem:[#allocation33_spill] sm:$0xff]  ;;  %v8192_v4 = vmov 0.0  }
 0xe47   : > { %3429 = vmatprep.subr.mxu0 %v7156_v61  ;;  %3500 = vmatprep.subr.mxu1 %v7264_v47  ;;  %v8193_v61 = vld [vmem:[#allocation37_spill] sm:$0xff] }
 0xe48   : > { %3430 = vmatpush1.msra.mxu0 %v7163_v11  ;;  %3501 = vmatpush1.msra.mxu1 %v7271_v39 }
 0xe49   : > { %3431 = vmatprep.subr.mxu0 %v7170_v40  ;;  %3502 = vmatprep.subr.mxu1 %v7278_v18  ;;  %v8194_v40 = vld [vmem:[#allocation91_spill] sm:$0xff] }
 0xe4a   : > { %3432 = vmatpush1.msra.mxu0 %v7177_v45  ;;  %3503 = vmatpush1.msra.mxu1 %v7285_v35  ;;  %v8196_v35 = vld [vmem:[#allocation92_spill] sm:$0xff] }
 0xe4b   : > { %3433 = vmatprep.subr.mxu0 %v7184_v20  ;;  %3504 = vmatprep.subr.mxu1 %v7292_v22 }
 0xe4c   : > { %3434 = vmatpush1.msra.mxu0 %v7191_v2  ;;  %3505 = vmatpush1.msra.mxu1 %v7299_v50 }
 0xe4d   : > { %3435 = vmatprep.subr.mxu0 %v7305_v46  ;;  %3506 = vmatprep.subr.mxu1 %v7311_v48  ;;  %v8197_v48 = vld [vmem:[#allocation94_spill] sm:$0xff] }
 0xe4e   : > { %3436 = vmatpush1.msra.mxu0 %v7317_v49  ;;  %3507 = vmatpush1.msra.mxu1 %v7323_v51 }
 0xe4f   : > { %3437 = vmatprep.subr.mxu0 %v7329_v52  ;;  %3508 = vmatprep.subr.mxu1 %v7335_v53 }
 0xe50   : > { %3438 = vmatpush1.msra.mxu0 %v7341_v54  ;;  %3509 = vmatpush1.msra.mxu1 %v7347_v56 }
 0xe51   : > { %3439 = vmatprep.subr.mxu0 %v7353_v57  ;;  %3510 = vmatprep.subr.mxu1 %v7359_v58 }
 0xe52   : > { %3440 = vmatpush1.msra.mxu0 %v7365_v59  ;;  %3511 = vmatpush1.msra.mxu1 %v7371_v62 }
 0xe53   : > { %3441 = vmatprep.subr.mxu0 %v7377_v0  ;;  %3512 = vmatprep.subr.mxu1 %v7383_v3 }
 0xe54   : > { %3442 = vmatpush1.msra.mxu0 %v8175_v43  ;;  %3513 = vmatpush1.msra.mxu1 %v8176_v60  ;;  %v8201_v60 = vld [vmem:[#allocation98_spill] sm:$0xff] }
 0xe55   : > { %3443 = vmatprep.subr.mxu0 %v8177_v1  ;;  %3514 = vmatprep.subr.mxu1 %v8178_v30 }
 0xe56   : > { %3444 = vmatpush1.msra.mxu0 %v8179_v9  ;;  %3515 = vmatpush1.msra.mxu1 %v8180_v7 }
 0xe57   : > { %3445 = vmatprep.subr.mxu0 %v8181_v63  ;;  %3516 = vmatprep.subr.mxu1 %v8182_v14 }
 0xe58   : > { %3446 = vmatpush1.msra.mxu0 %v8183_v12  ;;  %3517 = vmatpush1.msra.mxu1 %v8184_v15 }
 0xe59   : > { %3447 = vmatprep.subr.mxu0 %v8185_v55  ;;  %3518 = vmatprep.subr.mxu1 %v8186_v23 }
 0xe5a   : > { %3448 = vmatpush1.msra.mxu0 %v8187_v34  ;;  %3519 = vmatpush1.msra.mxu1 %v8188_v36 }
 0xe5b   : > { %3449 = vmatprep.subr.mxu0 %v8189_v38  ;;  %3520 = vmatprep.subr.mxu1 %v8190_v25  ;;  %v3590_v25 = vstv %s3589_s15 }
 0xe5c   : > { %3450 = vmatpush1.msra.mxu0 %v8191_v6  ;;  %3483 = vmatprep.mubr.f32.mxu0 %v8192_v4  ;;  %vm3591_vm0 = vcmp.lt.s32.totalorder %v3590_v25, %v6954_v8 }
 0xe5d   : > { %3521 = vmatpush1.msra.mxu1 %v8193_v61  ;;  %3554 = vmatprep.mubr.f32.mxu1 %v8192_v4 }
 0xefd   : > { %v3310_v11 = vpop.f32.mrf.mxu0  ;;  %v3381_v18 = vpop.f32.mrf.mxu1 }
 0xefe   : > { %v3386_v45 = vadd.f32 %v3310_v11, %v8194_v40  ;;  %v3388_v22 = vadd.f32 %v3381_v18, %v8196_v35 }
 0xeff   : > { %v3312_v20 = vpop.f32.mrf.mxu0  ;;  %v3383_v50 = vpop.f32.mrf.mxu1 }
 0xf00   : > { %v3813_v2 = vmul.f32 -1.442695, %v3386_v45  ;;  %v3387_v47 = vadd.f32 %v3312_v20, %v8195_v13  ;;  %v3815_v46 = vmul.f32 -1.442695, %v3388_v22  ;;  %v3389_v49 = vadd.f32 %v3383_v50, %v8197_v48 }
 0xf02   : > { %4164 = vpow2.f32 %v3813_v2  ;;  %v3814_v39 = vmul.f32 -1.442695, %v3387_v47 }
 0xf04   : > { %4166 = vpow2.f32 %v3814_v39 }
 0xf05   : > { %4168 = vpow2.f32 %v3815_v46 }
 0xf06   : > { %4170 = vtanh.f32 %v3389_v49 }
 0xf0f   : > { %v4165_v51 = vpop.eup %4164 }
 0xf10   : > { %v3399_v52 = vadd.f32 1.0, %v4165_v51 }
 0xf11   : > { %v4167_v53 = vpop.eup %4166 }
 0xf12   : > { %4172 = vrcp.f32 %v3399_v52  ;;  %v3400_v54 = vadd.f32 1.0, %v4167_v53  ;;  %v4169_v56 = vpop.eup %4168 }
 0xf13   : > { %v4171_v57 = vpop.eup %4170  ;;  %v3401_v0 = vadd.f32 1.0, %v4169_v56 }
 0xf14   : > { %4174 = vrcp.f32 %v3400_v54 }
 0xf15   : > { %4176 = vrcp.f32 %v3401_v0 }
 0xf1f   : > { %v4173_v58 = vpop.eup %4172 }
 0xf20   : > { %v3410_v59 = vmul.f32 %v4173_v58, %v4171_v57 }
 0xf21   : > { %v4175_v62 = vpop.eup %4174 }
 0xf22   : > { %v3409_v3 = vmul.f32 %v4175_v62, %v7503_v32  ;;  %v4177_v24 = vpop.eup %4176 }
 0xf24   : > { %v3411_v42 = vadd.f32 %v3410_v59, %v3409_v3 }
 0xf26   : > { %4178 = vtanh.f32 %v3411_v42 }
 0xf33   : > { %v4179_v19 = vpop.eup %4178 }
 0xf34   : > { %v3413_v27 = vmul.f32 %v4179_v19, %v4177_v24 }
 0xf36   : > { %v3417_v29 = vsel %vm3416_vm15, %v3413_v27, 0.0  ;;  %3484 = vmatmul.mubr.f32.vlgmr.msra.gmra.mxu0 %v3413_v27  ;;  %3555 = vmatmul.mubr.f32.vlgmr.msra.gmra.mxu1 %v3413_v27 }
 0xf37   : > { %3418 = vst [vmem:[%s4765_s8 + $0x70] sm:$0xff] %v3417_v29 }
 0xff6   : > { %v3485_v21 = vpop.f32.mrf.mxu0  ;;  %v3556_v17 = vpop.f32.mrf.mxu1 }
 0xff7   : > { %v3561_v16 = vadd.f32 %v3485_v21, %v8198_v41  ;;  %v3563_v31 = vadd.f32 %v3556_v17, %v8200_v5 }
 0xff8   : > { %v3487_v26 = vpop.f32.mrf.mxu0  ;;  %v3558_v10 = vpop.f32.mrf.mxu1 }
 0xff9   : > { %v3816_v33 = vmul.f32 -1.442695, %v3561_v16  ;;  %v3562_v32 = vadd.f32 %v3487_v26, %v8199_v37  ;;  %v3818_v43 = vmul.f32 -1.442695, %v3563_v31  ;;  %v3564_v1 = vadd.f32 %v3558_v10, %v8201_v60 }
 0xffb   : > { %4180 = vpow2.f32 %v3816_v33  ;;  %v3817_v28 = vmul.f32 -1.442695, %v3562_v32 }
 0xffd   : > { %4182 = vpow2.f32 %v3817_v28 }
 0xffe   : > { %4184 = vpow2.f32 %v3818_v43 }
 0xfff   : > { %4186 = vtanh.f32 %v3564_v1 }
0x1008   : > { %v4181_v30 = vpop.eup %4180 }
0x1009   : > { %v3574_v9 = vadd.f32 1.0, %v4181_v30 }
0x100a   : > { %v4183_v7 = vpop.eup %4182 }
0x100b   : > { %4188 = vrcp.f32 %v3574_v9  ;;  %v3575_v63 = vadd.f32 1.0, %v4183_v7  ;;  %v4185_v14 = vpop.eup %4184 }
0x100c   : > { %v4187_v12 = vpop.eup %4186  ;;  %v3576_v34 = vadd.f32 1.0, %v4185_v14 }
0x100d   : > { %4190 = vrcp.f32 %v3575_v63 }
0x100e   : > { %4192 = vrcp.f32 %v3576_v34 }
0x1018   : > { %v4189_v15 = vpop.eup %4188 }
0x1019   : > { %v3585_v55 = vmul.f32 %v4189_v15, %v4187_v12 }
0x101a   : > { %v4191_v23 = vpop.eup %4190 }
0x101b   : > { %v3584_v36 = vmul.f32 %v4191_v23, %v3411_v42  ;;  %v4193_v6 = vpop.eup %4192 }
0x101d   : > { %v3586_v38 = vadd.f32 %v3585_v55, %v3584_v36 }
0x101f   : > { %4194 = vtanh.f32 %v3586_v38  ;;  %3595 = vst [vmem:[#allocation3] sm:$0xff] %v3586_v38 }
0x102c   : > { %v4195_v4 = vpop.eup %4194 }
0x102d   : > { %v3588_v61 = vmul.f32 %v4195_v4, %v4193_v6 }
0x102f   : > { %v3592_v11 = vsel %vm3591_vm0, %v3588_v61, 0.0  ;;  %3594 = vst [vmem:[#allocation2] sm:$0xff] %v3588_v61 }
0x1030   : > { %3593 = vst [vmem:[%s4765_s8 + $0x78] sm:$0xff] %v3592_v11 }
0x1031   : > { %4457 = shalt.err (!%p4454_p9)
}
0x1032   : > { %s4458_s8 = scalar_lea.hbm %s7593_s10, 2048  ;;  %s4462_s21 = scalar_lea.hbm %s8203_s7, 8192 }
0x1033   : > { %p4459_p0 = scmp.ne.s32.totalorder %s7593_s10, %s4458_s8  ;;  %p4463_p6 = scmp.lt.s32.totalorder %s7593_s10, %s8203_s7 }
0x1034   : > { %p4464_p1 = scmp.lt.s32.totalorder %s4462_s21, %s4458_s8 }
0x1035   : > { %p4460_p2 = pnand %p4459_p0, %p8204_p11 }
0x1036   : > { %p4465_p3 = por %p4464_p1, %p4463_p6 }
0x1037   : > { %p4461_p13 = pneg %p4460_p2 }
0x1039   : > { %p4466_p7 = pnand %p4465_p3, %p4461_p13 }
0x103b   : > { %4469 = shalt.err (!%p4466_p7)
}
0x103c   : > { %3831 = dma.vmem_to_hbm [thread:$0]  (%p8204_p11), %s7595_s29, 2048, %s7593_s10, %s3597_s25  }
0x103d PF: > { %s8205_s16 = sld [smem:[#allocation13_spill]]  ;;  %p3848_p4 = scmp.ge.s32.totalorder %s4568_s28, 2 }
0x103e   : > { %s8206_s24 = sld [smem:[#allocation16_spill]] }
0x1043   : > { %s3625_s14 = sand.u32 1, %s8205_s16  }
0x1044   : > { %p8207_p5 = scmp.ne.s32.totalorder %s8206_s24, 0  ;;  %s3626_s18 = scalar_lea.sflag [#allocation6], %s3625_s14 }
0x1046   : > { %p3842_p8 = pnand %p3848_p4, %p8207_p5 }
0x1048   : > { %p3843_p10 = pneg %p3842_p8 }
0x104a   : > { %4523 = dma.done.wait (%p3843_p10), %s3626_s18, 2048  }
0x104b   : > { %4525 = vsyncadd (%p3843_p10), %s3626_s18, 4294965248  ;;  %s22_s28 = sadd.s32 1, %s4568_s28   ;;  %s8208_s24 = sld [smem:[#allocation14_spill]] }
0x104c   : > { %p19_p12 = scmp.ge.s32.totalorder %s22_s28, 6   ;;  %s8209_s13 = sld [smem:[#allocation17_spill]] }
0x104d   : > { %s8210_s29 = sld [smem:[#allocation18_spill]]  ;;  %s8211_s18 = smov %s4532_s19 }
0x104e   : > { %s8212_s19 = smov %s4536_s20  ;;  %s8213_s20 = smov %s4725_s26 }
0x104f   : > { %s8214_s21 = smov %s4544_s22  ;;  %s8215_s22 = smov %s4548_s23 }
0x1050   : > { %s8216_s23 = smov %s4720_s3  ;;  %s8217_s25 = smov %s4564_s27 }
0x1051   :  { %21 = sbr.rel (!%p19_p12) target bundleno = 14 (0xe), region = 97 }
0x1052   : > { %s8218_s26 = smov %s8209_s13 }
0x1053   : > { %s8219_s27 = smov %s8210_s29 }
0x1056   :  { %3631 = vsyncpa [#allocation5], 1 }
0x1057   :  { %3633 = vsyncpa [#allocation5 + $0x1], 1 }
0x1058   :  { %3634 = vsyncpa [#allocation8], 1 }
0x1059   :  { %3636 = vsyncpa [#allocation8 + $0x1], 1 }
0x105a   :  { %3637 = vsyncpa [#allocation6], 1 }
0x105b   :  { %3639 = vsyncpa [#allocation6 + $0x1], 1 }

</bundles_post_ra>
